<compile_context>
chip_gen: v7x
topology: tpu7x:2x2x1
jax: 0.10.0
libtpu: 0.0.40
codegen_flags: <defaults>
</compile_context>

<pallas_src>
import functools
import math

import jax
import jax.numpy as jnp
from jax.experimental import pallas as pl
from jax.experimental.pallas import tpu as pltpu

# ----------------------------- config (small synthetic CLIP) -----------------------
NUM_EXPERTS = 3
IMG_SIZE = 16
PATCH = 8
IN_CH = 3
V_WIDTH = 64      # visual transformer width
V_HEADS = 4
V_LAYERS = 2
T_WIDTH = 32      # text transformer width
T_HEADS = 2
T_LAYERS = 2
CTX = 8           # text context length
VOCAB = 49
EMBED = 32        # joint embedding dim
LORA_R = 12
LORA_ALPHA = 24
LOGIT_SCALE = 1.0 / 0.07   # exp(ln(1/0.07)), CLIP's initial logit_scale


# ----------------------------- Pallas kernels --------------------------------------
def _matmul_kernel(x_ref, w_ref, o_ref):
    # bf16 MXU matmul, f32 accumulate (no bias: CLIP conv1 / projections are bias-free)
    o_ref[...] = jnp.dot(x_ref[...].astype(jnp.bfloat16), w_ref[...],
                         preferred_element_type=jnp.float32)


def _layernorm_kernel(x_ref, g_ref, b_ref, o_ref):
    x = x_ref[...]
    mu = jnp.mean(x, axis=-1, keepdims=True)
    var = jnp.mean((x - mu) ** 2, axis=-1, keepdims=True)
    o_ref[...] = (x - mu) * jax.lax.rsqrt(var + 1e-5) * g_ref[...] + b_ref[...]


def _ln_proj_kernel(x_ref, g_ref, b_ref, w_ref, o_ref):
    # fused LayerNorm + (bias-free) projection
    x = x_ref[...]
    mu = jnp.mean(x, axis=-1, keepdims=True)
    var = jnp.mean((x - mu) ** 2, axis=-1, keepdims=True)
    h = (x - mu) * jax.lax.rsqrt(var + 1e-5) * g_ref[...] + b_ref[...]
    o_ref[...] = jnp.dot(h.astype(jnp.bfloat16), w_ref[...],
                         preferred_element_type=jnp.float32)


def _attn_block_kernel(L, H, dh, scale, causal, lora_scale,
                       x_ref, g1_ref, b1_ref, wqkv_ref, bqkv_ref,
                       wout_ref, bout_ref, *rest):
    # Fused:  LN1 -> QKV -> per-head softmax(QK^T)V -> out_proj (+LoRA) -> +residual
    # One grid step = one (expert, batch-element) pair; block is the full (L, D) slab.
    if lora_scale is not None:
        la_ref, lb_ref, o_ref = rest
    else:
        (o_ref,) = rest
    D = H * dh
    x = x_ref[0, 0]                                        # (L, D) f32 residual input

    # --- LayerNorm 1 (f32) ---
    mu = jnp.mean(x, axis=-1, keepdims=True)
    var = jnp.mean((x - mu) ** 2, axis=-1, keepdims=True)
    h = (x - mu) * jax.lax.rsqrt(var + 1e-5) * g1_ref[...] + b1_ref[...]

    # --- fused QKV projection (bf16 MXU, f32 accumulate) ---
    qkv = jnp.dot(h.astype(jnp.bfloat16), wqkv_ref[0],
                  preferred_element_type=jnp.float32) + bqkv_ref[0]   # (L, 3D)
    q = qkv[:, 0 * D:1 * D] * scale
    k = qkv[:, 1 * D:2 * D]
    v = qkv[:, 2 * D:3 * D]

    if causal:
        ri = jax.lax.broadcasted_iota(jnp.int32, (L, L), 0)
        ci = jax.lax.broadcasted_iota(jnp.int32, (L, L), 1)

    # --- attention, per head (unrolled at trace time; lane slices only) ---
    head_outs = []
    for hh in range(H):
        sl = slice(hh * dh, (hh + 1) * dh)
        s = jax.lax.dot_general(q[:, sl], k[:, sl],
                                (((1,), (1,)), ((), ())),
                                preferred_element_type=jnp.float32)    # (L, L)
        if causal:
            s = jnp.where(ci > ri, jnp.float32(-1e9), s)
        s = s - jnp.max(s, axis=-1, keepdims=True)
        p = jnp.exp(s)
        p = p * pl.reciprocal(jnp.sum(p, axis=-1, keepdims=True), approx=True)
        head_outs.append(jnp.dot(p.astype(jnp.bfloat16),
                                 v[:, sl].astype(jnp.bfloat16),
                                 preferred_element_type=jnp.float32))  # (L, dh)
    attn = jnp.concatenate(head_outs, axis=-1)                          # (L, D)

    # --- out_proj (+ LoRA) + residual, fused epilogue ---
    a16 = attn.astype(jnp.bfloat16)
    out = jnp.dot(a16, wout_ref[0], preferred_element_type=jnp.float32) + bout_ref[0]
    if lora_scale is not None:
        low = jnp.dot(a16, la_ref[0], preferred_element_type=jnp.float32)
        out = out + lora_scale * jnp.dot(low.astype(jnp.bfloat16), lb_ref[0],
                                         preferred_element_type=jnp.float32)
    o_ref[0, 0] = x + out


def _mlp_block_kernel(x_ref, g_ref, b_ref, w1_ref, b1_ref, w2_ref, b2_ref, o_ref):
    # Fused: LN2 -> fc -> QuickGELU -> proj -> +residual  (f32 epilogue math)
    x = x_ref[...]
    mu = jnp.mean(x, axis=-1, keepdims=True)
    var = jnp.mean((x - mu) ** 2, axis=-1, keepdims=True)
    h = (x - mu) * jax.lax.rsqrt(var + 1e-5) * g_ref[...] + b_ref[...]
    h1 = jnp.dot(h.astype(jnp.bfloat16), w1_ref[...],
                 preferred_element_type=jnp.float32) + b1_ref[...]
    h1 = h1 * jax.nn.sigmoid(1.702 * h1)                 # QuickGELU
    h2 = jnp.dot(h1.astype(jnp.bfloat16), w2_ref[...],
                 preferred_element_type=jnp.float32) + b2_ref[...]
    o_ref[...] = x + h2


def _clip_logits_kernel(scale, img_ref, txt_ref, o_ref):
    img = img_ref[...]
    txt = txt_ref[...]
    img = img * jax.lax.rsqrt(jnp.sum(img * img, axis=-1, keepdims=True) + 1e-12)
    txt = txt * jax.lax.rsqrt(jnp.sum(txt * txt, axis=-1, keepdims=True) + 1e-12)
    o_ref[...] = scale * jax.lax.dot_general(
        img.astype(jnp.bfloat16), txt.astype(jnp.bfloat16),
        (((1,), (1,)), ((), ())), preferred_element_type=jnp.float32)


# ----------------------------- kernel wrappers --------------------------------------
def matmul(x, w):
    m = x.shape[0]
    n = w.shape[1]
    return pl.pallas_call(
        _matmul_kernel, out_shape=jax.ShapeDtypeStruct((m, n), jnp.float32)
    )(x, w)


def layernorm(x, g, b):
    m, d = x.shape
    return pl.pallas_call(
        _layernorm_kernel, out_shape=jax.ShapeDtypeStruct((m, d), jnp.float32)
    )(x, g.reshape(1, d), b.reshape(1, d))


def ln_proj(x, g, b, w):
    m, d = x.shape
    n = w.shape[1]
    return pl.pallas_call(
        _ln_proj_kernel, out_shape=jax.ShapeDtypeStruct((m, n), jnp.float32)
    )(x, g.reshape(1, d), b.reshape(1, d), w)


def mlp_block(x, g, b, w1, b1, w2, b2):
    m, d = x.shape
    return pl.pallas_call(
        _mlp_block_kernel, out_shape=jax.ShapeDtypeStruct((m, d), jnp.float32)
    )(x, g.reshape(1, d), b.reshape(1, d), w1, b1.reshape(1, -1), w2, b2.reshape(1, -1))


def attn_block(x, ln_g, ln_b, wqkv, bqkv, wout, bout,
               lora_a=None, lora_b=None, lora_scale=None,
               *, heads, causal=False, broadcast_experts=False):
    # x: (Ex, B, L, D) f32 with Ex in {1, E}; stacked expert weights: leading axis E.
    E, D, _ = wqkv.shape
    _, B, L, _ = x.shape
    dh = D // heads
    scale = 1.0 / math.sqrt(dh)

    x_map = (lambda e, b: (0, b, 0, 0)) if broadcast_experts else (lambda e, b: (e, b, 0, 0))
    w_map = lambda e, b: (e, 0, 0)
    s_map = lambda e, b: (0, 0)

    in_specs = [
        pl.BlockSpec((1, 1, L, D), x_map),
        pl.BlockSpec((1, D), s_map),
        pl.BlockSpec((1, D), s_map),
        pl.BlockSpec((1, D, 3 * D), w_map),
        pl.BlockSpec((1, 1, 3 * D), w_map),
        pl.BlockSpec((1, D, D), w_map),
        pl.BlockSpec((1, 1, D), w_map),
    ]
    args = [x, ln_g.reshape(1, D), ln_b.reshape(1, D), wqkv, bqkv, wout, bout]
    ls = None
    if lora_a is not None:
        R = lora_a.shape[-1]
        in_specs += [pl.BlockSpec((1, D, R), w_map),
                     pl.BlockSpec((1, R, D), w_map)]
        args += [lora_a, lora_b]
        ls = float(lora_scale)

    kern = functools.partial(_attn_block_kernel, L, heads, dh, scale, causal, ls)
    return pl.pallas_call(
        kern,
        grid=(E, B),
        in_specs=in_specs,
        out_specs=pl.BlockSpec((1, 1, L, D), lambda e, b: (e, b, 0, 0)),
        out_shape=jax.ShapeDtypeStruct((E, B, L, D), jnp.float32),
        compiler_params=pltpu.CompilerParams(
            dimension_semantics=("parallel", "parallel")),
    )(*args)


def clip_logits(img_feat, txt_feat, logit_scale):
    m = img_feat.shape[0]
    t = txt_feat.shape[0]
    return pl.pallas_call(
        functools.partial(_clip_logits_kernel, float(logit_scale)),
        out_shape=jax.ShapeDtypeStruct((m, t), jnp.float32),
    )(img_feat, txt_feat)


# ----------------------------- model (glue + fused kernels) -------------------------
def encode_image(params, image):
    # image: (B, C, H, W) NCHW.  Prologue runs at batch B (not E*B): the expert
    # replication is folded into the first resblock's index_map.
    B, C, H, W = image.shape
    gy, gx = H // PATCH, W // PATCH
    npatch = gy * gx
    L = npatch + 1
    patches = (
        image.reshape(B, C, gy, PATCH, gx, PATCH)
        .transpose(0, 2, 4, 1, 3, 5)
        .reshape(B * npatch, C * PATCH * PATCH)
    )
    xp = matmul(patches, params["patch_w"]).reshape(B, npatch, V_WIDTH)   # conv1, no bias
    cls = jnp.broadcast_to(params["cls"], (B, 1, V_WIDTH))
    x = jnp.concatenate([cls, xp], axis=1) + params["pos"]                # (B, L, D)
    x = layernorm(x.reshape(B * L, V_WIDTH),
                  params["ln_pre_g"], params["ln_pre_b"]).reshape(1, B, L, V_WIDTH)

    for i, blk in enumerate(params["v_blocks"]):
        # Expert i of ParallelMultiheadAttention keeps only batch slice i; attention
        # never mixes batch elements, so running expert e on its own slice is exact.
        x = attn_block(x, blk["ln1_g"], blk["ln1_b"],
                       blk["wqkv"], blk["bqkv"], blk["wout"], blk["bout"],
                       lora_a=blk["lora_a"], lora_b=blk["lora_b"],
                       lora_scale=blk["lora_scale"],
                       heads=V_HEADS, causal=False, broadcast_experts=(i == 0))
        E = x.shape[0]
        x = mlp_block(x.reshape(E * B * L, V_WIDTH),
                      blk["ln2_g"], blk["ln2_b"],
                      blk["fc_w"], blk["fc_b"], blk["proj_w"], blk["proj_b"]
                      ).reshape(E, B, L, V_WIDTH)

    cls_tok = x[:, :, 0, :].reshape(NUM_EXPERTS * B, V_WIDTH)   # row order = e*B + b
    return ln_proj(cls_tok, params["ln_post_g"], params["ln_post_b"], params["v_proj"])


def encode_text(params, text):
    # text: (T, CTX) int32 tokens; embedding gather stays in glue.
    T = text.shape[0]
    x = params["tok_emb"][text] + params["t_pos"]               # (T, CTX, Dt)
    x = x.reshape(1, T, CTX, T_WIDTH)
    for blk in params["t_blocks"]:
        x = attn_block(x, blk["ln1_g"], blk["ln1_b"],
                       blk["wqkv"], blk["bqkv"], blk["wout"], blk["bout"],
                       heads=T_HEADS, causal=True)
        x = mlp_block(x.reshape(T * CTX, T_WIDTH),
                      blk["ln2_g"], blk["ln2_b"],
                      blk["fc_w"], blk["fc_b"], blk["proj_w"], blk["proj_b"]
                      ).reshape(1, T, CTX, T_WIDTH)
    x = x.reshape(T, CTX, T_WIDTH)
    eot = x[jnp.arange(T), jnp.argmax(text, axis=-1)]           # (T, Dt)  glue gather
    # ln_final is row-wise, so applying it only to the EOT rows is exact.
    return ln_proj(eot, params["ln_final_g"], params["ln_final_b"], params["text_proj"])


def multi_expert_clip_forward(params, image, text):
    # expanded_image = cat([image]*E) is never materialized (first-layer index_map).
    img_feat = encode_image(params, image)                      # (E*B, EMBED), e-major
    txt_feat = encode_text(params, text)                        # (T, EMBED)
    logits = clip_logits(img_feat, txt_feat, params["logit_scale"])  # (E*B, T)
    T = text.shape[0]
    image_logits = logits.reshape(NUM_EXPERTS, -1, T)
    # reference intentionally overwrites text_logits with a permute of image_logits
    text_logits = jnp.transpose(image_logits, (0, 2, 1))
    return image_logits, text_logits


# ----------------------------- deterministic synthetic params -----------------------
def init_params(key):
    keys = iter(jax.random.split(key, 512))

    def nrm(shape, std=0.02):
        return (std * jax.random.normal(next(keys), shape)).astype(jnp.float32)

    def nrm16(shape, std=0.02):
        return nrm(shape, std).astype(jnp.bfloat16)   # matmul weights stored bf16

    L = (IMG_SIZE // PATCH) ** 2 + 1
    p = {
        "patch_w": nrm16((IN_CH * PATCH * PATCH, V_WIDTH)),
        "cls": nrm((V_WIDTH,)),
        "pos": nrm((L, V_WIDTH)),
        "ln_pre_g": jnp.ones((V_WIDTH,), jnp.float32),
        "ln_pre_b": jnp.zeros((V_WIDTH,), jnp.float32),
        "ln_post_g": jnp.ones((V_WIDTH,), jnp.float32),
        "ln_post_b": jnp.zeros((V_WIDTH,), jnp.float32),
        "v_proj": nrm16((V_WIDTH, EMBED)),
        "tok_emb": nrm((VOCAB, T_WIDTH)),
        "t_pos": nrm((CTX, T_WIDTH)),
        "ln_final_g": jnp.ones((T_WIDTH,), jnp.float32),
        "ln_final_b": jnp.zeros((T_WIDTH,), jnp.float32),
        "text_proj": nrm16((T_WIDTH, EMBED)),
        "logit_scale": LOGIT_SCALE,
    }

    v_blocks = []
    for _ in range(V_LAYERS):
        v_blocks.append(dict(
            ln1_g=jnp.ones((V_WIDTH,), jnp.float32),
            ln1_b=jnp.zeros((V_WIDTH,), jnp.float32),
            ln2_g=jnp.ones((V_WIDTH,), jnp.float32),
            ln2_b=jnp.zeros((V_WIDTH,), jnp.float32),
            # per-expert attention weights stacked along a leading expert axis
            wqkv=nrm16((NUM_EXPERTS, V_WIDTH, 3 * V_WIDTH)),
            bqkv=nrm((NUM_EXPERTS, 1, 3 * V_WIDTH)),
            wout=nrm16((NUM_EXPERTS, V_WIDTH, V_WIDTH)),
            bout=nrm((NUM_EXPERTS, 1, V_WIDTH)),
            lora_a=nrm16((NUM_EXPERTS, V_WIDTH, LORA_R)),      # A^T
            lora_b=nrm16((NUM_EXPERTS, LORA_R, V_WIDTH)),      # B^T (nonzero: exercise LoRA)
            lora_scale=LORA_ALPHA / LORA_R,
            fc_w=nrm16((V_WIDTH, 4 * V_WIDTH)),
            fc_b=nrm((4 * V_WIDTH,)),
            proj_w=nrm16((4 * V_WIDTH, V_WIDTH)),
            proj_b=nrm((V_WIDTH,)),
        ))
    p["v_blocks"] = v_blocks

    t_blocks = []
    for _ in range(T_LAYERS):
        t_blocks.append(dict(
            ln1_g=jnp.ones((T_WIDTH,), jnp.float32),
            ln1_b=jnp.zeros((T_WIDTH,), jnp.float32),
            ln2_g=jnp.ones((T_WIDTH,), jnp.float32),
            ln2_b=jnp.zeros((T_WIDTH,), jnp.float32),
            wqkv=nrm16((1, T_WIDTH, 3 * T_WIDTH)),
            bqkv=nrm((1, 1, 3 * T_WIDTH)),
            wout=nrm16((1, T_WIDTH, T_WIDTH)),
            bout=nrm((1, 1, T_WIDTH)),
            fc_w=nrm16((T_WIDTH, 4 * T_WIDTH)),
            fc_b=nrm((4 * T_WIDTH,)),
            proj_w=nrm16((4 * T_WIDTH, T_WIDTH)),
            proj_b=nrm((T_WIDTH,)),
        ))
    p["t_blocks"] = t_blocks
    return p


# ----------------------------- main --------------------------------------------------
if __name__ == "__main__":
    key = jax.random.PRNGKey(0)
    k_img, k_txt = jax.random.split(key)

    B = 2
    T = 2
    image = jax.random.normal(k_img, (B, IN_CH, IMG_SIZE, IMG_SIZE), jnp.float32)
    text = jax.random.randint(k_txt, (T, CTX), 1, VOCAB - 1).astype(jnp.int32)
    text = text.at[:, -1].set(VOCAB - 1)  # eot token (argmax position), like CLIP's tokenizer

    params = init_params(jax.random.PRNGKey(42))

    fwd = jax.jit(functools.partial(multi_expert_clip_forward, params))
    image_logits, text_logits = fwd(image, text)
    jax.block_until_ready((image_logits, text_logits))

    assert image_logits.shape == (NUM_EXPERTS, B, T), image_logits.shape
    assert text_logits.shape == (NUM_EXPERTS, T, B), text_logits.shape
    assert bool(jnp.all(jnp.isfinite(image_logits)))
    print("KERNEL_OK")
</pallas_src>

<mosaic_0001>
module attributes {stable_mosaic.version = 11 : i64} {
  func.func @_matmul_kernel(%arg0: memref<8x192xf32, #tpu.memory_space<vmem>>, %arg1: memref<192x64xbf16, #tpu.memory_space<vmem>>, %arg2: memref<8x64xf32, #tpu.memory_space<vmem>>) attributes {dimension_semantics = [], scalar_prefetch = 0 : i64, scratch_operands = 0 : i64, tpu.core_type = #tpu.core_type<tc>} {
    %c0 = arith.constant 0 : index
    %c0_0 = arith.constant 0 : index
    %0 = vector.load %arg0[%c0, %c0_0] : memref<8x192xf32, #tpu.memory_space<vmem>>, vector<8x192xf32>
    %1 = arith.truncf %0 : vector<8x192xf32> to vector<8x192xbf16>
    %c0_1 = arith.constant 0 : index
    %c0_2 = arith.constant 0 : index
    %2 = vector.load %arg1[%c0_1, %c0_2] : memref<192x64xbf16, #tpu.memory_space<vmem>>, vector<192x64xbf16>
    %cst = arith.constant dense<0.000000e+00> : vector<8x64xf32>
    %3 = tpu.matmul %1, %2, %cst {dimension_numbers = #tpu.dot_dimension_numbers<[1], [0], [0], [1], [0, 0, 1, 1], [], []>} : vector<8x192xbf16>, vector<192x64xbf16>, vector<8x64xf32> -> vector<8x64xf32>
    %c0_3 = arith.constant 0 : index
    %c0_4 = arith.constant 0 : index
    %4 = vector.load %arg2[%c0_3, %c0_4] : memref<8x64xf32, #tpu.memory_space<vmem>>, vector<8x64xf32>
    tpu.vector_store %arg2[%c0_3, %c0_4], %3 {strides = array<i32>} : memref<8x64xf32, #tpu.memory_space<vmem>>, vector<8x64xf32>,
    return
  }
}

module attributes {stable_mosaic.version = 11 : i64} {
  func.func @_layernorm_kernel(%arg0: memref<10x64xf32, #tpu.memory_space<vmem>>, %arg1: memref<1x64xf32, #tpu.memory_space<vmem>>, %arg2: memref<1x64xf32, #tpu.memory_space<vmem>>, %arg3: memref<10x64xf32, #tpu.memory_space<vmem>>) attributes {dimension_semantics = [], scalar_prefetch = 0 : i64, scratch_operands = 0 : i64, tpu.core_type = #tpu.core_type<tc>} {
    %c0 = arith.constant 0 : index
    %c0_0 = arith.constant 0 : index
    %0 = vector.load %arg0[%c0, %c0_0] : memref<10x64xf32, #tpu.memory_space<vmem>>, vector<10x64xf32>
    %cst = arith.constant dense<0.000000e+00> : vector<10xf32>
    %1 = vector.multi_reduction <add>, %0, %cst [1] : vector<10x64xf32> to vector<10xf32>
    %2 = vector.shape_cast %1 : vector<10xf32> to vector<10x1xf32>
    %cst_1 = arith.constant 6.400000e+01 : f32
    %3 = vector.broadcast %cst_1 : f32 to vector<10x1xf32>
    %4 = arith.divf %2, %3 : vector<10x1xf32>
    %5 = vector.broadcast %4 : vector<10x1xf32> to vector<10x64xf32>
    %6 = arith.subf %0, %5 : vector<10x64xf32>
    %7 = arith.mulf %6, %6 : vector<10x64xf32>
    %cst_2 = arith.constant dense<0.000000e+00> : vector<10xf32>
    %8 = vector.multi_reduction <add>, %7, %cst_2 [1] : vector<10x64xf32> to vector<10xf32>
    %9 = vector.shape_cast %8 : vector<10xf32> to vector<10x1xf32>
    %cst_3 = arith.constant 6.400000e+01 : f32
    %10 = vector.broadcast %cst_3 : f32 to vector<10x1xf32>
    %11 = arith.divf %9, %10 : vector<10x1xf32>
    %12 = vector.broadcast %4 : vector<10x1xf32> to vector<10x64xf32>
    %13 = arith.subf %0, %12 : vector<10x64xf32>
    %cst_4 = arith.constant 9.99999974E-6 : f32
    %14 = vector.broadcast %cst_4 : f32 to vector<10x1xf32>
    %15 = arith.addf %11, %14 : vector<10x1xf32>
    %16 = math.rsqrt %15 : vector<10x1xf32>
    %17 = vector.broadcast %16 : vector<10x1xf32> to vector<10x64xf32>
    %18 = arith.mulf %13, %17 : vector<10x64xf32>
    %c0_5 = arith.constant 0 : index
    %c0_6 = arith.constant 0 : index
    %19 = vector.load %arg1[%c0_5, %c0_6] : memref<1x64xf32, #tpu.memory_space<vmem>>, vector<1x64xf32>
    %20 = vector.broadcast %19 : vector<1x64xf32> to vector<10x64xf32>
    %21 = arith.mulf %18, %20 : vector<10x64xf32>
    %c0_7 = arith.constant 0 : index
    %c0_8 = arith.constant 0 : index
    %22 = vector.load %arg2[%c0_7, %c0_8] : memref<1x64xf32, #tpu.memory_space<vmem>>, vector<1x64xf32>
    %23 = vector.broadcast %22 : vector<1x64xf32> to vector<10x64xf32>
    %24 = arith.addf %21, %23 : vector<10x64xf32>
    %c0_9 = arith.constant 0 : index
    %c0_10 = arith.constant 0 : index
    %25 = vector.load %arg3[%c0_9, %c0_10] : memref<10x64xf32, #tpu.memory_space<vmem>>, vector<10x64xf32>
    tpu.vector_store %arg3[%c0_9, %c0_10], %24 {strides = array<i32>} : memref<10x64xf32, #tpu.memory_space<vmem>>, vector<10x64xf32>,
    return
  }
}

module attributes {stable_mosaic.version = 11 : i64} {
  func.func @_attn_block_kernel(%arg0: i32, %arg1: i32, %arg2: memref<1x1x5x64xf32, #tpu.memory_space<vmem>>, %arg3: memref<1x64xf32, #tpu.memory_space<vmem>>, %arg4: memref<1x64xf32, #tpu.memory_space<vmem>>, %arg5: memref<1x64x192xbf16, #tpu.memory_space<vmem>>, %arg6: memref<1x1x192xf32, #tpu.memory_space<vmem>>, %arg7: memref<1x64x64xbf16, #tpu.memory_space<vmem>>, %arg8: memref<1x1x64xf32, #tpu.memory_space<vmem>>, %arg9: memref<1x64x12xbf16, #tpu.memory_space<vmem>>, %arg10: memref<1x12x64xbf16, #tpu.memory_space<vmem>>, %arg11: memref<1x1x5x64xf32, #tpu.memory_space<vmem>>) attributes {dimension_semantics = [#tpu.dimension_semantics<parallel>, #tpu.dimension_semantics<parallel>], iteration_bounds = array<i64: 3, 2>, scalar_prefetch = 0 : i64, scratch_operands = 0 : i64, tpu.core_type = #tpu.core_type<tc>, window_params = [{transform_indices = @transform_0, window_bounds = array<i64: 1, 1, 5, 64>}, {pipeline_mode = #tpu.pipeline_mode<synchronous>, transform_indices = @transform_1, window_bounds = array<i64: 1, 64>}, {pipeline_mode = #tpu.pipeline_mode<synchronous>, transform_indices = @transform_2, window_bounds = array<i64: 1, 64>}, {transform_indices = @transform_3, window_bounds = array<i64: 1, 64, 192>}, {transform_indices = @transform_4, window_bounds = array<i64: 1, 1, 192>}, {transform_indices = @transform_5, window_bounds = array<i64: 1, 64, 64>}, {transform_indices = @transform_6, window_bounds = array<i64: 1, 1, 64>}, {transform_indices = @transform_7, window_bounds = array<i64: 1, 64, 12>}, {transform_indices = @transform_8, window_bounds = array<i64: 1, 12, 64>}, {transform_indices = @transform_9, window_bounds = array<i64: 1, 1, 5, 64>}]} {
    %c0 = arith.constant 0 : index
    %c0_0 = arith.constant 0 : index
    %c0_1 = arith.constant 0 : index
    %c0_2 = arith.constant 0 : index
    %0 = vector.load %arg2[%c0, %c0_0, %c0_1, %c0_2] : memref<1x1x5x64xf32, #tpu.memory_space<vmem>>, vector<1x1x5x64xf32>
    %1 = vector.shape_cast %0 : vector<1x1x5x64xf32> to vector<5x64xf32>
    %cst = arith.constant dense<0.000000e+00> : vector<5xf32>
    %2 = vector.multi_reduction <add>, %1, %cst [1] : vector<5x64xf32> to vector<5xf32>
    %3 = vector.shape_cast %2 : vector<5xf32> to vector<5x1xf32>
    %cst_3 = arith.constant 6.400000e+01 : f32
    %4 = vector.broadcast %cst_3 : f32 to vector<5x1xf32>
    %5 = arith.divf %3, %4 : vector<5x1xf32>
    %6 = vector.broadcast %5 : vector<5x1xf32> to vector<5x64xf32>
    %7 = arith.subf %1, %6 : vector<5x64xf32>
    %8 = arith.mulf %7, %7 : vector<5x64xf32>
    %cst_4 = arith.constant dense<0.000000e+00> : vector<5xf32>
    %9 = vector.multi_reduction <add>, %8, %cst_4 [1] : vector<5x64xf32> to vector<5xf32>
    %10 = vector.shape_cast %9 : vector<5xf32> to vector<5x1xf32>
    %cst_5 = arith.constant 6.400000e+01 : f32
    %11 = vector.broadcast %cst_5 : f32 to vector<5x1xf32>
    %12 = arith.divf %10, %11 : vector<5x1xf32>
    %13 = vector.broadcast %5 : vector<5x1xf32> to vector<5x64xf32>
    %14 = arith.subf %1, %13 : vector<5x64xf32>
    %cst_6 = arith.constant 9.99999974E-6 : f32
    %15 = vector.broadcast %cst_6 : f32 to vector<5x1xf32>
    %16 = arith.addf %12, %15 : vector<5x1xf32>
    %17 = math.rsqrt %16 : vector<5x1xf32>
    %18 = vector.broadcast %17 : vector<5x1xf32> to vector<5x64xf32>
    %19 = arith.mulf %14, %18 : vector<5x64xf32>
    %c0_7 = arith.constant 0 : index
    %c0_8 = arith.constant 0 : index
    %20 = vector.load %arg3[%c0_7, %c0_8] : memref<1x64xf32, #tpu.memory_space<vmem>>, vector<1x64xf32>
    %21 = vector.broadcast %20 : vector<1x64xf32> to vector<5x64xf32>
    %22 = arith.mulf %19, %21 : vector<5x64xf32>
    %c0_9 = arith.constant 0 : index
    %c0_10 = arith.constant 0 : index
    %23 = vector.load %arg4[%c0_9, %c0_10] : memref<1x64xf32, #tpu.memory_space<vmem>>, vector<1x64xf32>
    %24 = vector.broadcast %23 : vector<1x64xf32> to vector<5x64xf32>
    %25 = arith.addf %22, %24 : vector<5x64xf32>
    %26 = arith.truncf %25 : vector<5x64xf32> to vector<5x64xbf16>
    %c0_11 = arith.constant 0 : index
    %c0_12 = arith.constant 0 : index
    %c0_13 = arith.constant 0 : index
    %27 = vector.load %arg5[%c0_11, %c0_12, %c0_13] : memref<1x64x192xbf16, #tpu.memory_space<vmem>>, vector<1x64x192xbf16>
    %28 = vector.shape_cast %27 : vector<1x64x192xbf16> to vector<64x192xbf16>
    %cst_14 = arith.constant dense<0.000000e+00> : vector<5x192xf32>
    %29 = tpu.matmul %26, %28, %cst_14 {dimension_numbers = #tpu.dot_dimension_numbers<[1], [0], [0], [1], [0, 0, 1, 1], [], []>} : vector<5x64xbf16>, vector<64x192xbf16>, vector<5x192xf32> -> vector<5x192xf32>
    %c0_15 = arith.constant 0 : index
    %c0_16 = arith.constant 0 : index
    %c0_17 = arith.constant 0 : index
    %30 = vector.load %arg6[%c0_15, %c0_16, %c0_17] : memref<1x1x192xf32, #tpu.memory_space<vmem>>, vector<1x1x192xf32>
    %31 = vector.shape_cast %30 : vector<1x1x192xf32> to vector<1x192xf32>
    %32 = vector.broadcast %31 : vector<1x192xf32> to vector<5x192xf32>
    %33 = arith.addf %29, %32 : vector<5x192xf32>
    %34 = vector.extract_strided_slice %33 {offsets = [0, 0], sizes = [5, 64], strides = [1, 1]} : vector<5x192xf32> to vector<5x64xf32>
    %cst_18 = arith.constant 2.500000e-01 : f32
    %35 = vector.broadcast %cst_18 : f32 to vector<5x64xf32>
    %36 = arith.mulf %34, %35 : vector<5x64xf32>
    %37 = vector.extract_strided_slice %33 {offsets = [0, 64], sizes = [5, 64], strides = [1, 1]} : vector<5x192xf32> to vector<5x64xf32>
    %38 = vector.extract_strided_slice %33 {offsets = [0, 128], sizes = [5, 64], strides = [1, 1]} : vector<5x192xf32> to vector<5x64xf32>
    %39 = vector.extract_strided_slice %36 {offsets = [0, 0], sizes = [5, 16], strides = [1, 1]} : vector<5x64xf32> to vector<5x16xf32>
    %40 = vector.extract_strided_slice %37 {offsets = [0, 0], sizes = [5, 16], strides = [1, 1]} : vector<5x64xf32> to vector<5x16xf32>
    %cst_19 = arith.constant dense<0.000000e+00> : vector<5x5xf32>
    %41 = tpu.matmul %39, %40, %cst_19 {dimension_numbers = #tpu.dot_dimension_numbers<[1], [1], [0], [0], [0, 0, 1, 0], [], []>} : vector<5x16xf32>, vector<5x16xf32>, vector<5x5xf32> -> vector<5x5xf32>
    %cst_20 = arith.constant dense<0xFF800000> : vector<5xf32>
    %42 = vector.multi_reduction <maximumf>, %41, %cst_20 [1] : vector<5x5xf32> to vector<5xf32>
    %43 = vector.shape_cast %42 : vector<5xf32> to vector<5x1xf32>
    %44 = vector.broadcast %43 : vector<5x1xf32> to vector<5x5xf32>
    %45 = arith.subf %41, %44 : vector<5x5xf32>
    %46 = math.exp %45 : vector<5x5xf32>
    %cst_21 = arith.constant dense<0.000000e+00> : vector<5xf32>
    %47 = vector.multi_reduction <add>, %46, %cst_21 [1] : vector<5x5xf32> to vector<5xf32>
    %48 = vector.shape_cast %47 : vector<5xf32> to vector<5x1xf32>
    %49 = tpu.reciprocal %48 {approx = true} : vector<5x1xf32> -> vector<5x1xf32>
    %50 = vector.broadcast %49 : vector<5x1xf32> to vector<5x5xf32>
    %51 = arith.mulf %46, %50 : vector<5x5xf32>
    %52 = arith.truncf %51 : vector<5x5xf32> to vector<5x5xbf16>
    %53 = vector.extract_strided_slice %38 {offsets = [0, 0], sizes = [5, 16], strides = [1, 1]} : vector<5x64xf32> to vector<5x16xf32>
    %54 = arith.truncf %53 : vector<5x16xf32> to vector<5x16xbf16>
    %cst_22 = arith.constant dense<0.000000e+00> : vector<5x16xf32>
    %55 = tpu.matmul %52, %54, %cst_22 {dimension_numbers = #tpu.dot_dimension_numbers<[1], [0], [0], [1], [0, 0, 1, 1], [], []>} : vector<5x5xbf16>, vector<5x16xbf16>, vector<5x16xf32> -> vector<5x16xf32>
    %56 = vector.extract_strided_slice %36 {offsets = [0, 16], sizes = [5, 16], strides = [1, 1]} : vector<5x64xf32> to vector<5x16xf32>
    %57 = vector.extract_strided_slice %37 {offsets = [0, 16], sizes = [5, 16], strides = [1, 1]} : vector<5x64xf32> to vector<5x16xf32>
    %cst_23 = arith.constant dense<0.000000e+00> : vector<5x5xf32>
    %58 = tpu.matmul %56, %57, %cst_23 {dimension_numbers = #tpu.dot_dimension_numbers<[1], [1], [0], [0], [0, 0, 1, 0], [], []>} : vector<5x16xf32>, vector<5x16xf32>, vector<5x5xf32> -> vector<5x5xf32>
    %cst_24 = arith.constant dense<0xFF800000> : vector<5xf32>
    %59 = vector.multi_reduction <maximumf>, %58, %cst_24 [1] : vector<5x5xf32> to vector<5xf32>
    %60 = vector.shape_cast %59 : vector<5xf32> to vector<5x1xf32>
    %61 = vector.broadcast %60 : vector<5x1xf32> to vector<5x5xf32>
    %62 = arith.subf %58, %61 : vector<5x5xf32>
    %63 = math.exp %62 : vector<5x5xf32>
    %cst_25 = arith.constant dense<0.000000e+00> : vector<5xf32>
    %64 = vector.multi_reduction <add>, %63, %cst_25 [1] : vector<5x5xf32> to vector<5xf32>
    %65 = vector.shape_cast %64 : vector<5xf32> to vector<5x1xf32>
    %66 = tpu.reciprocal %65 {approx = true} : vector<5x1xf32> -> vector<5x1xf32>
    %67 = vector.broadcast %66 : vector<5x1xf32> to vector<5x5xf32>
    %68 = arith.mulf %63, %67 : vector<5x5xf32>
    %69 = arith.truncf %68 : vector<5x5xf32> to vector<5x5xbf16>
    %70 = vector.extract_strided_slice %38 {offsets = [0, 16], sizes = [5, 16], strides = [1, 1]} : vector<5x64xf32> to vector<5x16xf32>
    %71 = arith.truncf %70 : vector<5x16xf32> to vector<5x16xbf16>
    %cst_26 = arith.constant dense<0.000000e+00> : vector<5x16xf32>
    %72 = tpu.matmul %69, %71, %cst_26 {dimension_numbers = #tpu.dot_dimension_numbers<[1], [0], [0], [1], [0, 0, 1, 1], [], []>} : vector<5x5xbf16>, vector<5x16xbf16>, vector<5x16xf32> -> vector<5x16xf32>
    %73 = vector.extract_strided_slice %36 {offsets = [0, 32], sizes = [5, 16], strides = [1, 1]} : vector<5x64xf32> to vector<5x16xf32>
    %74 = vector.extract_strided_slice %37 {offsets = [0, 32], sizes = [5, 16], strides = [1, 1]} : vector<5x64xf32> to vector<5x16xf32>
    %cst_27 = arith.constant dense<0.000000e+00> : vector<5x5xf32>
    %75 = tpu.matmul %73, %74, %cst_27 {dimension_numbers = #tpu.dot_dimension_numbers<[1], [1], [0], [0], [0, 0, 1, 0], [], []>} : vector<5x16xf32>, vector<5x16xf32>, vector<5x5xf32> -> vector<5x5xf32>
    %cst_28 = arith.constant dense<0xFF800000> : vector<5xf32>
    %76 = vector.multi_reduction <maximumf>, %75, %cst_28 [1] : vector<5x5xf32> to vector<5xf32>
    %77 = vector.shape_cast %76 : vector<5xf32> to vector<5x1xf32>
    %78 = vector.broadcast %77 : vector<5x1xf32> to vector<5x5xf32>
    %79 = arith.subf %75, %78 : vector<5x5xf32>
    %80 = math.exp %79 : vector<5x5xf32>
    %cst_29 = arith.constant dense<0.000000e+00> : vector<5xf32>
    %81 = vector.multi_reduction <add>, %80, %cst_29 [1] : vector<5x5xf32> to vector<5xf32>
    %82 = vector.shape_cast %81 : vector<5xf32> to vector<5x1xf32>
    %83 = tpu.reciprocal %82 {approx = true} : vector<5x1xf32> -> vector<5x1xf32>
    %84 = vector.broadcast %83 : vector<5x1xf32> to vector<5x5xf32>
    %85 = arith.mulf %80, %84 : vector<5x5xf32>
    %86 = arith.truncf %85 : vector<5x5xf32> to vector<5x5xbf16>
    %87 = vector.extract_strided_slice %38 {offsets = [0, 32], sizes = [5, 16], strides = [1, 1]} : vector<5x64xf32> to vector<5x16xf32>
    %88 = arith.truncf %87 : vector<5x16xf32> to vector<5x16xbf16>
    %cst_30 = arith.constant dense<0.000000e+00> : vector<5x16xf32>
    %89 = tpu.matmul %86, %88, %cst_30 {dimension_numbers = #tpu.dot_dimension_numbers<[1], [0], [0], [1], [0, 0, 1, 1], [], []>} : vector<5x5xbf16>, vector<5x16xbf16>, vector<5x16xf32> -> vector<5x16xf32>
    %90 = vector.extract_strided_slice %36 {offsets = [0, 48], sizes = [5, 16], strides = [1, 1]} : vector<5x64xf32> to vector<5x16xf32>
    %91 = vector.extract_strided_slice %37 {offsets = [0, 48], sizes = [5, 16], strides = [1, 1]} : vector<5x64xf32> to vector<5x16xf32>
    %cst_31 = arith.constant dense<0.000000e+00> : vector<5x5xf32>
    %92 = tpu.matmul %90, %91, %cst_31 {dimension_numbers = #tpu.dot_dimension_numbers<[1], [1], [0], [0], [0, 0, 1, 0], [], []>} : vector<5x16xf32>, vector<5x16xf32>, vector<5x5xf32> -> vector<5x5xf32>
    %cst_32 = arith.constant dense<0xFF800000> : vector<5xf32>
    %93 = vector.multi_reduction <maximumf>, %92, %cst_32 [1] : vector<5x5xf32> to vector<5xf32>
    %94 = vector.shape_cast %93 : vector<5xf32> to vector<5x1xf32>
    %95 = vector.broadcast %94 : vector<5x1xf32> to vector<5x5xf32>
    %96 = arith.subf %92, %95 : vector<5x5xf32>
    %97 = math.exp %96 : vector<5x5xf32>
    %cst_33 = arith.constant dense<0.000000e+00> : vector<5xf32>
    %98 = vector.multi_reduction <add>, %97, %cst_33 [1] : vector<5x5xf32> to vector<5xf32>
    %99 = vector.shape_cast %98 : vector<5xf32> to vector<5x1xf32>
    %100 = tpu.reciprocal %99 {approx = true} : vector<5x1xf32> -> vector<5x1xf32>
    %101 = vector.broadcast %100 : vector<5x1xf32> to vector<5x5xf32>
    %102 = arith.mulf %97, %101 : vector<5x5xf32>
    %103 = arith.truncf %102 : vector<5x5xf32> to vector<5x5xbf16>
    %104 = vector.extract_strided_slice %38 {offsets = [0, 48], sizes = [5, 16], strides = [1, 1]} : vector<5x64xf32> to vector<5x16xf32>
    %105 = arith.truncf %104 : vector<5x16xf32> to vector<5x16xbf16>
    %cst_34 = arith.constant dense<0.000000e+00> : vector<5x16xf32>
    %106 = tpu.matmul %103, %105, %cst_34 {dimension_numbers = #tpu.dot_dimension_numbers<[1], [0], [0], [1], [0, 0, 1, 1], [], []>} : vector<5x5xbf16>, vector<5x16xbf16>, vector<5x16xf32> -> vector<5x16xf32>
    %107 = tpu.concatenate %55, %72, %89, %106 in 1 : vector<5x16xf32>, vector<5x16xf32>, vector<5x16xf32>, vector<5x16xf32> -> vector<5x64xf32>
    %108 = arith.truncf %107 : vector<5x64xf32> to vector<5x64xbf16>
    %c0_35 = arith.constant 0 : index
    %c0_36 = arith.constant 0 : index
    %c0_37 = arith.constant 0 : index
    %109 = vector.load %arg7[%c0_35, %c0_36, %c0_37] : memref<1x64x64xbf16, #tpu.memory_space<vmem>>, vector<1x64x64xbf16>
    %110 = vector.shape_cast %109 : vector<1x64x64xbf16> to vector<64x64xbf16>
    %cst_38 = arith.constant dense<0.000000e+00> : vector<5x64xf32>
    %111 = tpu.matmul %108, %110, %cst_38 {dimension_numbers = #tpu.dot_dimension_numbers<[1], [0], [0], [1], [0, 0, 1, 1], [], []>} : vector<5x64xbf16>, vector<64x64xbf16>, vector<5x64xf32> -> vector<5x64xf32>
    %c0_39 = arith.constant 0 : index
    %c0_40 = arith.constant 0 : index
    %c0_41 = arith.constant 0 : index
    %112 = vector.load %arg8[%c0_39, %c0_40, %c0_41] : memref<1x1x64xf32, #tpu.memory_space<vmem>>, vector<1x1x64xf32>
    %113 = vector.shape_cast %112 : vector<1x1x64xf32> to vector<1x64xf32>
    %114 = vector.broadcast %113 : vector<1x64xf32> to vector<5x64xf32>
    %115 = arith.addf %111, %114 : vector<5x64xf32>
    %c0_42 = arith.constant 0 : index
    %c0_43 = arith.constant 0 : index
    %c0_44 = arith.constant 0 : index
    %116 = vector.load %arg9[%c0_42, %c0_43, %c0_44] : memref<1x64x12xbf16, #tpu.memory_space<vmem>>, vector<1x64x12xbf16>
    %117 = vector.shape_cast %116 : vector<1x64x12xbf16> to vector<64x12xbf16>
    %cst_45 = arith.constant dense<0.000000e+00> : vector<5x12xf32>
    %118 = tpu.matmul %108, %117, %cst_45 {dimension_numbers = #tpu.dot_dimension_numbers<[1], [0], [0], [1], [0, 0, 1, 1], [], []>} : vector<5x64xbf16>, vector<64x12xbf16>, vector<5x12xf32> -> vector<5x12xf32>
    %119 = arith.truncf %118 : vector<5x12xf32> to vector<5x12xbf16>
    %c0_46 = arith.constant 0 : index
    %c0_47 = arith.constant 0 : index
    %c0_48 = arith.constant 0 : index
    %120 = vector.load %arg10[%c0_46, %c0_47, %c0_48] : memref<1x12x64xbf16, #tpu.memory_space<vmem>>, vector<1x12x64xbf16>
    %121 = vector.shape_cast %120 : vector<1x12x64xbf16> to vector<12x64xbf16>
    %cst_49 = arith.constant dense<0.000000e+00> : vector<5x64xf32>
    %122 = tpu.matmul %119, %121, %cst_49 {dimension_numbers = #tpu.dot_dimension_numbers<[1], [0], [0], [1], [0, 0, 1, 1], [], []>} : vector<5x12xbf16>, vector<12x64xbf16>, vector<5x64xf32> -> vector<5x64xf32>
    %cst_50 = arith.constant 2.000000e+00 : f32
    %123 = vector.broadcast %cst_50 : f32 to vector<5x64xf32>
    %124 = arith.mulf %123, %122 : vector<5x64xf32>
    %125 = arith.addf %115, %124 : vector<5x64xf32>
    %126 = arith.addf %1, %125 : vector<5x64xf32>
    %c0_51 = arith.constant 0 : index
    %c0_52 = arith.constant 0 : index
    %c0_53 = arith.constant 0 : index
    %c0_54 = arith.constant 0 : index
    %127 = vector.load %arg11[%c0_51, %c0_52, %c0_53, %c0_54] : memref<1x1x5x64xf32, #tpu.memory_space<vmem>>, vector<1x1x5x64xf32>
    %128 = vector.shape_cast %127 : vector<1x1x5x64xf32> to vector<5x64xf32>
    %129 = vector.shape_cast %126 : vector<5x64xf32> to vector<1x1x5x64xf32>
    tpu.vector_store %arg11[%c0_51, %c0_52, %c0_53, %c0_54], %129 {strides = array<i32>} : memref<1x1x5x64xf32, #tpu.memory_space<vmem>>, vector<1x1x5x64xf32>,
    return
  }
  func.func @transform_0(%arg0: i32, %arg1: i32) -> (i32, i32, i32, i32) {
    %c0_i32 = arith.constant 0 : i32
    %c0_i32_0 = arith.constant 0 : i32
    %c0_i32_1 = arith.constant 0 : i32
    %c0_i32_2 = arith.constant 0 : i32
    return %c0_i32, %arg1, %c0_i32_0, %c0_i32_1 : i32, i32, i32, i32
  }
  func.func @transform_1(%arg0: i32, %arg1: i32) -> (i32, i32) {
    %c0_i32 = arith.constant 0 : i32
    %c0_i32_0 = arith.constant 0 : i32
    %c0_i32_1 = arith.constant 0 : i32
    return %c0_i32, %c0_i32_0 : i32, i32
  }
  func.func @transform_2(%arg0: i32, %arg1: i32) -> (i32, i32) {
    %c0_i32 = arith.constant 0 : i32
    %c0_i32_0 = arith.constant 0 : i32
    %c0_i32_1 = arith.constant 0 : i32
    return %c0_i32, %c0_i32_0 : i32, i32
  }
  func.func @transform_3(%arg0: i32, %arg1: i32) -> (i32, i32, i32) {
    %c0_i32 = arith.constant 0 : i32
    %c0_i32_0 = arith.constant 0 : i32
    %c0_i32_1 = arith.constant 0 : i32
    return %arg0, %c0_i32, %c0_i32_0 : i32, i32, i32
  }
  func.func @transform_4(%arg0: i32, %arg1: i32) -> (i32, i32, i32) {
    %c0_i32 = arith.constant 0 : i32
    %c0_i32_0 = arith.constant 0 : i32
    %c0_i32_1 = arith.constant 0 : i32
    return %arg0, %c0_i32, %c0_i32_0 : i32, i32, i32
  }
  func.func @transform_5(%arg0: i32, %arg1: i32) -> (i32, i32, i32) {
    %c0_i32 = arith.constant 0 : i32
    %c0_i32_0 = arith.constant 0 : i32
    %c0_i32_1 = arith.constant 0 : i32
    return %arg0, %c0_i32, %c0_i32_0 : i32, i32, i32
  }
  func.func @transform_6(%arg0: i32, %arg1: i32) -> (i32, i32, i32) {
    %c0_i32 = arith.constant 0 : i32
    %c0_i32_0 = arith.constant 0 : i32
    %c0_i32_1 = arith.constant 0 : i32
    return %arg0, %c0_i32, %c0_i32_0 : i32, i32, i32
  }
  func.func @transform_7(%arg0: i32, %arg1: i32) -> (i32, i32, i32) {
    %c0_i32 = arith.constant 0 : i32
    %c0_i32_0 = arith.constant 0 : i32
    %c0_i32_1 = arith.constant 0 : i32
    return %arg0, %c0_i32, %c0_i32_0 : i32, i32, i32
  }
  func.func @transform_8(%arg0: i32, %arg1: i32) -> (i32, i32, i32) {
    %c0_i32 = arith.constant 0 : i32
    %c0_i32_0 = arith.constant 0 : i32
    %c0_i32_1 = arith.constant 0 : i32
    return %arg0, %c0_i32, %c0_i32_0 : i32, i32, i32
  }
  func.func @transform_9(%arg0: i32, %arg1: i32) -> (i32, i32, i32, i32) {
    %c0_i32 = arith.constant 0 : i32
    %c0_i32_0 = arith.constant 0 : i32
    %c0_i32_1 = arith.constant 0 : i32
    return %arg0, %arg1, %c0_i32, %c0_i32_0 : i32, i32, i32, i32
  }
}

module attributes {stable_mosaic.version = 11 : i64} {
  func.func @_mlp_block_kernel(%arg0: memref<30x64xf32, #tpu.memory_space<vmem>>, %arg1: memref<1x64xf32, #tpu.memory_space<vmem>>, %arg2: memref<1x64xf32, #tpu.memory_space<vmem>>, %arg3: memref<64x256xbf16, #tpu.memory_space<vmem>>, %arg4: memref<1x256xf32, #tpu.memory_space<vmem>>, %arg5: memref<256x64xbf16, #tpu.memory_space<vmem>>, %arg6: memref<1x64xf32, #tpu.memory_space<vmem>>, %arg7: memref<30x64xf32, #tpu.memory_space<vmem>>) attributes {dimension_semantics = [], scalar_prefetch = 0 : i64, scratch_operands = 0 : i64, tpu.core_type = #tpu.core_type<tc>} {
    %c0 = arith.constant 0 : index
    %c0_0 = arith.constant 0 : index
    %0 = vector.load %arg0[%c0, %c0_0] : memref<30x64xf32, #tpu.memory_space<vmem>>, vector<30x64xf32>
    %cst = arith.constant dense<0.000000e+00> : vector<30xf32>
    %1 = vector.multi_reduction <add>, %0, %cst [1] : vector<30x64xf32> to vector<30xf32>
    %2 = vector.shape_cast %1 : vector<30xf32> to vector<30x1xf32>
    %cst_1 = arith.constant 6.400000e+01 : f32
    %3 = vector.broadcast %cst_1 : f32 to vector<30x1xf32>
    %4 = arith.divf %2, %3 : vector<30x1xf32>
    %5 = vector.broadcast %4 : vector<30x1xf32> to vector<30x64xf32>
    %6 = arith.subf %0, %5 : vector<30x64xf32>
    %7 = arith.mulf %6, %6 : vector<30x64xf32>
    %cst_2 = arith.constant dense<0.000000e+00> : vector<30xf32>
    %8 = vector.multi_reduction <add>, %7, %cst_2 [1] : vector<30x64xf32> to vector<30xf32>
    %9 = vector.shape_cast %8 : vector<30xf32> to vector<30x1xf32>
    %cst_3 = arith.constant 6.400000e+01 : f32
    %10 = vector.broadcast %cst_3 : f32 to vector<30x1xf32>
    %11 = arith.divf %9, %10 : vector<30x1xf32>
    %12 = vector.broadcast %4 : vector<30x1xf32> to vector<30x64xf32>
    %13 = arith.subf %0, %12 : vector<30x64xf32>
    %cst_4 = arith.constant 9.99999974E-6 : f32
    %14 = vector.broadcast %cst_4 : f32 to vector<30x1xf32>
    %15 = arith.addf %11, %14 : vector<30x1xf32>
    %16 = math.rsqrt %15 : vector<30x1xf32>
    %17 = vector.broadcast %16 : vector<30x1xf32> to vector<30x64xf32>
    %18 = arith.mulf %13, %17 : vector<30x64xf32>
    %c0_5 = arith.constant 0 : index
    %c0_6 = arith.constant 0 : index
    %19 = vector.load %arg1[%c0_5, %c0_6] : memref<1x64xf32, #tpu.memory_space<vmem>>, vector<1x64xf32>
    %20 = vector.broadcast %19 : vector<1x64xf32> to vector<30x64xf32>
    %21 = arith.mulf %18, %20 : vector<30x64xf32>
    %c0_7 = arith.constant 0 : index
    %c0_8 = arith.constant 0 : index
    %22 = vector.load %arg2[%c0_7, %c0_8] : memref<1x64xf32, #tpu.memory_space<vmem>>, vector<1x64xf32>
    %23 = vector.broadcast %22 : vector<1x64xf32> to vector<30x64xf32>
    %24 = arith.addf %21, %23 : vector<30x64xf32>
    %25 = arith.truncf %24 : vector<30x64xf32> to vector<30x64xbf16>
    %c0_9 = arith.constant 0 : index
    %c0_10 = arith.constant 0 : index
    %26 = vector.load %arg3[%c0_9, %c0_10] : memref<64x256xbf16, #tpu.memory_space<vmem>>, vector<64x256xbf16>
    %cst_11 = arith.constant dense<0.000000e+00> : vector<30x256xf32>
    %27 = tpu.matmul %25, %26, %cst_11 {dimension_numbers = #tpu.dot_dimension_numbers<[1], [0], [0], [1], [0, 0, 1, 1], [], []>} : vector<30x64xbf16>, vector<64x256xbf16>, vector<30x256xf32> -> vector<30x256xf32>
    %c0_12 = arith.constant 0 : index
    %c0_13 = arith.constant 0 : index
    %28 = vector.load %arg4[%c0_12, %c0_13] : memref<1x256xf32, #tpu.memory_space<vmem>>, vector<1x256xf32>
    %29 = vector.broadcast %28 : vector<1x256xf32> to vector<30x256xf32>
    %30 = arith.addf %27, %29 : vector<30x256xf32>
    %cst_14 = arith.constant 1.702000e+00 : f32
    %31 = vector.broadcast %cst_14 : f32 to vector<30x256xf32>
    %32 = arith.mulf %31, %30 : vector<30x256xf32>
    %33 = arith.negf %32 : vector<30x256xf32>
    %34 = math.exp %33 : vector<30x256xf32>
    %cst_15 = arith.constant 1.000000e+00 : f32
    %35 = vector.broadcast %cst_15 : f32 to vector<30x256xf32>
    %36 = arith.addf %35, %34 : vector<30x256xf32>
    %37 = arith.divf %35, %36 : vector<30x256xf32>
    %38 = arith.mulf %30, %37 : vector<30x256xf32>
    %39 = arith.truncf %38 : vector<30x256xf32> to vector<30x256xbf16>
    %c0_16 = arith.constant 0 : index
    %c0_17 = arith.constant 0 : index
    %40 = vector.load %arg5[%c0_16, %c0_17] : memref<256x64xbf16, #tpu.memory_space<vmem>>, vector<256x64xbf16>
    %cst_18 = arith.constant dense<0.000000e+00> : vector<30x64xf32>
    %41 = tpu.matmul %39, %40, %cst_18 {dimension_numbers = #tpu.dot_dimension_numbers<[1], [0], [0], [1], [0, 0, 1, 1], [], []>} : vector<30x256xbf16>, vector<256x64xbf16>, vector<30x64xf32> -> vector<30x64xf32>
    %c0_19 = arith.constant 0 : index
    %c0_20 = arith.constant 0 : index
    %42 = vector.load %arg6[%c0_19, %c0_20] : memref<1x64xf32, #tpu.memory_space<vmem>>, vector<1x64xf32>
    %43 = vector.broadcast %42 : vector<1x64xf32> to vector<30x64xf32>
    %44 = arith.addf %41, %43 : vector<30x64xf32>
    %45 = arith.addf %0, %44 : vector<30x64xf32>
    %c0_21 = arith.constant 0 : index
    %c0_22 = arith.constant 0 : index
    %46 = vector.load %arg7[%c0_21, %c0_22] : memref<30x64xf32, #tpu.memory_space<vmem>>, vector<30x64xf32>
    tpu.vector_store %arg7[%c0_21, %c0_22], %45 {strides = array<i32>} : memref<30x64xf32, #tpu.memory_space<vmem>>, vector<30x64xf32>,
    return
  }
}

module attributes {stable_mosaic.version = 11 : i64} {
  func.func @_ln_proj_kernel(%arg0: memref<6x64xf32, #tpu.memory_space<vmem>>, %arg1: memref<1x64xf32, #tpu.memory_space<vmem>>, %arg2: memref<1x64xf32, #tpu.memory_space<vmem>>, %arg3: memref<64x32xbf16, #tpu.memory_space<vmem>>, %arg4: memref<6x32xf32, #tpu.memory_space<vmem>>) attributes {dimension_semantics = [], scalar_prefetch = 0 : i64, scratch_operands = 0 : i64, tpu.core_type = #tpu.core_type<tc>} {
    %c0 = arith.constant 0 : index
    %c0_0 = arith.constant 0 : index
    %0 = vector.load %arg0[%c0, %c0_0] : memref<6x64xf32, #tpu.memory_space<vmem>>, vector<6x64xf32>
    %cst = arith.constant dense<0.000000e+00> : vector<6xf32>
    %1 = vector.multi_reduction <add>, %0, %cst [1] : vector<6x64xf32> to vector<6xf32>
    %2 = vector.shape_cast %1 : vector<6xf32> to vector<6x1xf32>
    %cst_1 = arith.constant 6.400000e+01 : f32
    %3 = vector.broadcast %cst_1 : f32 to vector<6x1xf32>
    %4 = arith.divf %2, %3 : vector<6x1xf32>
    %5 = vector.broadcast %4 : vector<6x1xf32> to vector<6x64xf32>
    %6 = arith.subf %0, %5 : vector<6x64xf32>
    %7 = arith.mulf %6, %6 : vector<6x64xf32>
    %cst_2 = arith.constant dense<0.000000e+00> : vector<6xf32>
    %8 = vector.multi_reduction <add>, %7, %cst_2 [1] : vector<6x64xf32> to vector<6xf32>
    %9 = vector.shape_cast %8 : vector<6xf32> to vector<6x1xf32>
    %cst_3 = arith.constant 6.400000e+01 : f32
    %10 = vector.broadcast %cst_3 : f32 to vector<6x1xf32>
    %11 = arith.divf %9, %10 : vector<6x1xf32>
    %12 = vector.broadcast %4 : vector<6x1xf32> to vector<6x64xf32>
    %13 = arith.subf %0, %12 : vector<6x64xf32>
    %cst_4 = arith.constant 9.99999974E-6 : f32
    %14 = vector.broadcast %cst_4 : f32 to vector<6x1xf32>
    %15 = arith.addf %11, %14 : vector<6x1xf32>
    %16 = math.rsqrt %15 : vector<6x1xf32>
    %17 = vector.broadcast %16 : vector<6x1xf32> to vector<6x64xf32>
    %18 = arith.mulf %13, %17 : vector<6x64xf32>
    %c0_5 = arith.constant 0 : index
    %c0_6 = arith.constant 0 : index
    %19 = vector.load %arg1[%c0_5, %c0_6] : memref<1x64xf32, #tpu.memory_space<vmem>>, vector<1x64xf32>
    %20 = vector.broadcast %19 : vector<1x64xf32> to vector<6x64xf32>
    %21 = arith.mulf %18, %20 : vector<6x64xf32>
    %c0_7 = arith.constant 0 : index
    %c0_8 = arith.constant 0 : index
    %22 = vector.load %arg2[%c0_7, %c0_8] : memref<1x64xf32, #tpu.memory_space<vmem>>, vector<1x64xf32>
    %23 = vector.broadcast %22 : vector<1x64xf32> to vector<6x64xf32>
    %24 = arith.addf %21, %23 : vector<6x64xf32>
    %25 = arith.truncf %24 : vector<6x64xf32> to vector<6x64xbf16>
    %c0_9 = arith.constant 0 : index
    %c0_10 = arith.constant 0 : index
    %26 = vector.load %arg3[%c0_9, %c0_10] : memref<64x32xbf16, #tpu.memory_space<vmem>>, vector<64x32xbf16>
    %cst_11 = arith.constant dense<0.000000e+00> : vector<6x32xf32>
    %27 = tpu.matmul %25, %26, %cst_11 {dimension_numbers = #tpu.dot_dimension_numbers<[1], [0], [0], [1], [0, 0, 1, 1], [], []>} : vector<6x64xbf16>, vector<64x32xbf16>, vector<6x32xf32> -> vector<6x32xf32>
    %c0_12 = arith.constant 0 : index
    %c0_13 = arith.constant 0 : index
    %28 = vector.load %arg4[%c0_12, %c0_13] : memref<6x32xf32, #tpu.memory_space<vmem>>, vector<6x32xf32>
    tpu.vector_store %arg4[%c0_12, %c0_13], %27 {strides = array<i32>} : memref<6x32xf32, #tpu.memory_space<vmem>>, vector<6x32xf32>,
    return
  }
}

module attributes {stable_mosaic.version = 11 : i64} {
  func.func @_attn_block_kernel(%arg0: i32, %arg1: i32, %arg2: memref<1x1x5x64xf32, #tpu.memory_space<vmem>>, %arg3: memref<1x64xf32, #tpu.memory_space<vmem>>, %arg4: memref<1x64xf32, #tpu.memory_space<vmem>>, %arg5: memref<1x64x192xbf16, #tpu.memory_space<vmem>>, %arg6: memref<1x1x192xf32, #tpu.memory_space<vmem>>, %arg7: memref<1x64x64xbf16, #tpu.memory_space<vmem>>, %arg8: memref<1x1x64xf32, #tpu.memory_space<vmem>>, %arg9: memref<1x64x12xbf16, #tpu.memory_space<vmem>>, %arg10: memref<1x12x64xbf16, #tpu.memory_space<vmem>>, %arg11: memref<1x1x5x64xf32, #tpu.memory_space<vmem>>) attributes {dimension_semantics = [#tpu.dimension_semantics<parallel>, #tpu.dimension_semantics<parallel>], iteration_bounds = array<i64: 3, 2>, scalar_prefetch = 0 : i64, scratch_operands = 0 : i64, tpu.core_type = #tpu.core_type<tc>, window_params = [{transform_indices = @transform_0, window_bounds = array<i64: 1, 1, 5, 64>}, {pipeline_mode = #tpu.pipeline_mode<synchronous>, transform_indices = @transform_1, window_bounds = array<i64: 1, 64>}, {pipeline_mode = #tpu.pipeline_mode<synchronous>, transform_indices = @transform_2, window_bounds = array<i64: 1, 64>}, {transform_indices = @transform_3, window_bounds = array<i64: 1, 64, 192>}, {transform_indices = @transform_4, window_bounds = array<i64: 1, 1, 192>}, {transform_indices = @transform_5, window_bounds = array<i64: 1, 64, 64>}, {transform_indices = @transform_6, window_bounds = array<i64: 1, 1, 64>}, {transform_indices = @transform_7, window_bounds = array<i64: 1, 64, 12>}, {transform_indices = @transform_8, window_bounds = array<i64: 1, 12, 64>}, {transform_indices = @transform_9, window_bounds = array<i64: 1, 1, 5, 64>}]} {
    %c0 = arith.constant 0 : index
    %c0_0 = arith.constant 0 : index
    %c0_1 = arith.constant 0 : index
    %c0_2 = arith.constant 0 : index
    %0 = vector.load %arg2[%c0, %c0_0, %c0_1, %c0_2] : memref<1x1x5x64xf32, #tpu.memory_space<vmem>>, vector<1x1x5x64xf32>
    %1 = vector.shape_cast %0 : vector<1x1x5x64xf32> to vector<5x64xf32>
    %cst = arith.constant dense<0.000000e+00> : vector<5xf32>
    %2 = vector.multi_reduction <add>, %1, %cst [1] : vector<5x64xf32> to vector<5xf32>
    %3 = vector.shape_cast %2 : vector<5xf32> to vector<5x1xf32>
    %cst_3 = arith.constant 6.400000e+01 : f32
    %4 = vector.broadcast %cst_3 : f32 to vector<5x1xf32>
    %5 = arith.divf %3, %4 : vector<5x1xf32>
    %6 = vector.broadcast %5 : vector<5x1xf32> to vector<5x64xf32>
    %7 = arith.subf %1, %6 : vector<5x64xf32>
    %8 = arith.mulf %7, %7 : vector<5x64xf32>
    %cst_4 = arith.constant dense<0.000000e+00> : vector<5xf32>
    %9 = vector.multi_reduction <add>, %8, %cst_4 [1] : vector<5x64xf32> to vector<5xf32>
    %10 = vector.shape_cast %9 : vector<5xf32> to vector<5x1xf32>
    %cst_5 = arith.constant 6.400000e+01 : f32
    %11 = vector.broadcast %cst_5 : f32 to vector<5x1xf32>
    %12 = arith.divf %10, %11 : vector<5x1xf32>
    %13 = vector.broadcast %5 : vector<5x1xf32> to vector<5x64xf32>
    %14 = arith.subf %1, %13 : vector<5x64xf32>
    %cst_6 = arith.constant 9.99999974E-6 : f32
    %15 = vector.broadcast %cst_6 : f32 to vector<5x1xf32>
    %16 = arith.addf %12, %15 : vector<5x1xf32>
    %17 = math.rsqrt %16 : vector<5x1xf32>
    %18 = vector.broadcast %17 : vector<5x1xf32> to vector<5x64xf32>
    %19 = arith.mulf %14, %18 : vector<5x64xf32>
    %c0_7 = arith.constant 0 : index
    %c0_8 = arith.constant 0 : index
    %20 = vector.load %arg3[%c0_7, %c0_8] : memref<1x64xf32, #tpu.memory_space<vmem>>, vector<1x64xf32>
    %21 = vector.broadcast %20 : vector<1x64xf32> to vector<5x64xf32>
    %22 = arith.mulf %19, %21 : vector<5x64xf32>
    %c0_9 = arith.constant 0 : index
    %c0_10 = arith.constant 0 : index
    %23 = vector.load %arg4[%c0_9, %c0_10] : memref<1x64xf32, #tpu.memory_space<vmem>>, vector<1x64xf32>
    %24 = vector.broadcast %23 : vector<1x64xf32> to vector<5x64xf32>
    %25 = arith.addf %22, %24 : vector<5x64xf32>
    %26 = arith.truncf %25 : vector<5x64xf32> to vector<5x64xbf16>
    %c0_11 = arith.constant 0 : index
    %c0_12 = arith.constant 0 : index
    %c0_13 = arith.constant 0 : index
    %27 = vector.load %arg5[%c0_11, %c0_12, %c0_13] : memref<1x64x192xbf16, #tpu.memory_space<vmem>>, vector<1x64x192xbf16>
    %28 = vector.shape_cast %27 : vector<1x64x192xbf16> to vector<64x192xbf16>
    %cst_14 = arith.constant dense<0.000000e+00> : vector<5x192xf32>
    %29 = tpu.matmul %26, %28, %cst_14 {dimension_numbers = #tpu.dot_dimension_numbers<[1], [0], [0], [1], [0, 0, 1, 1], [], []>} : vector<5x64xbf16>, vector<64x192xbf16>, vector<5x192xf32> -> vector<5x192xf32>
    %c0_15 = arith.constant 0 : index
    %c0_16 = arith.constant 0 : index
    %c0_17 = arith.constant 0 : index
    %30 = vector.load %arg6[%c0_15, %c0_16, %c0_17] : memref<1x1x192xf32, #tpu.memory_space<vmem>>, vector<1x1x192xf32>
    %31 = vector.shape_cast %30 : vector<1x1x192xf32> to vector<1x192xf32>
    %32 = vector.broadcast %31 : vector<1x192xf32> to vector<5x192xf32>
    %33 = arith.addf %29, %32 : vector<5x192xf32>
    %34 = vector.extract_strided_slice %33 {offsets = [0, 0], sizes = [5, 64], strides = [1, 1]} : vector<5x192xf32> to vector<5x64xf32>
    %cst_18 = arith.constant 2.500000e-01 : f32
    %35 = vector.broadcast %cst_18 : f32 to vector<5x64xf32>
    %36 = arith.mulf %34, %35 : vector<5x64xf32>
    %37 = vector.extract_strided_slice %33 {offsets = [0, 64], sizes = [5, 64], strides = [1, 1]} : vector<5x192xf32> to vector<5x64xf32>
    %38 = vector.extract_strided_slice %33 {offsets = [0, 128], sizes = [5, 64], strides = [1, 1]} : vector<5x192xf32> to vector<5x64xf32>
    %39 = vector.extract_strided_slice %36 {offsets = [0, 0], sizes = [5, 16], strides = [1, 1]} : vector<5x64xf32> to vector<5x16xf32>
    %40 = vector.extract_strided_slice %37 {offsets = [0, 0], sizes = [5, 16], strides = [1, 1]} : vector<5x64xf32> to vector<5x16xf32>
    %cst_19 = arith.constant dense<0.000000e+00> : vector<5x5xf32>
    %41 = tpu.matmul %39, %40, %cst_19 {dimension_numbers = #tpu.dot_dimension_numbers<[1], [1], [0], [0], [0, 0, 1, 0], [], []>} : vector<5x16xf32>, vector<5x16xf32>, vector<5x5xf32> -> vector<5x5xf32>
    %cst_20 = arith.constant dense<0xFF800000> : vector<5xf32>
    %42 = vector.multi_reduction <maximumf>, %41, %cst_20 [1] : vector<5x5xf32> to vector<5xf32>
    %43 = vector.shape_cast %42 : vector<5xf32> to vector<5x1xf32>
    %44 = vector.broadcast %43 : vector<5x1xf32> to vector<5x5xf32>
    %45 = arith.subf %41, %44 : vector<5x5xf32>
    %46 = math.exp %45 : vector<5x5xf32>
    %cst_21 = arith.constant dense<0.000000e+00> : vector<5xf32>
    %47 = vector.multi_reduction <add>, %46, %cst_21 [1] : vector<5x5xf32> to vector<5xf32>
    %48 = vector.shape_cast %47 : vector<5xf32> to vector<5x1xf32>
    %49 = tpu.reciprocal %48 {approx = true} : vector<5x1xf32> -> vector<5x1xf32>
    %50 = vector.broadcast %49 : vector<5x1xf32> to vector<5x5xf32>
    %51 = arith.mulf %46, %50 : vector<5x5xf32>
    %52 = arith.truncf %51 : vector<5x5xf32> to vector<5x5xbf16>
    %53 = vector.extract_strided_slice %38 {offsets = [0, 0], sizes = [5, 16], strides = [1, 1]} : vector<5x64xf32> to vector<5x16xf32>
    %54 = arith.truncf %53 : vector<5x16xf32> to vector<5x16xbf16>
    %cst_22 = arith.constant dense<0.000000e+00> : vector<5x16xf32>
    %55 = tpu.matmul %52, %54, %cst_22 {dimension_numbers = #tpu.dot_dimension_numbers<[1], [0], [0], [1], [0, 0, 1, 1], [], []>} : vector<5x5xbf16>, vector<5x16xbf16>, vector<5x16xf32> -> vector<5x16xf32>
    %56 = vector.extract_strided_slice %36 {offsets = [0, 16], sizes = [5, 16], strides = [1, 1]} : vector<5x64xf32> to vector<5x16xf32>
    %57 = vector.extract_strided_slice %37 {offsets = [0, 16], sizes = [5, 16], strides = [1, 1]} : vector<5x64xf32> to vector<5x16xf32>
    %cst_23 = arith.constant dense<0.000000e+00> : vector<5x5xf32>
    %58 = tpu.matmul %56, %57, %cst_23 {dimension_numbers = #tpu.dot_dimension_numbers<[1], [1], [0], [0], [0, 0, 1, 0], [], []>} : vector<5x16xf32>, vector<5x16xf32>, vector<5x5xf32> -> vector<5x5xf32>
    %cst_24 = arith.constant dense<0xFF800000> : vector<5xf32>
    %59 = vector.multi_reduction <maximumf>, %58, %cst_24 [1] : vector<5x5xf32> to vector<5xf32>
    %60 = vector.shape_cast %59 : vector<5xf32> to vector<5x1xf32>
    %61 = vector.broadcast %60 : vector<5x1xf32> to vector<5x5xf32>
    %62 = arith.subf %58, %61 : vector<5x5xf32>
    %63 = math.exp %62 : vector<5x5xf32>
    %cst_25 = arith.constant dense<0.000000e+00> : vector<5xf32>
    %64 = vector.multi_reduction <add>, %63, %cst_25 [1] : vector<5x5xf32> to vector<5xf32>
    %65 = vector.shape_cast %64 : vector<5xf32> to vector<5x1xf32>
    %66 = tpu.reciprocal %65 {approx = true} : vector<5x1xf32> -> vector<5x1xf32>
    %67 = vector.broadcast %66 : vector<5x1xf32> to vector<5x5xf32>
    %68 = arith.mulf %63, %67 : vector<5x5xf32>
    %69 = arith.truncf %68 : vector<5x5xf32> to vector<5x5xbf16>
    %70 = vector.extract_strided_slice %38 {offsets = [0, 16], sizes = [5, 16], strides = [1, 1]} : vector<5x64xf32> to vector<5x16xf32>
    %71 = arith.truncf %70 : vector<5x16xf32> to vector<5x16xbf16>
    %cst_26 = arith.constant dense<0.000000e+00> : vector<5x16xf32>
    %72 = tpu.matmul %69, %71, %cst_26 {dimension_numbers = #tpu.dot_dimension_numbers<[1], [0], [0], [1], [0, 0, 1, 1], [], []>} : vector<5x5xbf16>, vector<5x16xbf16>, vector<5x16xf32> -> vector<5x16xf32>
    %73 = vector.extract_strided_slice %36 {offsets = [0, 32], sizes = [5, 16], strides = [1, 1]} : vector<5x64xf32> to vector<5x16xf32>
    %74 = vector.extract_strided_slice %37 {offsets = [0, 32], sizes = [5, 16], strides = [1, 1]} : vector<5x64xf32> to vector<5x16xf32>
    %cst_27 = arith.constant dense<0.000000e+00> : vector<5x5xf32>
    %75 = tpu.matmul %73, %74, %cst_27 {dimension_numbers = #tpu.dot_dimension_numbers<[1], [1], [0], [0], [0, 0, 1, 0], [], []>} : vector<5x16xf32>, vector<5x16xf32>, vector<5x5xf32> -> vector<5x5xf32>
    %cst_28 = arith.constant dense<0xFF800000> : vector<5xf32>
    %76 = vector.multi_reduction <maximumf>, %75, %cst_28 [1] : vector<5x5xf32> to vector<5xf32>
    %77 = vector.shape_cast %76 : vector<5xf32> to vector<5x1xf32>
    %78 = vector.broadcast %77 : vector<5x1xf32> to vector<5x5xf32>
    %79 = arith.subf %75, %78 : vector<5x5xf32>
    %80 = math.exp %79 : vector<5x5xf32>
    %cst_29 = arith.constant dense<0.000000e+00> : vector<5xf32>
    %81 = vector.multi_reduction <add>, %80, %cst_29 [1] : vector<5x5xf32> to vector<5xf32>
    %82 = vector.shape_cast %81 : vector<5xf32> to vector<5x1xf32>
    %83 = tpu.reciprocal %82 {approx = true} : vector<5x1xf32> -> vector<5x1xf32>
    %84 = vector.broadcast %83 : vector<5x1xf32> to vector<5x5xf32>
    %85 = arith.mulf %80, %84 : vector<5x5xf32>
    %86 = arith.truncf %85 : vector<5x5xf32> to vector<5x5xbf16>
    %87 = vector.extract_strided_slice %38 {offsets = [0, 32], sizes = [5, 16], strides = [1, 1]} : vector<5x64xf32> to vector<5x16xf32>
    %88 = arith.truncf %87 : vector<5x16xf32> to vector<5x16xbf16>
    %cst_30 = arith.constant dense<0.000000e+00> : vector<5x16xf32>
    %89 = tpu.matmul %86, %88, %cst_30 {dimension_numbers = #tpu.dot_dimension_numbers<[1], [0], [0], [1], [0, 0, 1, 1], [], []>} : vector<5x5xbf16>, vector<5x16xbf16>, vector<5x16xf32> -> vector<5x16xf32>
    %90 = vector.extract_strided_slice %36 {offsets = [0, 48], sizes = [5, 16], strides = [1, 1]} : vector<5x64xf32> to vector<5x16xf32>
    %91 = vector.extract_strided_slice %37 {offsets = [0, 48], sizes = [5, 16], strides = [1, 1]} : vector<5x64xf32> to vector<5x16xf32>
    %cst_31 = arith.constant dense<0.000000e+00> : vector<5x5xf32>
    %92 = tpu.matmul %90, %91, %cst_31 {dimension_numbers = #tpu.dot_dimension_numbers<[1], [1], [0], [0], [0, 0, 1, 0], [], []>} : vector<5x16xf32>, vector<5x16xf32>, vector<5x5xf32> -> vector<5x5xf32>
    %cst_32 = arith.constant dense<0xFF800000> : vector<5xf32>
    %93 = vector.multi_reduction <maximumf>, %92, %cst_32 [1] : vector<5x5xf32> to vector<5xf32>
    %94 = vector.shape_cast %93 : vector<5xf32> to vector<5x1xf32>
    %95 = vector.broadcast %94 : vector<5x1xf32> to vector<5x5xf32>
    %96 = arith.subf %92, %95 : vector<5x5xf32>
    %97 = math.exp %96 : vector<5x5xf32>
    %cst_33 = arith.constant dense<0.000000e+00> : vector<5xf32>
    %98 = vector.multi_reduction <add>, %97, %cst_33 [1] : vector<5x5xf32> to vector<5xf32>
    %99 = vector.shape_cast %98 : vector<5xf32> to vector<5x1xf32>
    %100 = tpu.reciprocal %99 {approx = true} : vector<5x1xf32> -> vector<5x1xf32>
    %101 = vector.broadcast %100 : vector<5x1xf32> to vector<5x5xf32>
    %102 = arith.mulf %97, %101 : vector<5x5xf32>
    %103 = arith.truncf %102 : vector<5x5xf32> to vector<5x5xbf16>
    %104 = vector.extract_strided_slice %38 {offsets = [0, 48], sizes = [5, 16], strides = [1, 1]} : vector<5x64xf32> to vector<5x16xf32>
    %105 = arith.truncf %104 : vector<5x16xf32> to vector<5x16xbf16>
    %cst_34 = arith.constant dense<0.000000e+00> : vector<5x16xf32>
    %106 = tpu.matmul %103, %105, %cst_34 {dimension_numbers = #tpu.dot_dimension_numbers<[1], [0], [0], [1], [0, 0, 1, 1], [], []>} : vector<5x5xbf16>, vector<5x16xbf16>, vector<5x16xf32> -> vector<5x16xf32>
    %107 = tpu.concatenate %55, %72, %89, %106 in 1 : vector<5x16xf32>, vector<5x16xf32>, vector<5x16xf32>, vector<5x16xf32> -> vector<5x64xf32>
    %108 = arith.truncf %107 : vector<5x64xf32> to vector<5x64xbf16>
    %c0_35 = arith.constant 0 : index
    %c0_36 = arith.constant 0 : index
    %c0_37 = arith.constant 0 : index
    %109 = vector.load %arg7[%c0_35, %c0_36, %c0_37] : memref<1x64x64xbf16, #tpu.memory_space<vmem>>, vector<1x64x64xbf16>
    %110 = vector.shape_cast %109 : vector<1x64x64xbf16> to vector<64x64xbf16>
    %cst_38 = arith.constant dense<0.000000e+00> : vector<5x64xf32>
    %111 = tpu.matmul %108, %110, %cst_38 {dimension_numbers = #tpu.dot_dimension_numbers<[1], [0], [0], [1], [0, 0, 1, 1], [], []>} : vector<5x64xbf16>, vector<64x64xbf16>, vector<5x64xf32> -> vector<5x64xf32>
    %c0_39 = arith.constant 0 : index
    %c0_40 = arith.constant 0 : index
    %c0_41 = arith.constant 0 : index
    %112 = vector.load %arg8[%c0_39, %c0_40, %c0_41] : memref<1x1x64xf32, #tpu.memory_space<vmem>>, vector<1x1x64xf32>
    %113 = vector.shape_cast %112 : vector<1x1x64xf32> to vector<1x64xf32>
    %114 = vector.broadcast %113 : vector<1x64xf32> to vector<5x64xf32>
    %115 = arith.addf %111, %114 : vector<5x64xf32>
    %c0_42 = arith.constant 0 : index
    %c0_43 = arith.constant 0 : index
    %c0_44 = arith.constant 0 : index
    %116 = vector.load %arg9[%c0_42, %c0_43, %c0_44] : memref<1x64x12xbf16, #tpu.memory_space<vmem>>, vector<1x64x12xbf16>
    %117 = vector.shape_cast %116 : vector<1x64x12xbf16> to vector<64x12xbf16>
    %cst_45 = arith.constant dense<0.000000e+00> : vector<5x12xf32>
    %118 = tpu.matmul %108, %117, %cst_45 {dimension_numbers = #tpu.dot_dimension_numbers<[1], [0], [0], [1], [0, 0, 1, 1], [], []>} : vector<5x64xbf16>, vector<64x12xbf16>, vector<5x12xf32> -> vector<5x12xf32>
    %119 = arith.truncf %118 : vector<5x12xf32> to vector<5x12xbf16>
    %c0_46 = arith.constant 0 : index
    %c0_47 = arith.constant 0 : index
    %c0_48 = arith.constant 0 : index
    %120 = vector.load %arg10[%c0_46, %c0_47, %c0_48] : memref<1x12x64xbf16, #tpu.memory_space<vmem>>, vector<1x12x64xbf16>
    %121 = vector.shape_cast %120 : vector<1x12x64xbf16> to vector<12x64xbf16>
    %cst_49 = arith.constant dense<0.000000e+00> : vector<5x64xf32>
    %122 = tpu.matmul %119, %121, %cst_49 {dimension_numbers = #tpu.dot_dimension_numbers<[1], [0], [0], [1], [0, 0, 1, 1], [], []>} : vector<5x12xbf16>, vector<12x64xbf16>, vector<5x64xf32> -> vector<5x64xf32>
    %cst_50 = arith.constant 2.000000e+00 : f32
    %123 = vector.broadcast %cst_50 : f32 to vector<5x64xf32>
    %124 = arith.mulf %123, %122 : vector<5x64xf32>
    %125 = arith.addf %115, %124 : vector<5x64xf32>
    %126 = arith.addf %1, %125 : vector<5x64xf32>
    %c0_51 = arith.constant 0 : index
    %c0_52 = arith.constant 0 : index
    %c0_53 = arith.constant 0 : index
    %c0_54 = arith.constant 0 : index
    %127 = vector.load %arg11[%c0_51, %c0_52, %c0_53, %c0_54] : memref<1x1x5x64xf32, #tpu.memory_space<vmem>>, vector<1x1x5x64xf32>
    %128 = vector.shape_cast %127 : vector<1x1x5x64xf32> to vector<5x64xf32>
    %129 = vector.shape_cast %126 : vector<5x64xf32> to vector<1x1x5x64xf32>
    tpu.vector_store %arg11[%c0_51, %c0_52, %c0_53, %c0_54], %129 {strides = array<i32>} : memref<1x1x5x64xf32, #tpu.memory_space<vmem>>, vector<1x1x5x64xf32>,
    return
  }
  func.func @transform_0(%arg0: i32, %arg1: i32) -> (i32, i32, i32, i32) {
    %c0_i32 = arith.constant 0 : i32
    %c0_i32_0 = arith.constant 0 : i32
    %c0_i32_1 = arith.constant 0 : i32
    return %arg0, %arg1, %c0_i32, %c0_i32_0 : i32, i32, i32, i32
  }
  func.func @transform_1(%arg0: i32, %arg1: i32) -> (i32, i32) {
    %c0_i32 = arith.constant 0 : i32
    %c0_i32_0 = arith.constant 0 : i32
    %c0_i32_1 = arith.constant 0 : i32
    return %c0_i32, %c0_i32_0 : i32, i32
  }
  func.func @transform_2(%arg0: i32, %arg1: i32) -> (i32, i32) {
    %c0_i32 = arith.constant 0 : i32
    %c0_i32_0 = arith.constant 0 : i32
    %c0_i32_1 = arith.constant 0 : i32
    return %c0_i32, %c0_i32_0 : i32, i32
  }
  func.func @transform_3(%arg0: i32, %arg1: i32) -> (i32, i32, i32) {
    %c0_i32 = arith.constant 0 : i32
    %c0_i32_0 = arith.constant 0 : i32
    %c0_i32_1 = arith.constant 0 : i32
    return %arg0, %c0_i32, %c0_i32_0 : i32, i32, i32
  }
  func.func @transform_4(%arg0: i32, %arg1: i32) -> (i32, i32, i32) {
    %c0_i32 = arith.constant 0 : i32
    %c0_i32_0 = arith.constant 0 : i32
    %c0_i32_1 = arith.constant 0 : i32
    return %arg0, %c0_i32, %c0_i32_0 : i32, i32, i32
  }
  func.func @transform_5(%arg0: i32, %arg1: i32) -> (i32, i32, i32) {
    %c0_i32 = arith.constant 0 : i32
    %c0_i32_0 = arith.constant 0 : i32
    %c0_i32_1 = arith.constant 0 : i32
    return %arg0, %c0_i32, %c0_i32_0 : i32, i32, i32
  }
  func.func @transform_6(%arg0: i32, %arg1: i32) -> (i32, i32, i32) {
    %c0_i32 = arith.constant 0 : i32
    %c0_i32_0 = arith.constant 0 : i32
    %c0_i32_1 = arith.constant 0 : i32
    return %arg0, %c0_i32, %c0_i32_0 : i32, i32, i32
  }
  func.func @transform_7(%arg0: i32, %arg1: i32) -> (i32, i32, i32) {
    %c0_i32 = arith.constant 0 : i32
    %c0_i32_0 = arith.constant 0 : i32
    %c0_i32_1 = arith.constant 0 : i32
    return %arg0, %c0_i32, %c0_i32_0 : i32, i32, i32
  }
  func.func @transform_8(%arg0: i32, %arg1: i32) -> (i32, i32, i32) {
    %c0_i32 = arith.constant 0 : i32
    %c0_i32_0 = arith.constant 0 : i32
    %c0_i32_1 = arith.constant 0 : i32
    return %arg0, %c0_i32, %c0_i32_0 : i32, i32, i32
  }
  func.func @transform_9(%arg0: i32, %arg1: i32) -> (i32, i32, i32, i32) {
    %c0_i32 = arith.constant 0 : i32
    %c0_i32_0 = arith.constant 0 : i32
    %c0_i32_1 = arith.constant 0 : i32
    return %arg0, %arg1, %c0_i32, %c0_i32_0 : i32, i32, i32, i32
  }
}

module attributes {stable_mosaic.version = 11 : i64} {
  func.func @_mlp_block_kernel(%arg0: memref<16x32xf32, #tpu.memory_space<vmem>>, %arg1: memref<1x32xf32, #tpu.memory_space<vmem>>, %arg2: memref<1x32xf32, #tpu.memory_space<vmem>>, %arg3: memref<32x128xbf16, #tpu.memory_space<vmem>>, %arg4: memref<1x128xf32, #tpu.memory_space<vmem>>, %arg5: memref<128x32xbf16, #tpu.memory_space<vmem>>, %arg6: memref<1x32xf32, #tpu.memory_space<vmem>>, %arg7: memref<16x32xf32, #tpu.memory_space<vmem>>) attributes {dimension_semantics = [], scalar_prefetch = 0 : i64, scratch_operands = 0 : i64, tpu.core_type = #tpu.core_type<tc>} {
    %c0 = arith.constant 0 : index
    %c0_0 = arith.constant 0 : index
    %0 = vector.load %arg0[%c0, %c0_0] : memref<16x32xf32, #tpu.memory_space<vmem>>, vector<16x32xf32>
    %cst = arith.constant dense<0.000000e+00> : vector<16xf32>
    %1 = vector.multi_reduction <add>, %0, %cst [1] : vector<16x32xf32> to vector<16xf32>
    %2 = vector.shape_cast %1 : vector<16xf32> to vector<16x1xf32>
    %cst_1 = arith.constant 3.200000e+01 : f32
    %3 = vector.broadcast %cst_1 : f32 to vector<16x1xf32>
    %4 = arith.divf %2, %3 : vector<16x1xf32>
    %5 = vector.broadcast %4 : vector<16x1xf32> to vector<16x32xf32>
    %6 = arith.subf %0, %5 : vector<16x32xf32>
    %7 = arith.mulf %6, %6 : vector<16x32xf32>
    %cst_2 = arith.constant dense<0.000000e+00> : vector<16xf32>
    %8 = vector.multi_reduction <add>, %7, %cst_2 [1] : vector<16x32xf32> to vector<16xf32>
    %9 = vector.shape_cast %8 : vector<16xf32> to vector<16x1xf32>
    %cst_3 = arith.constant 3.200000e+01 : f32
    %10 = vector.broadcast %cst_3 : f32 to vector<16x1xf32>
    %11 = arith.divf %9, %10 : vector<16x1xf32>
    %12 = vector.broadcast %4 : vector<16x1xf32> to vector<16x32xf32>
    %13 = arith.subf %0, %12 : vector<16x32xf32>
    %cst_4 = arith.constant 9.99999974E-6 : f32
    %14 = vector.broadcast %cst_4 : f32 to vector<16x1xf32>
    %15 = arith.addf %11, %14 : vector<16x1xf32>
    %16 = math.rsqrt %15 : vector<16x1xf32>
    %17 = vector.broadcast %16 : vector<16x1xf32> to vector<16x32xf32>
    %18 = arith.mulf %13, %17 : vector<16x32xf32>
    %c0_5 = arith.constant 0 : index
    %c0_6 = arith.constant 0 : index
    %19 = vector.load %arg1[%c0_5, %c0_6] : memref<1x32xf32, #tpu.memory_space<vmem>>, vector<1x32xf32>
    %20 = vector.broadcast %19 : vector<1x32xf32> to vector<16x32xf32>
    %21 = arith.mulf %18, %20 : vector<16x32xf32>
    %c0_7 = arith.constant 0 : index
    %c0_8 = arith.constant 0 : index
    %22 = vector.load %arg2[%c0_7, %c0_8] : memref<1x32xf32, #tpu.memory_space<vmem>>, vector<1x32xf32>
    %23 = vector.broadcast %22 : vector<1x32xf32> to vector<16x32xf32>
    %24 = arith.addf %21, %23 : vector<16x32xf32>
    %25 = arith.truncf %24 : vector<16x32xf32> to vector<16x32xbf16>
    %c0_9 = arith.constant 0 : index
    %c0_10 = arith.constant 0 : index
    %26 = vector.load %arg3[%c0_9, %c0_10] : memref<32x128xbf16, #tpu.memory_space<vmem>>, vector<32x128xbf16>
    %cst_11 = arith.constant dense<0.000000e+00> : vector<16x128xf32>
    %27 = tpu.matmul %25, %26, %cst_11 {dimension_numbers = #tpu.dot_dimension_numbers<[1], [0], [0], [1], [0, 0, 1, 1], [], []>} : vector<16x32xbf16>, vector<32x128xbf16>, vector<16x128xf32> -> vector<16x128xf32>
    %c0_12 = arith.constant 0 : index
    %c0_13 = arith.constant 0 : index
    %28 = vector.load %arg4[%c0_12, %c0_13] : memref<1x128xf32, #tpu.memory_space<vmem>>, vector<1x128xf32>
    %29 = vector.broadcast %28 : vector<1x128xf32> to vector<16x128xf32>
    %30 = arith.addf %27, %29 : vector<16x128xf32>
    %cst_14 = arith.constant 1.702000e+00 : f32
    %31 = vector.broadcast %cst_14 : f32 to vector<16x128xf32>
    %32 = arith.mulf %31, %30 : vector<16x128xf32>
    %33 = arith.negf %32 : vector<16x128xf32>
    %34 = math.exp %33 : vector<16x128xf32>
    %cst_15 = arith.constant 1.000000e+00 : f32
    %35 = vector.broadcast %cst_15 : f32 to vector<16x128xf32>
    %36 = arith.addf %35, %34 : vector<16x128xf32>
    %37 = arith.divf %35, %36 : vector<16x128xf32>
    %38 = arith.mulf %30, %37 : vector<16x128xf32>
    %39 = arith.truncf %38 : vector<16x128xf32> to vector<16x128xbf16>
    %c0_16 = arith.constant 0 : index
    %c0_17 = arith.constant 0 : index
    %40 = vector.load %arg5[%c0_16, %c0_17] : memref<128x32xbf16, #tpu.memory_space<vmem>>, vector<128x32xbf16>
    %cst_18 = arith.constant dense<0.000000e+00> : vector<16x32xf32>
    %41 = tpu.matmul %39, %40, %cst_18 {dimension_numbers = #tpu.dot_dimension_numbers<[1], [0], [0], [1], [0, 0, 1, 1], [], []>} : vector<16x128xbf16>, vector<128x32xbf16>, vector<16x32xf32> -> vector<16x32xf32>
    %c0_19 = arith.constant 0 : index
    %c0_20 = arith.constant 0 : index
    %42 = vector.load %arg6[%c0_19, %c0_20] : memref<1x32xf32, #tpu.memory_space<vmem>>, vector<1x32xf32>
    %43 = vector.broadcast %42 : vector<1x32xf32> to vector<16x32xf32>
    %44 = arith.addf %41, %43 : vector<16x32xf32>
    %45 = arith.addf %0, %44 : vector<16x32xf32>
    %c0_21 = arith.constant 0 : index
    %c0_22 = arith.constant 0 : index
    %46 = vector.load %arg7[%c0_21, %c0_22] : memref<16x32xf32, #tpu.memory_space<vmem>>, vector<16x32xf32>
    tpu.vector_store %arg7[%c0_21, %c0_22], %45 {strides = array<i32>} : memref<16x32xf32, #tpu.memory_space<vmem>>, vector<16x32xf32>,
    return
  }
}

module attributes {stable_mosaic.version = 11 : i64} {
  func.func @_attn_block_kernel(%arg0: i32, %arg1: i32, %arg2: memref<1x1x8x32xf32, #tpu.memory_space<vmem>>, %arg3: memref<1x32xf32, #tpu.memory_space<vmem>>, %arg4: memref<1x32xf32, #tpu.memory_space<vmem>>, %arg5: memref<1x32x96xbf16, #tpu.memory_space<vmem>>, %arg6: memref<1x1x96xf32, #tpu.memory_space<vmem>>, %arg7: memref<1x32x32xbf16, #tpu.memory_space<vmem>>, %arg8: memref<1x1x32xf32, #tpu.memory_space<vmem>>, %arg9: memref<1x1x8x32xf32, #tpu.memory_space<vmem>>) attributes {dimension_semantics = [#tpu.dimension_semantics<parallel>, #tpu.dimension_semantics<parallel>], iteration_bounds = array<i64: 1, 2>, scalar_prefetch = 0 : i64, scratch_operands = 0 : i64, tpu.core_type = #tpu.core_type<tc>, window_params = [{transform_indices = @transform_0, window_bounds = array<i64: 1, 1, 8, 32>}, {pipeline_mode = #tpu.pipeline_mode<synchronous>, transform_indices = @transform_1, window_bounds = array<i64: 1, 32>}, {pipeline_mode = #tpu.pipeline_mode<synchronous>, transform_indices = @transform_2, window_bounds = array<i64: 1, 32>}, {transform_indices = @transform_3, window_bounds = array<i64: 1, 32, 96>}, {transform_indices = @transform_4, window_bounds = array<i64: 1, 1, 96>}, {transform_indices = @transform_5, window_bounds = array<i64: 1, 32, 32>}, {transform_indices = @transform_6, window_bounds = array<i64: 1, 1, 32>}, {transform_indices = @transform_7, window_bounds = array<i64: 1, 1, 8, 32>}]} {
    %c0 = arith.constant 0 : index
    %c0_0 = arith.constant 0 : index
    %c0_1 = arith.constant 0 : index
    %c0_2 = arith.constant 0 : index
    %0 = vector.load %arg2[%c0, %c0_0, %c0_1, %c0_2] : memref<1x1x8x32xf32, #tpu.memory_space<vmem>>, vector<1x1x8x32xf32>
    %1 = vector.shape_cast %0 : vector<1x1x8x32xf32> to vector<8x32xf32>
    %cst = arith.constant dense<0.000000e+00> : vector<8xf32>
    %2 = vector.multi_reduction <add>, %1, %cst [1] : vector<8x32xf32> to vector<8xf32>
    %3 = vector.shape_cast %2 : vector<8xf32> to vector<8x1xf32>
    %cst_3 = arith.constant 3.200000e+01 : f32
    %4 = vector.broadcast %cst_3 : f32 to vector<8x1xf32>
    %5 = arith.divf %3, %4 : vector<8x1xf32>
    %6 = vector.broadcast %5 : vector<8x1xf32> to vector<8x32xf32>
    %7 = arith.subf %1, %6 : vector<8x32xf32>
    %8 = arith.mulf %7, %7 : vector<8x32xf32>
    %cst_4 = arith.constant dense<0.000000e+00> : vector<8xf32>
    %9 = vector.multi_reduction <add>, %8, %cst_4 [1] : vector<8x32xf32> to vector<8xf32>
    %10 = vector.shape_cast %9 : vector<8xf32> to vector<8x1xf32>
    %cst_5 = arith.constant 3.200000e+01 : f32
    %11 = vector.broadcast %cst_5 : f32 to vector<8x1xf32>
    %12 = arith.divf %10, %11 : vector<8x1xf32>
    %13 = vector.broadcast %5 : vector<8x1xf32> to vector<8x32xf32>
    %14 = arith.subf %1, %13 : vector<8x32xf32>
    %cst_6 = arith.constant 9.99999974E-6 : f32
    %15 = vector.broadcast %cst_6 : f32 to vector<8x1xf32>
    %16 = arith.addf %12, %15 : vector<8x1xf32>
    %17 = math.rsqrt %16 : vector<8x1xf32>
    %18 = vector.broadcast %17 : vector<8x1xf32> to vector<8x32xf32>
    %19 = arith.mulf %14, %18 : vector<8x32xf32>
    %c0_7 = arith.constant 0 : index
    %c0_8 = arith.constant 0 : index
    %20 = vector.load %arg3[%c0_7, %c0_8] : memref<1x32xf32, #tpu.memory_space<vmem>>, vector<1x32xf32>
    %21 = vector.broadcast %20 : vector<1x32xf32> to vector<8x32xf32>
    %22 = arith.mulf %19, %21 : vector<8x32xf32>
    %c0_9 = arith.constant 0 : index
    %c0_10 = arith.constant 0 : index
    %23 = vector.load %arg4[%c0_9, %c0_10] : memref<1x32xf32, #tpu.memory_space<vmem>>, vector<1x32xf32>
    %24 = vector.broadcast %23 : vector<1x32xf32> to vector<8x32xf32>
    %25 = arith.addf %22, %24 : vector<8x32xf32>
    %26 = arith.truncf %25 : vector<8x32xf32> to vector<8x32xbf16>
    %c0_11 = arith.constant 0 : index
    %c0_12 = arith.constant 0 : index
    %c0_13 = arith.constant 0 : index
    %27 = vector.load %arg5[%c0_11, %c0_12, %c0_13] : memref<1x32x96xbf16, #tpu.memory_space<vmem>>, vector<1x32x96xbf16>
    %28 = vector.shape_cast %27 : vector<1x32x96xbf16> to vector<32x96xbf16>
    %cst_14 = arith.constant dense<0.000000e+00> : vector<8x96xf32>
    %29 = tpu.matmul %26, %28, %cst_14 {dimension_numbers = #tpu.dot_dimension_numbers<[1], [0], [0], [1], [0, 0, 1, 1], [], []>} : vector<8x32xbf16>, vector<32x96xbf16>, vector<8x96xf32> -> vector<8x96xf32>
    %c0_15 = arith.constant 0 : index
    %c0_16 = arith.constant 0 : index
    %c0_17 = arith.constant 0 : index
    %30 = vector.load %arg6[%c0_15, %c0_16, %c0_17] : memref<1x1x96xf32, #tpu.memory_space<vmem>>, vector<1x1x96xf32>
    %31 = vector.shape_cast %30 : vector<1x1x96xf32> to vector<1x96xf32>
    %32 = vector.broadcast %31 : vector<1x96xf32> to vector<8x96xf32>
    %33 = arith.addf %29, %32 : vector<8x96xf32>
    %34 = vector.extract_strided_slice %33 {offsets = [0, 0], sizes = [8, 32], strides = [1, 1]} : vector<8x96xf32> to vector<8x32xf32>
    %cst_18 = arith.constant 2.500000e-01 : f32
    %35 = vector.broadcast %cst_18 : f32 to vector<8x32xf32>
    %36 = arith.mulf %34, %35 : vector<8x32xf32>
    %37 = vector.extract_strided_slice %33 {offsets = [0, 32], sizes = [8, 32], strides = [1, 1]} : vector<8x96xf32> to vector<8x32xf32>
    %38 = vector.extract_strided_slice %33 {offsets = [0, 64], sizes = [8, 32], strides = [1, 1]} : vector<8x96xf32> to vector<8x32xf32>
    %39 = tpu.iota {dimensions = array<i32: 0>} : vector<8x8xi32>
    %40 = tpu.iota {dimensions = array<i32: 1>} : vector<8x8xi32>
    %41 = vector.extract_strided_slice %36 {offsets = [0, 0], sizes = [8, 16], strides = [1, 1]} : vector<8x32xf32> to vector<8x16xf32>
    %42 = vector.extract_strided_slice %37 {offsets = [0, 0], sizes = [8, 16], strides = [1, 1]} : vector<8x32xf32> to vector<8x16xf32>
    %cst_19 = arith.constant dense<0.000000e+00> : vector<8x8xf32>
    %43 = tpu.matmul %41, %42, %cst_19 {dimension_numbers = #tpu.dot_dimension_numbers<[1], [1], [0], [0], [0, 0, 1, 0], [], []>} : vector<8x16xf32>, vector<8x16xf32>, vector<8x8xf32> -> vector<8x8xf32>
    %44 = arith.cmpi sgt, %40, %39 : vector<8x8xi32>
    %cst_20 = arith.constant -1.000000e+09 : f32
    %45 = vector.broadcast %cst_20 : f32 to vector<8x8xf32>
    %46 = arith.select %44, %45, %43 : vector<8x8xi1>, vector<8x8xf32>
    %cst_21 = arith.constant dense<0xFF800000> : vector<8xf32>
    %47 = vector.multi_reduction <maximumf>, %46, %cst_21 [1] : vector<8x8xf32> to vector<8xf32>
    %48 = vector.shape_cast %47 : vector<8xf32> to vector<8x1xf32>
    %49 = vector.broadcast %48 : vector<8x1xf32> to vector<8x8xf32>
    %50 = arith.subf %46, %49 : vector<8x8xf32>
    %51 = math.exp %50 : vector<8x8xf32>
    %cst_22 = arith.constant dense<0.000000e+00> : vector<8xf32>
    %52 = vector.multi_reduction <add>, %51, %cst_22 [1] : vector<8x8xf32> to vector<8xf32>
    %53 = vector.shape_cast %52 : vector<8xf32> to vector<8x1xf32>
    %54 = tpu.reciprocal %53 {approx = true} : vector<8x1xf32> -> vector<8x1xf32>
    %55 = vector.broadcast %54 : vector<8x1xf32> to vector<8x8xf32>
    %56 = arith.mulf %51, %55 : vector<8x8xf32>
    %57 = arith.truncf %56 : vector<8x8xf32> to vector<8x8xbf16>
    %58 = vector.extract_strided_slice %38 {offsets = [0, 0], sizes = [8, 16], strides = [1, 1]} : vector<8x32xf32> to vector<8x16xf32>
    %59 = arith.truncf %58 : vector<8x16xf32> to vector<8x16xbf16>
    %cst_23 = arith.constant dense<0.000000e+00> : vector<8x16xf32>
    %60 = tpu.matmul %57, %59, %cst_23 {dimension_numbers = #tpu.dot_dimension_numbers<[1], [0], [0], [1], [0, 0, 1, 1], [], []>} : vector<8x8xbf16>, vector<8x16xbf16>, vector<8x16xf32> -> vector<8x16xf32>
    %61 = vector.extract_strided_slice %36 {offsets = [0, 16], sizes = [8, 16], strides = [1, 1]} : vector<8x32xf32> to vector<8x16xf32>
    %62 = vector.extract_strided_slice %37 {offsets = [0, 16], sizes = [8, 16], strides = [1, 1]} : vector<8x32xf32> to vector<8x16xf32>
    %cst_24 = arith.constant dense<0.000000e+00> : vector<8x8xf32>
    %63 = tpu.matmul %61, %62, %cst_24 {dimension_numbers = #tpu.dot_dimension_numbers<[1], [1], [0], [0], [0, 0, 1, 0], [], []>} : vector<8x16xf32>, vector<8x16xf32>, vector<8x8xf32> -> vector<8x8xf32>
    %64 = arith.cmpi sgt, %40, %39 : vector<8x8xi32>
    %cst_25 = arith.constant -1.000000e+09 : f32
    %65 = vector.broadcast %cst_25 : f32 to vector<8x8xf32>
    %66 = arith.select %64, %65, %63 : vector<8x8xi1>, vector<8x8xf32>
    %cst_26 = arith.constant dense<0xFF800000> : vector<8xf32>
    %67 = vector.multi_reduction <maximumf>, %66, %cst_26 [1] : vector<8x8xf32> to vector<8xf32>
    %68 = vector.shape_cast %67 : vector<8xf32> to vector<8x1xf32>
    %69 = vector.broadcast %68 : vector<8x1xf32> to vector<8x8xf32>
    %70 = arith.subf %66, %69 : vector<8x8xf32>
    %71 = math.exp %70 : vector<8x8xf32>
    %cst_27 = arith.constant dense<0.000000e+00> : vector<8xf32>
    %72 = vector.multi_reduction <add>, %71, %cst_27 [1] : vector<8x8xf32> to vector<8xf32>
    %73 = vector.shape_cast %72 : vector<8xf32> to vector<8x1xf32>
    %74 = tpu.reciprocal %73 {approx = true} : vector<8x1xf32> -> vector<8x1xf32>
    %75 = vector.broadcast %74 : vector<8x1xf32> to vector<8x8xf32>
    %76 = arith.mulf %71, %75 : vector<8x8xf32>
    %77 = arith.truncf %76 : vector<8x8xf32> to vector<8x8xbf16>
    %78 = vector.extract_strided_slice %38 {offsets = [0, 16], sizes = [8, 16], strides = [1, 1]} : vector<8x32xf32> to vector<8x16xf32>
    %79 = arith.truncf %78 : vector<8x16xf32> to vector<8x16xbf16>
    %cst_28 = arith.constant dense<0.000000e+00> : vector<8x16xf32>
    %80 = tpu.matmul %77, %79, %cst_28 {dimension_numbers = #tpu.dot_dimension_numbers<[1], [0], [0], [1], [0, 0, 1, 1], [], []>} : vector<8x8xbf16>, vector<8x16xbf16>, vector<8x16xf32> -> vector<8x16xf32>
    %81 = tpu.concatenate %60, %80 in 1 : vector<8x16xf32>, vector<8x16xf32> -> vector<8x32xf32>
    %82 = arith.truncf %81 : vector<8x32xf32> to vector<8x32xbf16>
    %c0_29 = arith.constant 0 : index
    %c0_30 = arith.constant 0 : index
    %c0_31 = arith.constant 0 : index
    %83 = vector.load %arg7[%c0_29, %c0_30, %c0_31] : memref<1x32x32xbf16, #tpu.memory_space<vmem>>, vector<1x32x32xbf16>
    %84 = vector.shape_cast %83 : vector<1x32x32xbf16> to vector<32x32xbf16>
    %cst_32 = arith.constant dense<0.000000e+00> : vector<8x32xf32>
    %85 = tpu.matmul %82, %84, %cst_32 {dimension_numbers = #tpu.dot_dimension_numbers<[1], [0], [0], [1], [0, 0, 1, 1], [], []>} : vector<8x32xbf16>, vector<32x32xbf16>, vector<8x32xf32> -> vector<8x32xf32>
    %c0_33 = arith.constant 0 : index
    %c0_34 = arith.constant 0 : index
    %c0_35 = arith.constant 0 : index
    %86 = vector.load %arg8[%c0_33, %c0_34, %c0_35] : memref<1x1x32xf32, #tpu.memory_space<vmem>>, vector<1x1x32xf32>
    %87 = vector.shape_cast %86 : vector<1x1x32xf32> to vector<1x32xf32>
    %88 = vector.broadcast %87 : vector<1x32xf32> to vector<8x32xf32>
    %89 = arith.addf %85, %88 : vector<8x32xf32>
    %90 = arith.addf %1, %89 : vector<8x32xf32>
    %c0_36 = arith.constant 0 : index
    %c0_37 = arith.constant 0 : index
    %c0_38 = arith.constant 0 : index
    %c0_39 = arith.constant 0 : index
    %91 = vector.load %arg9[%c0_36, %c0_37, %c0_38, %c0_39] : memref<1x1x8x32xf32, #tpu.memory_space<vmem>>, vector<1x1x8x32xf32>
    %92 = vector.shape_cast %91 : vector<1x1x8x32xf32> to vector<8x32xf32>
    %93 = vector.shape_cast %90 : vector<8x32xf32> to vector<1x1x8x32xf32>
    tpu.vector_store %arg9[%c0_36, %c0_37, %c0_38, %c0_39], %93 {strides = array<i32>} : memref<1x1x8x32xf32, #tpu.memory_space<vmem>>, vector<1x1x8x32xf32>,
    return
  }
  func.func @transform_0(%arg0: i32, %arg1: i32) -> (i32, i32, i32, i32) {
    %c0_i32 = arith.constant 0 : i32
    %c0_i32_0 = arith.constant 0 : i32
    %c0_i32_1 = arith.constant 0 : i32
    return %arg0, %arg1, %c0_i32, %c0_i32_0 : i32, i32, i32, i32
  }
  func.func @transform_1(%arg0: i32, %arg1: i32) -> (i32, i32) {
    %c0_i32 = arith.constant 0 : i32
    %c0_i32_0 = arith.constant 0 : i32
    %c0_i32_1 = arith.constant 0 : i32
    return %c0_i32, %c0_i32_0 : i32, i32
  }
  func.func @transform_2(%arg0: i32, %arg1: i32) -> (i32, i32) {
    %c0_i32 = arith.constant 0 : i32
    %c0_i32_0 = arith.constant 0 : i32
    %c0_i32_1 = arith.constant 0 : i32
    return %c0_i32, %c0_i32_0 : i32, i32
  }
  func.func @transform_3(%arg0: i32, %arg1: i32) -> (i32, i32, i32) {
    %c0_i32 = arith.constant 0 : i32
    %c0_i32_0 = arith.constant 0 : i32
    %c0_i32_1 = arith.constant 0 : i32
    return %arg0, %c0_i32, %c0_i32_0 : i32, i32, i32
  }
  func.func @transform_4(%arg0: i32, %arg1: i32) -> (i32, i32, i32) {
    %c0_i32 = arith.constant 0 : i32
    %c0_i32_0 = arith.constant 0 : i32
    %c0_i32_1 = arith.constant 0 : i32
    return %arg0, %c0_i32, %c0_i32_0 : i32, i32, i32
  }
  func.func @transform_5(%arg0: i32, %arg1: i32) -> (i32, i32, i32) {
    %c0_i32 = arith.constant 0 : i32
    %c0_i32_0 = arith.constant 0 : i32
    %c0_i32_1 = arith.constant 0 : i32
    return %arg0, %c0_i32, %c0_i32_0 : i32, i32, i32
  }
  func.func @transform_6(%arg0: i32, %arg1: i32) -> (i32, i32, i32) {
    %c0_i32 = arith.constant 0 : i32
    %c0_i32_0 = arith.constant 0 : i32
    %c0_i32_1 = arith.constant 0 : i32
    return %arg0, %c0_i32, %c0_i32_0 : i32, i32, i32
  }
  func.func @transform_7(%arg0: i32, %arg1: i32) -> (i32, i32, i32, i32) {
    %c0_i32 = arith.constant 0 : i32
    %c0_i32_0 = arith.constant 0 : i32
    %c0_i32_1 = arith.constant 0 : i32
    return %arg0, %arg1, %c0_i32, %c0_i32_0 : i32, i32, i32, i32
  }
}

module attributes {stable_mosaic.version = 11 : i64} {
  func.func @_ln_proj_kernel(%arg0: memref<2x32xf32, #tpu.memory_space<vmem>>, %arg1: memref<1x32xf32, #tpu.memory_space<vmem>>, %arg2: memref<1x32xf32, #tpu.memory_space<vmem>>, %arg3: memref<32x32xbf16, #tpu.memory_space<vmem>>, %arg4: memref<2x32xf32, #tpu.memory_space<vmem>>) attributes {dimension_semantics = [], scalar_prefetch = 0 : i64, scratch_operands = 0 : i64, tpu.core_type = #tpu.core_type<tc>} {
    %c0 = arith.constant 0 : index
    %c0_0 = arith.constant 0 : index
    %0 = vector.load %arg0[%c0, %c0_0] : memref<2x32xf32, #tpu.memory_space<vmem>>, vector<2x32xf32>
    %cst = arith.constant dense<0.000000e+00> : vector<2xf32>
    %1 = vector.multi_reduction <add>, %0, %cst [1] : vector<2x32xf32> to vector<2xf32>
    %2 = vector.shape_cast %1 : vector<2xf32> to vector<2x1xf32>
    %cst_1 = arith.constant 3.200000e+01 : f32
    %3 = vector.broadcast %cst_1 : f32 to vector<2x1xf32>
    %4 = arith.divf %2, %3 : vector<2x1xf32>
    %5 = vector.broadcast %4 : vector<2x1xf32> to vector<2x32xf32>
    %6 = arith.subf %0, %5 : vector<2x32xf32>
    %7 = arith.mulf %6, %6 : vector<2x32xf32>
    %cst_2 = arith.constant dense<0.000000e+00> : vector<2xf32>
    %8 = vector.multi_reduction <add>, %7, %cst_2 [1] : vector<2x32xf32> to vector<2xf32>
    %9 = vector.shape_cast %8 : vector<2xf32> to vector<2x1xf32>
    %cst_3 = arith.constant 3.200000e+01 : f32
    %10 = vector.broadcast %cst_3 : f32 to vector<2x1xf32>
    %11 = arith.divf %9, %10 : vector<2x1xf32>
    %12 = vector.broadcast %4 : vector<2x1xf32> to vector<2x32xf32>
    %13 = arith.subf %0, %12 : vector<2x32xf32>
    %cst_4 = arith.constant 9.99999974E-6 : f32
    %14 = vector.broadcast %cst_4 : f32 to vector<2x1xf32>
    %15 = arith.addf %11, %14 : vector<2x1xf32>
    %16 = math.rsqrt %15 : vector<2x1xf32>
    %17 = vector.broadcast %16 : vector<2x1xf32> to vector<2x32xf32>
    %18 = arith.mulf %13, %17 : vector<2x32xf32>
    %c0_5 = arith.constant 0 : index
    %c0_6 = arith.constant 0 : index
    %19 = vector.load %arg1[%c0_5, %c0_6] : memref<1x32xf32, #tpu.memory_space<vmem>>, vector<1x32xf32>
    %20 = vector.broadcast %19 : vector<1x32xf32> to vector<2x32xf32>
    %21 = arith.mulf %18, %20 : vector<2x32xf32>
    %c0_7 = arith.constant 0 : index
    %c0_8 = arith.constant 0 : index
    %22 = vector.load %arg2[%c0_7, %c0_8] : memref<1x32xf32, #tpu.memory_space<vmem>>, vector<1x32xf32>
    %23 = vector.broadcast %22 : vector<1x32xf32> to vector<2x32xf32>
    %24 = arith.addf %21, %23 : vector<2x32xf32>
    %25 = arith.truncf %24 : vector<2x32xf32> to vector<2x32xbf16>
    %c0_9 = arith.constant 0 : index
    %c0_10 = arith.constant 0 : index
    %26 = vector.load %arg3[%c0_9, %c0_10] : memref<32x32xbf16, #tpu.memory_space<vmem>>, vector<32x32xbf16>
    %cst_11 = arith.constant dense<0.000000e+00> : vector<2x32xf32>
    %27 = tpu.matmul %25, %26, %cst_11 {dimension_numbers = #tpu.dot_dimension_numbers<[1], [0], [0], [1], [0, 0, 1, 1], [], []>} : vector<2x32xbf16>, vector<32x32xbf16>, vector<2x32xf32> -> vector<2x32xf32>
    %c0_12 = arith.constant 0 : index
    %c0_13 = arith.constant 0 : index
    %28 = vector.load %arg4[%c0_12, %c0_13] : memref<2x32xf32, #tpu.memory_space<vmem>>, vector<2x32xf32>
    tpu.vector_store %arg4[%c0_12, %c0_13], %27 {strides = array<i32>} : memref<2x32xf32, #tpu.memory_space<vmem>>, vector<2x32xf32>,
    return
  }
}

module attributes {stable_mosaic.version = 11 : i64} {
  func.func @_clip_logits_kernel(%arg0: memref<6x32xf32, #tpu.memory_space<vmem>>, %arg1: memref<2x32xf32, #tpu.memory_space<vmem>>, %arg2: memref<6x2xf32, #tpu.memory_space<vmem>>) attributes {dimension_semantics = [], scalar_prefetch = 0 : i64, scratch_operands = 0 : i64, tpu.core_type = #tpu.core_type<tc>} {
    %c0 = arith.constant 0 : index
    %c0_0 = arith.constant 0 : index
    %0 = vector.load %arg0[%c0, %c0_0] : memref<6x32xf32, #tpu.memory_space<vmem>>, vector<6x32xf32>
    %c0_1 = arith.constant 0 : index
    %c0_2 = arith.constant 0 : index
    %1 = vector.load %arg1[%c0_1, %c0_2] : memref<2x32xf32, #tpu.memory_space<vmem>>, vector<2x32xf32>
    %2 = arith.mulf %0, %0 : vector<6x32xf32>
    %cst = arith.constant dense<0.000000e+00> : vector<6xf32>
    %3 = vector.multi_reduction <add>, %2, %cst [1] : vector<6x32xf32> to vector<6xf32>
    %4 = vector.shape_cast %3 : vector<6xf32> to vector<6x1xf32>
    %cst_3 = arith.constant 9.99999996E-13 : f32
    %5 = vector.broadcast %cst_3 : f32 to vector<6x1xf32>
    %6 = arith.addf %4, %5 : vector<6x1xf32>
    %7 = math.rsqrt %6 : vector<6x1xf32>
    %8 = vector.broadcast %7 : vector<6x1xf32> to vector<6x32xf32>
    %9 = arith.mulf %0, %8 : vector<6x32xf32>
    %10 = arith.mulf %1, %1 : vector<2x32xf32>
    %cst_4 = arith.constant dense<0.000000e+00> : vector<2xf32>
    %11 = vector.multi_reduction <add>, %10, %cst_4 [1] : vector<2x32xf32> to vector<2xf32>
    %12 = vector.shape_cast %11 : vector<2xf32> to vector<2x1xf32>
    %cst_5 = arith.constant 9.99999996E-13 : f32
    %13 = vector.broadcast %cst_5 : f32 to vector<2x1xf32>
    %14 = arith.addf %12, %13 : vector<2x1xf32>
    %15 = math.rsqrt %14 : vector<2x1xf32>
    %16 = vector.broadcast %15 : vector<2x1xf32> to vector<2x32xf32>
    %17 = arith.mulf %1, %16 : vector<2x32xf32>
    %18 = arith.truncf %9 : vector<6x32xf32> to vector<6x32xbf16>
    %19 = arith.truncf %17 : vector<2x32xf32> to vector<2x32xbf16>
    %cst_6 = arith.constant dense<0.000000e+00> : vector<6x2xf32>
    %20 = tpu.matmul %18, %19, %cst_6 {dimension_numbers = #tpu.dot_dimension_numbers<[1], [1], [0], [0], [0, 0, 1, 0], [], []>} : vector<6x32xbf16>, vector<2x32xbf16>, vector<6x2xf32> -> vector<6x2xf32>
    %cst_7 = arith.constant 14.2857141 : f32
    %21 = vector.broadcast %cst_7 : f32 to vector<6x2xf32>
    %22 = arith.mulf %21, %20 : vector<6x2xf32>
    %c0_8 = arith.constant 0 : index
    %c0_9 = arith.constant 0 : index
    %23 = vector.load %arg2[%c0_8, %c0_9] : memref<6x2xf32, #tpu.memory_space<vmem>>, vector<6x2xf32>
    tpu.vector_store %arg2[%c0_8, %c0_9], %22 {strides = array<i32>} : memref<6x2xf32, #tpu.memory_space<vmem>>, vector<6x2xf32>,
    return
  }
}

</mosaic_0001>

<bundles_post_ra>
// kernel: multi_expert_clip_forward.13
= control target key start
LH: loop header
LB: loop body
LE: loop exit
PB: predicated region body
PF: predicated region fallthrough
CT: control target
= control target key end

     0   :  { %v187_v0 = vmov 0   ;;  %vm112_vm0 = vcmask 523264   ;;  %s250_s1 = inlined_call_operand.vmem [shape: bf16[192,64], index: 1, kind: input, shape index: {}]   ;;  %s251_s0 = inlined_call_operand.vmem [shape: f32[8,192], index: 0, kind: input, shape index: {}]   ;;  %s252_s2 = inlined_call_operand.vmem [shape: f32[8,64], index: 2, kind: output, shape index: {}]  }
   0x1   :  { %116 = vmatprep.subr.bf16.mxu0 %v187_v0  ;;  %v175_v1 = vld [vmem:[%s250_s1] sm:$0xff]   ;;  %v176_v2 = vld [vmem:[%s250_s1 + $0x8] sm:$0xff]   ;;  %v177_v3 = vld [vmem:[%s250_s1 + $0x10] sm:$0xff]  }
   0x2   :  { %117 = vmatpush1.bf16.msra.mxu0 %v175_v1  ;;  %v178_v4 = vld [vmem:[%s250_s1 + $0x18] sm:$0xff]   ;;  %v13_v5 = vld [vmem:[%s251_s0 + $0x8] sm:$0xff]  ;;  %v179_v7 = vld [vmem:[%s250_s1 + $0x20] sm:$0xff]  }
   0x3   :  { %118 = vmatprep.subr.bf16.mxu0 %v187_v0  ;;  %v15_v6 = vpack.c.bf16 %v13_v5, %v13_v5  ;;  %v180_v8 = vld [vmem:[%s250_s1 + $0x28] sm:$0xff]   ;;  %v181_v9 = vld [vmem:[%s250_s1 + $0x30] sm:$0xff]   ;;  %v182_v10 = vld [vmem:[%s250_s1 + $0x38] sm:$0xff]  }
   0x4   :  { %v183_v11 = vld [vmem:[%s250_s1 + $0x40] sm:$0xff]   ;;  %v184_v12 = vld [vmem:[%s250_s1 + $0x48] sm:$0xff]   ;;  %v185_v13 = vld [vmem:[%s250_s1 + $0x50] sm:$0xff]  }
   0x5   :  { %173 = vmatprep.mubr.msk.bf16.mxu0 %vm112_vm0, %v15_v6  ;;  %v186_v14 = vld [vmem:[%s250_s1 + $0x58] sm:$0xff]   ;;  %v12_v15 = vld [vmem:[%s251_s0] sm:$0xff] }
   0x6   :  { %119 = vmatpush1.bf16.msra.mxu0 %v176_v2  ;;  %v14_v16 = vpack.c.bf16 %v12_v15, %v12_v15 }
   0x7   :  { %120 = vmatprep.subr.bf16.mxu0 %v187_v0 }
   0xa   :  { %121 = vmatpush1.bf16.msra.mxu0 %v177_v3 }
   0xb   :  { %122 = vmatprep.subr.bf16.mxu0 %v187_v0 }
   0xe   :  { %123 = vmatpush1.bf16.msra.mxu0 %v178_v4 }
   0xf   :  { %124 = vmatprep.subr.bf16.mxu0 %v187_v0 }
  0x12   :  { %125 = vmatpush1.bf16.msra.mxu0 %v179_v7 }
  0x13   :  { %126 = vmatprep.subr.bf16.mxu0 %v187_v0 }
  0x16   :  { %127 = vmatpush1.bf16.msra.mxu0 %v180_v8 }
  0x17   :  { %128 = vmatprep.subr.bf16.mxu0 %v187_v0 }
  0x1a   :  { %129 = vmatpush1.bf16.msra.mxu0 %v181_v9 }
  0x1b   :  { %130 = vmatprep.subr.bf16.mxu0 %v187_v0 }
  0x1e   :  { %131 = vmatpush1.bf16.msra.mxu0 %v182_v10 }
  0x1f   :  { %132 = vmatprep.subr.bf16.mxu0 %v187_v0 }
  0x22   :  { %133 = vmatpush1.bf16.msra.mxu0 %v183_v11 }
  0x23   :  { %134 = vmatprep.subr.bf16.mxu0 %v187_v0 }
  0x26   :  { %135 = vmatpush1.bf16.msra.mxu0 %v184_v12 }
  0x27   :  { %136 = vmatprep.subr.bf16.mxu0 %v187_v0 }
  0x2a   :  { %137 = vmatpush1.bf16.msra.mxu0 %v185_v13 }
  0x2b   :  { %138 = vmatprep.subr.bf16.mxu0 %v187_v0 }
  0x2e   :  { %139 = vmatpush1.bf16.msra.mxu0 %v186_v14 }
  0x31   :  { %149 = vmatmul.mubr.bf16.vlgmr.msra.gmra.mrb[0].mxu0 %v14_v16 }
 0x104   :  { %v150_v17 = vpop.f32.mrb[0].mxu0 }
 0x105   :  { %156 = vst.msk [vmem:[%s252_s2] sm:$0xff] %vm112_vm0, %v150_v17  ;;  %v152_v18 = vpop.f32.mrb[1].mxu0 }
 0x106   :  { %v153_v19 = vpop.f32.mrb[2].mxu0 }
 0x107   :  { %v154_v20 = vpop.f32.mrb[3].mxu0 }

// kernel: multi_expert_clip_forward.14
= control target key start
LH: loop header
LB: loop body
LE: loop exit
PB: predicated region body
PF: predicated region fallthrough
CT: control target
= control target key end

     0   :  { %vm16_vm0 = vcmask 523264   ;;  %vm20_vm1 = vcmask 517120   ;;  %s119_s0 = inlined_call_operand.vmem [shape: f32[10,64], index: 0, kind: input, shape index: {}]   ;;  %s120_s1 = inlined_call_operand.vmem [shape: f32[1,64], index: 1, kind: input, shape index: {}]   ;;  %s121_s2 = inlined_call_operand.vmem [shape: f32[1,64], index: 2, kind: input, shape index: {}]   ;;  %s122_s3 = inlined_call_operand.vmem [shape: f32[10,64], index: 3, kind: output, shape index: {}]  }
   0x1   :  { %v14_v0 = vld [vmem:[%s119_s0] sm:$0xff]  ;;  %v15_v1 = vld [vmem:[%s119_s0 + $0x8] sm:$0x3] }
   0x2   :  { %v17_v2 = vsel %vm16_vm0, %v14_v0, 0.0  ;;  %v21_v3 = vsel %vm20_vm1, %v15_v1, 0.0  ;;  %v69_v21 = vld [vmem:[%s120_s1] ss:$0 sm:$0xff] }
   0x3   :  { %18 = vadd.xlane.f32.xlu0 %v17_v2  ;;  %v70_v23 = vld [vmem:[%s121_s2] ss:$0 sm:$0xff] }
   0x7   :  { %22 = vadd.xlane.f32.xlu0 %v21_v3 }
  0x90   :  { %v19_v4 = vpop.xlane.xlu0 %18 }
  0x91   :  { %v25_v5 = vmul.f32 0.015625, %v19_v4 }
  0x93   :  { %v27_v6 = vsub.f32 %v14_v0, %v25_v5 }
  0x94   :  { %v23_v7 = vpop.xlane.xlu0 %22 }
  0x95   :  { %v26_v8 = vmul.f32 0.015625, %v23_v7  ;;  %v29_v9 = vmul.f32 %v27_v6, %v27_v6 }
  0x97   :  { %v28_v10 = vsub.f32 %v15_v1, %v26_v8  ;;  %v31_v11 = vsel %vm16_vm0, %v29_v9, 0.0 }
  0x98   :  { %32 = vadd.xlane.f32.xlu1 %v31_v11 }
  0x99   :  { %v30_v12 = vmul.f32 %v28_v10, %v28_v10 }
  0x9b   :  { %v34_v13 = vsel %vm20_vm1, %v30_v12, 0.0 }
  0x9c   :  { %35 = vadd.xlane.f32.xlu1 %v34_v13 }
 0x125   :  { %v33_v14 = vpop.xlane.xlu1 %32 }
 0x126   :  { %v37_v15 = vmul.f32 0.015625, %v33_v14 }
 0x128   :  { %v39_v16 = vadd.f32 1e-05, %v37_v15 }
 0x129   :  { %v36_v17 = vpop.xlane.xlu1 %35 }
 0x12a   :  { %71 = vrsqrt.f32 %v39_v16  ;;  %v38_v18 = vmul.f32 0.015625, %v36_v17 }
 0x12c   :  { %v40_v19 = vadd.f32 1e-05, %v38_v18 }
 0x12e   :  { %73 = vrsqrt.f32 %v40_v19 }
 0x134   :  { %v72_v20 = vpop.eup %71 }
 0x135   :  { %v43_v22 = vmul.f32 %v72_v20, %v27_v6 }
 0x137   :  { %v52_v24 = vmul.f32 %v69_v21, %v43_v22 }
 0x138   :  { %v74_v25 = vpop.eup %73 }
 0x139   :  { %v61_v26 = vadd.f32 %v70_v23, %v52_v24  ;;  %v44_v27 = vmul.f32 %v74_v25, %v28_v10 }
 0x13b   :  { %63 = vst.msk [vmem:[%s122_s3] sm:$0xff] %vm16_vm0, %v61_v26  ;;  %v53_v28 = vmul.f32 %v69_v21, %v44_v27 }
 0x13d   :  { %v62_v29 = vadd.f32 %v70_v23, %v53_v28 }
 0x13f   :  { %64 = vst.msk [vmem:[%s122_s3 + $0x8] sm:$0x3] %vm20_vm1, %v62_v29 }

// kernel: squeeze.1
= control target key start
LH: loop header
LB: loop body
LE: loop exit
PB: predicated region body
PF: predicated region fallthrough
CT: control target
= control target key end

     0   :  { %vm16_vm0 = vcmask 523264   ;;  %s61_s0 = inlined_call_operand.vmem [shape: f32[3,2,64], index: 0, kind: input, shape index: {}]   ;;  %s62_s1 = inlined_call_operand.vmem [shape: f32[6,64], index: 1, kind: output, shape index: {}]  }
   0x1   :  { %v29_v0 = vld [vmem:[%s61_s0 + $0x4] sm:$0x3]  ;;  %v30_v1 = vld [vmem:[%s61_s0 + $0x2] sm:$0x3]  ;;  %v13_v2 = vld [vmem:[%s61_s0] sm:$0x3] }
   0x2   :  { %8 = vst [vmem:[#allocation0 + $0x10] sm:$0x3] %v29_v0  ;;  %12 = vst [vmem:[#allocation0 + $0x8] sm:$0x3] %v30_v1 }
   0x3   :  { %14 = vst [vmem:[#allocation0] sm:$0x3] %v13_v2 }
   0x9   :  { %v19_v4 = vld [vmem:[#allocation0 + $0x8] sm:$0x3]   ;;  %v24_v5 = vld [vmem:[#allocation0 + $0x10] sm:$0x3]  }
   0xa   :  { %v15_v3 = vld [vmem:[#allocation0] sm:$0x3]   ;;  %31 = vst.msk [vmem:[%s62_s1 + $0x2] sm:$0x3] %vm16_vm0, %v19_v4   ;;  %32 = vst.msk [vmem:[%s62_s1 + $0x4] sm:$0x3] %vm16_vm0, %v24_v5  }
   0xb   :  { %17 = vst.msk [vmem:[%s62_s1] sm:$0x3] %vm16_vm0, %v15_v3  }

// kernel: multi_expert_clip_forward.16
= control target key start
LH: loop header
LB: loop body
LE: loop exit
PB: predicated region body
PF: predicated region fallthrough
CT: control target
= control target key end

     0   :  { %vm31_vm0 = vcmask 523264   ;;  %vm41_vm1 = vcmask 521216   ;;  %v627_v36 = vmov 0   ;;  %s827_s0 = inlined_call_operand.vmem [shape: f32[30,64], index: 0, kind: input, shape index: {}]   ;;  %s828_s3 = inlined_call_operand.vmem [shape: bf16[64,256], index: 3, kind: input, shape index: {}]   ;;  %s829_s1 = inlined_call_operand.vmem [shape: f32[1,64], index: 1, kind: input, shape index: {}]   ;;  %s830_s2 = inlined_call_operand.vmem [shape: f32[1,64], index: 2, kind: input, shape index: {}]   ;;  %s831_s5 = inlined_call_operand.vmem [shape: bf16[256,64], index: 5, kind: input, shape index: {}]   ;;  %s832_s4 = inlined_call_operand.vmem [shape: f32[1,256], index: 4, kind: input, shape index: {}]   ;;  %s833_s6 = inlined_call_operand.vmem [shape: f32[1,64], index: 6, kind: input, shape index: {}]   ;;  %s834_s7 = inlined_call_operand.vmem [shape: f32[30,64], index: 7, kind: output, shape index: {}]  }
   0x1   :  { %v671_v0 = vld [vmem:[%s827_s0] sm:$0xff]  ;;  %v676_v1 = vld [vmem:[%s827_s0 + $0x10] sm:$0xff]  ;;  %v681_v2 = vld [vmem:[%s827_s0 + $0x8] sm:$0xff]  ;;  %208 = vmatprep.mubr.bf16.mxu0 %v627_v36 }
   0x2   :  { %v32_v3 = vsel %vm31_vm0, %v671_v0, 0.0  ;;  %v38_v4 = vsel %vm31_vm0, %v676_v1, 0.0  ;;  %v690_v5 = vld [vmem:[%s827_s0 + $0x18] sm:$0x3f]  ;;  %v35_v6 = vsel %vm31_vm0, %v681_v2, 0.0 }
   0x3   :  { %33 = vadd.xlane.f32.xlu0 %v32_v3  ;;  %39 = vadd.xlane.f32.xlu1 %v38_v4  ;;  %v42_v7 = vsel %vm41_vm1, %v690_v5, 0.0  ;;  %v559_v28 = vld [vmem:[%s828_s3 + $0x4] ss:$8 sps:$4 sm:$0xff]   ;;  %v561_v29 = vld [vmem:[%s828_s3] ss:$8 sps:$4 sm:$0xff]  }
   0x4   :  { %176 = vmatprep.subr.bf16.mxu0 %v559_v28  ;;  %v562_v30 = vld [vmem:[%s828_s3 + $0x14] ss:$8 sps:$4 sm:$0xff]   ;;  %v564_v31 = vld [vmem:[%s828_s3 + $0x10] ss:$8 sps:$4 sm:$0xff]   ;;  %v565_v32 = vld [vmem:[%s828_s3 + $0x24] ss:$8 sps:$4 sm:$0xff]  }
   0x5   :  { %177 = vmatpush1.bf16.msra.mxu0 %v561_v29  ;;  %v567_v33 = vld [vmem:[%s828_s3 + $0x20] ss:$8 sps:$4 sm:$0xff]   ;;  %v568_v34 = vld [vmem:[%s828_s3 + $0x34] ss:$8 sps:$4 sm:$0xff]   ;;  %v570_v35 = vld [vmem:[%s828_s3 + $0x30] ss:$8 sps:$4 sm:$0xff]  }
   0x6   :  { %178 = vmatprep.subr.bf16.mxu0 %v562_v30  ;;  %v493_v51 = vld [vmem:[%s829_s1] ss:$0 sm:$0xff] }
   0x7   :  { %36 = vadd.xlane.f32.xlu0 %v35_v6  ;;  %43 = vadd.xlane.f32.xlu1 %v42_v7  ;;  %v494_v56 = vld [vmem:[%s830_s2] ss:$0 sm:$0xff] }
   0x8   :  { %v118_v28 = vld [vmem:[%s832_s4] sm:$0x3] }
   0x9   :  { %179 = vmatpush1.bf16.msra.mxu0 %v564_v31 }
   0xa   :  { %180 = vmatprep.subr.bf16.mxu0 %v565_v32 }
   0xd   :  { %181 = vmatpush1.bf16.msra.mxu0 %v567_v33 }
   0xe   :  { %182 = vmatprep.subr.bf16.mxu0 %v568_v34 }
  0x11   :  { %183 = vmatpush1.bf16.msra.mxu0 %v570_v35 }
  0x90   :  { %v34_v8 = vpop.xlane.xlu0 %33  ;;  %v40_v9 = vpop.xlane.xlu1 %39 }
  0x91   :  { %v46_v10 = vmul.f32 0.015625, %v34_v8  ;;  %v48_v11 = vmul.f32 0.015625, %v40_v9  ;;  %v571_v9 = vld [vmem:[%s831_s5 + $0x40] sm:$0xff]  }
  0x92   :  { %530 = vmatprep.subr.bf16.mxu1 %v571_v9 }
  0x93   :  { %v50_v12 = vsub.f32 %v671_v0, %v46_v10  ;;  %v698_v13 = vsub.f32 %v676_v1, %v48_v11  ;;  %v572_v10 = vld [vmem:[%s831_s5] sm:$0xff]   ;;  %v573_v11 = vld [vmem:[%s831_s5 + $0x48] sm:$0xff]  }
  0x94   :  { %v37_v14 = vpop.xlane.xlu0 %36  ;;  %v44_v15 = vpop.xlane.xlu1 %43  ;;  %531 = vmatpush3.bf16.msra.mxu1 %v572_v10 }
  0x95   :  { %v47_v16 = vmul.f32 0.015625, %v37_v14  ;;  %v49_v17 = vmul.f32 0.015625, %v44_v15  ;;  %v54_v18 = vmul.f32 %v50_v12, %v50_v12  ;;  %v56_v19 = vmul.f32 %v698_v13, %v698_v13  ;;  %532 = vmatprep.subr.bf16.mxu1 %v573_v11  ;;  %v576_v14 = vld [vmem:[%s831_s5 + $0x10] sm:$0xff]   ;;  %v577_v15 = vld [vmem:[%s831_s5 + $0x58] sm:$0xff]  }
  0x97   :  { %v51_v20 = vsub.f32 %v681_v2, %v47_v16  ;;  %v53_v21 = vsub.f32 %v690_v5, %v49_v17  ;;  %v58_v22 = vsel %vm31_vm0, %v54_v18, 0.0  ;;  %v64_v23 = vsel %vm31_vm0, %v56_v19, 0.0  ;;  %v578_v16 = vld [vmem:[%s831_s5 + $0x18] sm:$0xff]   ;;  %v579_v17 = vld [vmem:[%s831_s5 + $0x60] sm:$0xff]   ;;  %v581_v19 = vld [vmem:[%s831_s5 + $0x68] sm:$0xff]  }
  0x98   :  { %59 = vadd.xlane.f32.xlu0 %v58_v22  ;;  %v580_v18 = vld [vmem:[%s831_s5 + $0x20] sm:$0xff]   ;;  %v584_v22 = vld [vmem:[%s831_s5 + $0x30] sm:$0xff]  }
  0x99   :  { %v55_v24 = vmul.f32 %v51_v20, %v51_v20  ;;  %v57_v25 = vmul.f32 %v53_v21, %v53_v21 }
  0x9b   :  { %v61_v26 = vsel %vm31_vm0, %v55_v24, 0.0  ;;  %v67_v27 = vsel %vm41_vm1, %v57_v25, 0.0  ;;  %v586_v24 = vld [vmem:[%s831_s5 + $0x38] sm:$0xff]   ;;  %v120_v25 = vlaneseq }
  0x9c   :  { %65 = vadd.xlane.f32.xlu0 %v64_v23  ;;  %62 = vadd.xlane.f32.xlu1 %v61_v26  ;;  %v585_v23 = vld [vmem:[%s831_s5 + $0x78] sm:$0xff]  }
  0x9d   :  { %v121_v26 = vshrl.u32 %v120_v25, 7 }
  0x9f   :  { %v126_v29 = vsub.s32 1, %v121_v26 }
  0xa0   :  { %68 = vadd.xlane.f32.xlu1 %v67_v27  ;;  %v122_v27 = vsub.s32 0, %v121_v26 }
  0xa1   :  { %v127_v31 = vrot.slane %v118_v28, %v126_v29 }
  0xa2   :  { %v123_v30 = vrot.slane %v118_v28, %v122_v27 }
 0x125   :  { %v60_v37 = vpop.xlane.xlu0 %59 }
 0x126   :  { %v70_v38 = vmul.f32 0.015625, %v60_v37 }
 0x128   :  { %v74_v39 = vadd.f32 1e-05, %v70_v38 }
 0x129   :  { %v63_v40 = vpop.xlane.xlu1 %62  ;;  %v66_v41 = vpop.xlane.xlu0 %65 }
 0x12a   :  { %587 = vrsqrt.f32 %v74_v39  ;;  %v71_v42 = vmul.f32 0.015625, %v63_v40  ;;  %v72_v43 = vmul.f32 0.015625, %v66_v41 }
 0x12c   :  { %v75_v44 = vadd.f32 1e-05, %v71_v42  ;;  %v76_v45 = vadd.f32 1e-05, %v72_v43 }
 0x12d   :  { %v69_v46 = vpop.xlane.xlu1 %68 }
 0x12e   :  { %589 = vrsqrt.f32 %v75_v44  ;;  %v73_v47 = vmul.f32 0.015625, %v69_v46 }
 0x12f   :  { %591 = vrsqrt.f32 %v76_v45 }
 0x130   :  { %v77_v48 = vadd.f32 1e-05, %v73_v47 }
 0x132   :  { %593 = vrsqrt.f32 %v77_v48 }
 0x134   :  { %v588_v49 = vpop.eup %587 }
 0x135   :  { %v82_v50 = vmul.f32 %v588_v49, %v50_v12  ;;  %v574_v12 = vld [vmem:[%s831_s5 + $0x8] sm:$0xff]  }
 0x136   :  { %533 = vmatpush3.bf16.msra.mxu1 %v574_v12 }
 0x137   :  { %v93_v54 = vmul.f32 %v493_v51, %v82_v50 }
 0x138   :  { %v590_v52 = vpop.eup %589 }
 0x139   :  { %v83_v53 = vmul.f32 %v590_v52, %v51_v20  ;;  %v592_v55 = vpop.eup %591  ;;  %v104_v61 = vadd.f32 %v494_v56, %v93_v54  ;;  %v582_v20 = vld [vmem:[%s831_s5 + $0x28] sm:$0xff]  }
 0x13a   :  { %v84_v59 = vmul.f32 %v592_v55, %v698_v13  ;;  %v575_v13 = vld [vmem:[%s831_s5 + $0x50] sm:$0xff]  }
 0x13b   :  { %v94_v57 = vmul.f32 %v493_v51, %v83_v53  ;;  %534 = vmatprep.subr.bf16.mxu1 %v575_v13 }
 0x13c   :  { %v594_v58 = vpop.eup %593  ;;  %v95_v4 = vmul.f32 %v493_v51, %v84_v59  ;;  %535 = vmatpush3.bf16.msra.mxu1 %v576_v14 }
 0x13d   :  { %v85_v60 = vmul.f32 %v594_v58, %v53_v21  ;;  %v105_v62 = vadd.f32 %v494_v56, %v94_v57  ;;  %536 = vmatprep.subr.bf16.mxu1 %v577_v15  ;;  %v583_v21 = vld [vmem:[%s831_s5 + $0x70] sm:$0xff]  }
 0x13e   :  { %v106_v7 = vadd.f32 %v494_v56, %v95_v4 }
 0x13f   :  { %v108_v63 = vpack.c.bf16 %v105_v62, %v104_v61  ;;  %v96_v3 = vmul.f32 %v493_v51, %v85_v60 }
 0x140   :  { %537 = vmatpush3.bf16.msra.mxu1 %v578_v16 }
 0x141   :  { %503 = vmatmul.mubr.msk.bf16.vlgmr.msra.gmra.mrb[0].mxu0 %vm31_vm0, %v108_v63  ;;  %v107_v6 = vadd.f32 %v494_v56, %v96_v3  ;;  %538 = vmatprep.subr.bf16.mxu1 %v579_v17 }
 0x142   :  { %218 = vmatprep.mubr.bf16.mxu0 %v627_v36 }
 0x143   :  { %v109_v8 = vpack.c.bf16 %v107_v6, %v106_v7 }
 0x144   :  { %539 = vmatpush3.bf16.msra.mxu1 %v580_v18 }
 0x145   :  { %540 = vmatprep.subr.bf16.mxu1 %v581_v19 }
 0x148   :  { %541 = vmatpush3.bf16.msra.mxu1 %v582_v20 }
 0x149   :  { %504 = vmatmul.mubr.msk.bf16.gmra.mrb[4].mxu0 %vm31_vm0, %v109_v8  ;;  %542 = vmatprep.subr.bf16.mxu1 %v583_v21 }
 0x14c   :  { %543 = vmatpush3.bf16.msra.mxu1 %v584_v22 }
 0x14d   :  { %544 = vmatprep.subr.bf16.mxu1 %v585_v23 }
 0x150   :  { %545 = vmatpush3.bf16.msra.mxu1 %v586_v24 }
 0x214   :  { %v210_v32 = vpop.f32.mrb[0].mxu0 }
 0x215   :  { %v792_v33 = vadd.f32 %v210_v32, %v123_v30  ;;  %v212_v34 = vpop.f32.mrb[1].mxu0 }
 0x216   :  { %v794_v35 = vadd.f32 %v212_v34, %v127_v31  ;;  %v214_v36 = vpop.f32.mrb[2].mxu0 }
 0x217   :  { %v505_v37 = vmul.f32 -1.702, %v792_v33  ;;  %v797_v38 = vadd.f32 %v214_v36, %v123_v30  ;;  %v216_v39 = vpop.f32.mrb[3].mxu0 }
 0x218   :  { %v506_v40 = vmul.f32 -1.702, %v794_v35  ;;  %v217_v41 = vadd.f32 %v216_v39, %v127_v31 }
 0x219   :  { %v245_v42 = vmul.f32 1.442695, %v505_v37  ;;  %v507_v43 = vmul.f32 -1.702, %v797_v38 }
 0x21a   :  { %v247_v44 = vmul.f32 1.442695, %v506_v40  ;;  %v508_v45 = vmul.f32 -1.702, %v217_v41 }
 0x21b   :  { %595 = vpow2.f32 %v245_v42  ;;  %v249_v46 = vmul.f32 1.442695, %v507_v43 }
 0x21c   :  { %597 = vpow2.f32 %v247_v44  ;;  %v251_v47 = vmul.f32 1.442695, %v508_v45  ;;  %v220_v48 = vpop.f32.mrb[4].mxu0 }
 0x21d   :  { %599 = vpow2.f32 %v249_v46  ;;  %v221_v49 = vadd.f32 %v220_v48, %v123_v30  ;;  %v222_v50 = vpop.f32.mrb[5].mxu0 }
 0x21e   :  { %601 = vpow2.f32 %v251_v47  ;;  %v223_v51 = vadd.f32 %v222_v50, %v127_v31  ;;  %v224_v52 = vpop.f32.mrb[6].mxu0 }
 0x21f   :  { %v509_v53 = vmul.f32 -1.702, %v221_v49  ;;  %v225_v54 = vadd.f32 %v224_v52, %v123_v30  ;;  %v226_v55 = vpop.f32.mrb[7].mxu0 }
 0x220   :  { %v510_v56 = vmul.f32 -1.702, %v223_v51  ;;  %v227_v57 = vadd.f32 %v226_v55, %v127_v31 }
 0x221   :  { %v253_v58 = vmul.f32 1.442695, %v509_v53  ;;  %v511_v59 = vmul.f32 -1.702, %v225_v54 }
 0x222   :  { %v255_v60 = vmul.f32 1.442695, %v510_v56  ;;  %v512_v61 = vmul.f32 -1.702, %v227_v57 }
 0x223   :  { %603 = vpow2.f32 %v253_v58  ;;  %v257_v62 = vmul.f32 1.442695, %v511_v59 }
 0x224   :  { %605 = vpow2.f32 %v255_v60  ;;  %v259_v63 = vmul.f32 1.442695, %v512_v61 }
 0x225   :  { %v596_v3 = vpop.eup %595  ;;  %607 = vpow2.f32 %v257_v62 }
 0x226   :  { %v598_v4 = vpop.eup %597  ;;  %v261_v6 = vadd.f32 1.0, %v596_v3  ;;  %609 = vpow2.f32 %v259_v63 }
 0x227   :  { %v600_v7 = vpop.eup %599  ;;  %v262_v8 = vadd.f32 1.0, %v598_v4 }
 0x228   :  { %v602_v9 = vpop.eup %601  ;;  %611 = vrcp.f32 %v261_v6  ;;  %v263_v10 = vadd.f32 1.0, %v600_v7 }
 0x229   :  { %613 = vrcp.f32 %v262_v8  ;;  %v264_v11 = vadd.f32 1.0, %v602_v9 }
 0x22a   :  { %615 = vrcp.f32 %v263_v10 }
 0x22b   :  { %617 = vrcp.f32 %v264_v11 }
 0x22d   :  { %v604_v12 = vpop.eup %603 }
 0x22e   :  { %v606_v13 = vpop.eup %605  ;;  %v265_v14 = vadd.f32 1.0, %v604_v12 }
 0x22f   :  { %v608_v15 = vpop.eup %607  ;;  %v266_v16 = vadd.f32 1.0, %v606_v13 }
 0x230   :  { %v610_v17 = vpop.eup %609  ;;  %619 = vrcp.f32 %v265_v14  ;;  %v267_v18 = vadd.f32 1.0, %v608_v15 }
 0x231   :  { %621 = vrcp.f32 %v266_v16  ;;  %v268_v19 = vadd.f32 1.0, %v610_v17 }
 0x232   :  { %v612_v20 = vpop.eup %611  ;;  %623 = vrcp.f32 %v267_v18 }
 0x233   :  { %v614_v21 = vpop.eup %613  ;;  %625 = vrcp.f32 %v268_v19  ;;  %v285_v24 = vmul.f32 %v612_v20, %v792_v33 }
 0x234   :  { %v616_v22 = vpop.eup %615  ;;  %v286_v26 = vmul.f32 %v614_v21, %v794_v35  ;;  %v513_v35 = vld [vmem:[%s833_s6] ss:$0 sm:$0xff] }
 0x235   :  { %v618_v23 = vpop.eup %617  ;;  %v287_v25 = vmul.f32 %v616_v22, %v797_v38 }
 0x236   :  { %v288_v27 = vmul.f32 %v618_v23, %v217_v41 }
 0x237   :  { %v293_v28 = vpack.c.bf16 %v287_v25, %v285_v24 }
 0x238   :  { %v294_v29 = vpack.c.bf16 %v288_v27, %v286_v26 }
 0x23a   :  { %v620_v30 = vpop.eup %619  ;;  %464 = vmatprep.mubr.bf16.mxu1 %v294_v29 }
 0x23b   :  { %v622_v31 = vpop.eup %621  ;;  %465 = vmatmul.mubr.bf16.vlgmr.msra.gmra.mrb[0].mxu1 %v293_v28  ;;  %v289_v36 = vmul.f32 %v620_v30, %v221_v49 }
 0x23c   :  { %v624_v32 = vpop.eup %623  ;;  %v290_v39 = vmul.f32 %v622_v31, %v223_v51 }
 0x23d   :  { %v626_v34 = vpop.eup %625  ;;  %v291_v37 = vmul.f32 %v624_v32, %v225_v54 }
 0x23e   :  { %v292_v40 = vmul.f32 %v626_v34, %v227_v57 }
 0x23f   :  { %v295_v42 = vpack.c.bf16 %v291_v37, %v289_v36 }
 0x240   :  { %v296_v43 = vpack.c.bf16 %v292_v40, %v290_v39 }
 0x242   :  { %472 = vmatprep.mubr.bf16.mxu1 %v296_v43 }
 0x243   :  { %473 = vmatmul.mubr.bf16.gmra.mrb[4].mxu1 %v295_v42 }
 0x30e   :  { %v546_v33 = vpop.f32.mrb[0].mxu1 }
 0x30f   :  { %v547_v38 = vpop.f32.mrb[1].mxu1 }
 0x310   :  { %v548_v41 = vadd.f32 %v547_v38, %v546_v33  ;;  %v549_v44 = vpop.f32.mrb[2].mxu1 }
 0x311   :  { %v550_v45 = vpop.f32.mrb[3].mxu1 }
 0x312   :  { %v467_v46 = vadd.f32 %v548_v41, %v513_v35  ;;  %v551_v47 = vadd.f32 %v550_v45, %v549_v44 }
 0x314   :  { %v481_v48 = vadd.f32 %v467_v46, %v671_v0  ;;  %v470_v49 = vadd.f32 %v551_v47, %v513_v35 }
 0x316   :  { %485 = vst.msk [vmem:[%s834_s7] sm:$0xff] %vm31_vm0, %v481_v48  ;;  %v482_v50 = vadd.f32 %v470_v49, %v681_v2  ;;  %v552_v51 = vpop.f32.mrb[4].mxu1 }
 0x317   :  { %v553_v52 = vpop.f32.mrb[5].mxu1 }
 0x318   :  { %486 = vst.msk [vmem:[%s834_s7 + $0x8] sm:$0xff] %vm31_vm0, %v482_v50  ;;  %v554_v53 = vadd.f32 %v553_v52, %v552_v51  ;;  %v555_v54 = vpop.f32.mrb[6].mxu1 }
 0x319   :  { %v556_v55 = vpop.f32.mrb[7].mxu1 }
 0x31a   :  { %v475_v56 = vadd.f32 %v554_v53, %v513_v35  ;;  %v557_v0 = vadd.f32 %v556_v55, %v555_v54 }
 0x31c   :  { %v483_v57 = vadd.f32 %v475_v56, %v676_v1  ;;  %v478_v58 = vadd.f32 %v557_v0, %v513_v35 }
 0x31e   :  { %487 = vst.msk [vmem:[%s834_s7 + $0x10] sm:$0xff] %vm31_vm0, %v483_v57  ;;  %v484_v2 = vadd.f32 %v478_v58, %v690_v5 }
 0x320   :  { %488 = vst.msk [vmem:[%s834_s7 + $0x18] sm:$0x3f] %vm41_vm1, %v484_v2 }

// kernel: multi_expert_clip_forward.19
= control target key start
LH: loop header
LB: loop body
LE: loop exit
PB: predicated region body
PF: predicated region fallthrough
CT: control target
= control target key end

     0   :  { %vm19_vm0 = vcmask 521216   ;;  %v165_v8 = vmov 0.0   ;;  %vm166_vm1 = vmmov 0   ;;  %vm83_vm2 = vcmask 523264   ;;  %s216_s0 = inlined_call_operand.vmem [shape: f32[6,64], index: 0, kind: input, shape index: {}]   ;;  %s217_s3 = inlined_call_operand.vmem [shape: bf16[64,32], index: 3, kind: input, shape index: {}]   ;;  %s218_s1 = inlined_call_operand.vmem [shape: f32[1,64], index: 1, kind: input, shape index: {}]   ;;  %s219_s2 = inlined_call_operand.vmem [shape: f32[1,64], index: 2, kind: input, shape index: {}]   ;;  %s220_s4 = inlined_call_operand.vmem [shape: f32[6,32], index: 4, kind: output, shape index: {}]  }
   0x1   :  { %v18_v0 = vld [vmem:[%s216_s0] sm:$0x3f]  ;;  %145 = vmatprep.subr.bf16.mxu0 %v165_v8  ;;  %v160_v9 = vld [vmem:[%s217_s3 + $0x8] sm:$0xff]   ;;  %v161_v10 = vld [vmem:[%s217_s3 + $0x10] sm:$0xff]   ;;  %153 = vmatprep.mubr.msk.bf16.mxu0 %vm166_vm1, %v165_v8  ;;  %vm127_vm3 = vcmask 259072  }
   0x2   :  { %v20_v1 = vsel %vm19_vm0, %v18_v0, 0.0  ;;  %v159_v7 = vld [vmem:[%s217_s3] sm:$0xff]   ;;  %v162_v11 = vld [vmem:[%s217_s3 + $0x18] sm:$0xff]  }
   0x3   :  { %21 = vadd.xlane.f32.xlu0 %v20_v1  ;;  %146 = vmatpush3.bf16.msra.mxu0 %v159_v7  ;;  %v133_v16 = vld [vmem:[%s218_s1] ss:$0 sm:$0xff] }
   0x4   :  { %147 = vmatprep.subr.bf16.mxu0 %v165_v8  ;;  %v134_v18 = vld [vmem:[%s219_s2] ss:$0 sm:$0xff] }
   0x7   :  { %148 = vmatpush3.bf16.msra.mxu0 %v160_v9 }
   0x8   :  { %149 = vmatprep.subr.bf16.mxu0 %v165_v8 }
   0xb   :  { %150 = vmatpush3.bf16.msra.mxu0 %v161_v10 }
   0xc   :  { %151 = vmatprep.subr.bf16.mxu0 %v165_v8 }
   0xf   :  { %152 = vmatpush3.bf16.msra.mxu0 %v162_v11 }
  0x90   :  { %v22_v2 = vpop.xlane.xlu0 %21 }
  0x91   :  { %v24_v3 = vmul.f32 0.015625, %v22_v2 }
  0x93   :  { %v25_v4 = vsub.f32 %v18_v0, %v24_v3 }
  0x95   :  { %v26_v5 = vmul.f32 %v25_v4, %v25_v4 }
  0x97   :  { %v27_v6 = vsel %vm19_vm0, %v26_v5, 0.0 }
  0x98   :  { %28 = vadd.xlane.f32.xlu0 %v27_v6 }
 0x125   :  { %v29_v12 = vpop.xlane.xlu0 %28 }
 0x126   :  { %v30_v13 = vmul.f32 0.015625, %v29_v12 }
 0x128   :  { %v31_v14 = vadd.f32 1e-05, %v30_v13 }
 0x12a   :  { %163 = vrsqrt.f32 %v31_v14 }
 0x134   :  { %v164_v15 = vpop.eup %163 }
 0x135   :  { %v33_v17 = vmul.f32 %v164_v15, %v25_v4 }
 0x137   :  { %v41_v19 = vmul.f32 %v133_v16, %v33_v17 }
 0x139   :  { %v49_v20 = vadd.f32 %v134_v18, %v41_v19 }
 0x13b   :  { %v50_v21 = vpack.c.bf16 %v49_v20, %v49_v20 }
 0x13d   :  { %154 = vmatmul.mubr.msk.bf16.vlgmr.msra.gmra.mrb[0].mxu0 %vm83_vm2, %v50_v21 }
 0x210   :  { %v121_v22 = vpop.f32.mrb[0].mxu0 }
 0x211   :  { %128 = vst.msk [vmem:[%s220_s4] sm:$0x3f] %vm127_vm3, %v121_v22  ;;  %v155_v23 = vpop.f32.mrb[1].mxu0 }
 0x212   :  { %v124_v24 = vpop.f32.mrb[2].mxu0 }
 0x213   :  { %v156_v25 = vpop.f32.mrb[3].mxu0 }

// kernel: multi_expert_clip_forward.15
= control target key start
LH: loop header
LB: loop body
LE: loop exit
PB: predicated region body
PF: predicated region fallthrough
CT: control target
= control target key end

     0   :  { %s1893_s30 = smov 0   ;;  %s1895_s10 = smov 0   ;;  %s2096_s0 = inlined_call_operand.vmem [shape: f32[1,2,5,64], index: 0, kind: input, shape index: {}]   ;;  %s2097_s1 = inlined_call_operand.vmem [shape: f32[1,64], index: 1, kind: input, shape index: {}]   ;;  %s2098_s2 = inlined_call_operand.vmem [shape: f32[1,64], index: 2, kind: input, shape index: {}]   ;;  %s2099_s3 = inlined_call_operand.vmem [shape: bf16[3,64,192], index: 3, kind: input, shape index: {}]   ;;  %s2100_s4 = inlined_call_operand.vmem [shape: f32[3,1,192], index: 4, kind: input, shape index: {}]   ;;  %s2101_s5 = inlined_call_operand.vmem [shape: bf16[3,64,64], index: 5, kind: input, shape index: {}]   ;;  %s2102_s6 = inlined_call_operand.vmem [shape: f32[3,1,64], index: 6, kind: input, shape index: {}]   ;;  %s2103_s7 = inlined_call_operand.vmem [shape: bf16[3,64,12], index: 7, kind: input, shape index: {}]   ;;  %s2104_s8 = inlined_call_operand.vmem [shape: bf16[3,12,64], index: 8, kind: input, shape index: {}]   ;;  %s2105_s9 = inlined_call_operand.vmem [shape: f32[3,2,5,64], index: 9, kind: output, shape index: {}]  }
   0x1   :  { %s1897_s11 = smov 0   ;;  %s1899_s12 = smov 0  }
   0x2   :  { %s1901_s13 = smov 0  }
   0x3 LB: > { %s28_s14 = sadd.s32 1, %s1822_s11  ;;  %s31_s15 = sadd.s32 1, %s1826_s12  ;;  %s1830_s13 = sphi %s1901_s13, %s19_s13   ;;  %s1826_s12 = sphi %s1899_s12, %s2109_s12   ;;  %s1822_s11 = sphi %s1897_s11, %s2108_s11   ;;  %s1818_s10 = sphi %s1895_s10, %s2107_s10   ;;  %s1814_s30 = sphi %s1893_s30, %s2106_s30  }
   0x4   : > { %p29_p0 = scmp.ge.s32.totalorder %s28_s14, 2  ;;  %p1545_p1 = scmp.ge.s32.totalorder %s1830_s13, 1 }
   0x5   : > { %p357_p2 = scmp.lt.s32.totalorder %s1830_s13, 7 }
   0x6   : > { %s2111_s14 = smov (%p29_p0, %s28_s14), 0  ;;  %s2113_s15 = smov (!%p29_p0, %s31_s15), %s1826_s12 }
   0x7   : > { %p358_p3 = pnand %p1545_p1, %p357_p2  ;;  %p33_p4 = scmp.ge.s32.totalorder %s2113_s15, 3 }
   0x8   : > { %p422_p5 = scmp.lt.s32.totalorder (!%p358_p3), %s1814_s30, 1  ;;  %vm463_vm0 = vcmask (!%p358_p3), 520192   ;;  %p426_p6 = scmp.lt.s32.totalorder (!%p358_p3), %s1818_s10, 2  ;;  %v1832_v8 = vmov (!%p358_p3), 0   ;;  %v1558_v20 = vld [vmem:[%s2097_s1] ss:$0 sm:$0xff] (!%p358_p3)  ;;  %v505_v27 = vlaneseq (!%p358_p3) }
   0x9   : > { %s2115_s15 = smov (%p33_p4, %s2113_s15), 0  ;;  %361 = sbr.rel (%p358_p3) target bundleno = 3030 (0xbd6), region = 56 }
   0xa   : > { %591 = vmatprep.mubr.bf16.mxu0 (!%p358_p3), %v1832_v8  ;;  %v1559_v22 = vld [vmem:[%s2098_s2] ss:$0 sm:$0xff] (!%p358_p3)  ;;  %vm555_vm1 = vcmask (!%p358_p3), 523264   ;;  %v1833_v26 = vmov (!%p358_p3), 0.0   ;;  %v506_v28 = vshrl.u32 (!%p358_p3), %v505_v27, 7  ;;  %vm1834_vm2 = vmmov (!%p358_p3), 0  }
   0xb   : > { %1628 = vmatprep.subr.mxu1 (!%p358_p3), %v1833_v26  ;;  %1630 = vmatprep.mubr.msk.f32.mxu1 (!%p358_p3), %vm1834_vm2, %v1833_v26  ;;  %s1835_s18 = smov (!%p358_p3), 64   ;;  %vm698_vm3 = vcmask (!%p358_p3), 1041408   ;;  %vm699_vm4 = vcmask (!%p358_p3), 1042432   ;;  %v1836_v40 = vmov (!%p358_p3), 65535   ;;  %vm604_vm5 = vcmask (!%p358_p3), 130048   ;;  %s1839_s21 = smov (!%p358_p3), 48  }
   0xc   : > { %v507_v29 = vsub.s32 (!%p358_p3), 0, %v506_v28  ;;  %v511_v37 = vsub.s32 (!%p358_p3), 1, %v506_v28  ;;  %v700_v41 = vsel (!%p358_p3), %vm698_vm3, 4294967295, %v1836_v40  ;;  %vm680_vm6 = vcmask (!%p358_p3), 36864   ;;  %s1840_s22 = smov (!%p358_p3), 96   ;;  %s1842_s24 = smov (!%p358_p3), 80  }
   0xd   : > { %v1969_v44 = vsel (!%p358_p3), %vm699_vm4, %v700_v41, 0  ;;  %vm694_vm7 = vcmask (!%p358_p3), 39936   ;;  %vm1173_vm8 = vcmask (!%p358_p3), 261120   ;;  %vm1175_vm9 = vcmask (!%p358_p3), 392192  }
   0xe   : > { %vm1344_vm10 = vcmask (!%p358_p3), 1045504   ;;  %vm1340_vm11 = vcmask (!%p358_p3), 97280  }
  0x10   : > { %s2117_s30 = smov (!%p422_p5, %s1814_s30), 1  ;;  %s2119_s10 = smov (!%p426_p6, %s1818_s10), 2 }
  0x11   : > { %s1546_s16 = sshll.u32 %s2117_s30, 3  ;;  %s1596_s20 = sshll.u32 %s2119_s10, 6 }
  0x12   : > { %s425_s19 = scalar_lea.vmem %s2096_s0, %s1546_s16  ;;  %s430_s23 = scalar_lea.vmem %s2099_s3, %s1596_s20 }
  0x13   : > { %v1931_v0 = vld [vmem:[%s425_s19] sm:$0x1f]  ;;  %v1756_v10 = vld [vmem:[%s430_s23 + $0x14] ss:$8 sps:$4 sm:$0xff]   ;;  %v1758_v11 = vld [vmem:[%s430_s23 + $0x10] ss:$8 sps:$4 sm:$0xff]  }
  0x14   : > { %v464_v1 = vsel %vm463_vm0, %v1931_v0, 0.0  ;;  %v1753_v7 = vld [vmem:[%s430_s23 + $0x4] ss:$8 sps:$4 sm:$0xff]   ;;  %v1755_v9 = vld [vmem:[%s430_s23] ss:$8 sps:$4 sm:$0xff]   ;;  %s1549_s28 = sshll.u32 %s2119_s10, 1 }
  0x15   : > { %465 = vadd.xlane.f32.xlu0 %v464_v1  ;;  %559 = vmatprep.subr.bf16.mxu0 %v1753_v7  ;;  %v1759_v12 = vld [vmem:[%s430_s23 + $0x24] ss:$8 sps:$4 sm:$0xff]   ;;  %v1761_v13 = vld [vmem:[%s430_s23 + $0x20] ss:$8 sps:$4 sm:$0xff]   ;;  %v1762_v14 = vld [vmem:[%s430_s23 + $0x34] ss:$8 sps:$4 sm:$0xff]   ;;  %s434_s17 = scalar_lea.vmem %s2100_s4, %s1549_s28  ;;  %s458_s26 = sadd.s32 %s1549_s28, %s2117_s30 }
  0x16   : > { %560 = vmatpush1.bf16.msra.mxu0 %v1755_v9  ;;  %v1764_v15 = vld [vmem:[%s430_s23 + $0x30] ss:$8 sps:$4 sm:$0xff]   ;;  %v503_v30 = vld [vmem:[%s434_s17] sm:$0x3]  ;;  %s1837_s19 = smov 112   ;;  %s1838_s20 = smov 32  }
  0x17   : > { %561 = vmatprep.subr.bf16.mxu0 %v1756_v10  ;;  %v508_v31 = vrot.slane %v503_v30, %v507_v29  ;;  %v512_v38 = vrot.slane %v503_v30, %v511_v37  ;;  %s1841_s23 = smov 16   ;;  %s1597_s25 = sshll.u32 %s2119_s10, 5 }
  0x18   : > { %s439_s29 = scalar_lea.vmem %s2101_s5, %s1597_s25  ;;  %s1557_s27 = sshll.u32 %s458_s26, 3 }
  0x19   : > { %s460_s17 = scalar_lea.vmem %s2105_s9, %s1557_s27 }
  0x1a   : > { %562 = vmatpush1.bf16.msra.mxu0 %v1758_v11 }
  0x1b   : > { %563 = vmatprep.subr.bf16.mxu0 %v1759_v12 }
  0x1e   : > { %564 = vmatpush1.bf16.msra.mxu0 %v1761_v13 }
  0x1f   : > { %565 = vmatprep.subr.bf16.mxu0 %v1762_v14 }
  0x22   : > { %566 = vmatpush1.bf16.msra.mxu0 %v1764_v15 }
  0x23   : > { %1650 = vmatprep.subr.mxu0 %v1833_v26 }
  0xa2   : > { %v466_v2 = vpop.xlane.xlu0 %465 }
  0xa3   : > { %v468_v3 = vmul.f32 0.015625, %v466_v2 }
  0xa5   : > { %v469_v4 = vsub.f32 %v1931_v0, %v468_v3 }
  0xa7   : > { %v470_v5 = vmul.f32 %v469_v4, %v469_v4 }
  0xa9   : > { %v471_v6 = vsel %vm463_vm0, %v470_v5, 0.0 }
  0xaa   : > { %472 = vadd.xlane.f32.xlu0 %v471_v6 }
 0x137   : > { %v473_v16 = vpop.xlane.xlu0 %472 }
 0x138   : > { %v474_v17 = vmul.f32 0.015625, %v473_v16 }
 0x13a   : > { %v475_v18 = vadd.f32 1e-05, %v474_v17 }
 0x13c   : > { %1774 = vrsqrt.f32 %v475_v18 }
 0x146   : > { %v1775_v19 = vpop.eup %1774 }
 0x147   : > { %v477_v21 = vmul.f32 %v1775_v19, %v469_v4 }
 0x149   : > { %v485_v23 = vmul.f32 %v1558_v20, %v477_v21 }
 0x14b   : > { %v493_v24 = vadd.f32 %v1559_v22, %v485_v23 }
 0x14d   : > { %v494_v25 = vpack.c.bf16 %v493_v24, %v493_v24 }
 0x14f   : > { %1568 = vmatmul.mubr.msk.bf16.vlgmr.msra.gmra.mrb[0].mxu0 %vm555_vm1, %v494_v25 }
 0x150   : > { %1652 = vmatprep.mubr.msk.f32.mxu0 %vm1834_vm2, %v1833_v26 }
 0x222   : > { %v593_v32 = vpop.f32.mrb[0].mxu0 }
 0x223   : > { %v1964_v33 = vadd.f32 %v593_v32, %v508_v31  ;;  %v595_v34 = vpop.f32.mrb[1].mxu0 }
 0x224   : > { %v597_v35 = vpop.f32.mrb[2].mxu0  ;;  %v596_v39 = vadd.f32 %v595_v34, %v512_v38 }
 0x225   : > { %v598_v36 = vpop.f32.mrb[3].mxu0  ;;  %602 = vrot.lane.b32.xlu1 %v1964_v33, %s1835_s18  ;;  %v1973_v45 = vmul.f32 0.25, %v1964_v33  ;;  %s447_s18 = scalar_lea.vmem %s2103_s7, %s1597_s25  ;;  %s442_s25 = scalar_lea.vmem %s2102_s6, %s2119_s10 }
 0x226   : > { %v1967_v42 = vpack.c.bf16 %v596_v39, %v596_v39 }
 0x228   : > { %v703_v46 = vand.u32 %v1969_v44, %v1967_v42 }
 0x297   : > { %v603_v43 = vpop.permute.xlu1 %602 }
 0x298   : > { %1629 = vmatpush3.xpose.msk.msra.mxu1 %vm604_vm5, %v603_v43 }
 0x299   : > { %1633 = vmatprep.subr.bf16.mxu1 %v1833_v26 }
 0x29b   : > { %1631 = vmatmul.mubr.msk.f32.vlgmr.msra.gmra.mrb[0].mxu1 %vm604_vm5, %v1973_v45 }
 0x29c   : > { %1634 = vmatpush3.bf16.msra.mxu1 %v703_v46  ;;  %1635 = vmatprep.mubr.msk.bf16.mxu1 %vm1834_vm2, %v1833_v26 }
 0x29d   : > { %1639 = vmatprep.subr.mxu1 %v1833_v26 }
 0x36e   : > { %v676_v47 = vpop.f32.mrb[0].mxu1 }
 0x36f   : > { %v1632_v48 = vpop.f32.mrb[1].mxu1  ;;  %v681_v49 = vsel %vm680_vm6, %v676_v47, -inf }
 0x370   : > { %682 = vmax.xlane.f32.xlu1 %v681_v49 }
 0x381   : > { %836 = vrot.lane.b32.xlu1 %v1967_v42, %s1837_s19 }
 0x385   : > { %886 = vrot.lane.b32.xlu1 %v1964_v33, %s1838_s20 }
 0x3fd   : > { %v683_v50 = vpop.xlane.xlu1 %682 }
 0x3fe   : > { %v684_v51 = vsub.f32 %v676_v47, %v683_v50 }
 0x400   : > { %v685_v52 = vmul.f32 1.442695, %v684_v51 }
 0x401   : > { %v837_v53 = vpop.permute.xlu1 %836 }
 0x402   : > { %1776 = vpow2.f32 %v685_v52  ;;  %v842_v62 = vand.u32 %v837_v53, %v1969_v44 }
 0x405   : > { %v887_v54 = vpop.permute.xlu1 %886 }
 0x406   : > { %1651 = vmatpush3.xpose.msk.msra.mxu0 %vm604_vm5, %v887_v54  ;;  %v1766_v54 = vld [vmem:[%s447_s18] sm:$0xff]  }
 0x407   : > { %1655 = vmatprep.subr.bf16.mxu0 %v1833_v26 }
 0x40c   : > { %v1777_v55 = vpop.eup %1776 }
 0x40d   : > { %v687_v56 = vsel %vm680_vm6, %v1777_v55, 0.0 }
 0x40e   : > { %688 = vadd.xlane.f32.xlu0 %v687_v56  ;;  %v1768_v56 = vld [vmem:[%s447_s18 + $0x8] sm:$0xff]  }
 0x424   : > { %747 = vrot.lane.b32.xlu0 %v1964_v33, %s1839_s21 }
 0x428   : > { %745 = vrot.lane.b32.xlu0 %v1973_v45, %s1837_s19  ;;  %s1599_s19 = sshll.u32 %s2119_s10, 3 }
 0x49b   : > { %v689_v57 = vpop.xlane.xlu0 %688 }
 0x49c   : > { %1778 = vrcp.f32 %v689_v57  ;;  %v1769_v57 = vld [vmem:[%s439_s29 + $0x10] sm:$0xff]  }
 0x49f   : > { %v748_v61 = vpop.permute.xlu0 %747 }
 0x4a3   : > { %v746_v63 = vpop.permute.xlu0 %745 }
 0x4a6   : > { %v1779_v58 = vpop.eup %1778 }
 0x4a7   : > { %v691_v59 = vmul.f32 %v1779_v58, %v1777_v55  ;;  %v1767_v55 = vld [vmem:[%s439_s29 + $0x8] sm:$0xff]   ;;  %v1770_v58 = vld [vmem:[%s447_s18 + $0x10] sm:$0xff]  }
 0x4a9   : > { %v692_v60 = vpack.c.bf16 %v691_v59, %v691_v59  ;;  %v1771_v59 = vld [vmem:[%s439_s29 + $0x18] sm:$0xff]  }
 0x4ab   : > { %1636 = vmatmul.mubr.msk.bf16.vlgmr.msra.gmra.mrb[4].mxu1 %vm694_vm7, %v692_v60  ;;  %v1772_v60 = vld [vmem:[%s447_s18 + $0x18] sm:$0xff]  }
 0x4ac   : > { %1640 = vmatpush3.xpose.msk.msra.mxu1 %vm604_vm5, %v748_v61  ;;  %1641 = vmatprep.mubr.msk.f32.mxu1 %vm1834_vm2, %v1833_v26 }
 0x4ad   : > { %1644 = vmatprep.subr.bf16.mxu1 %v1833_v26 }
 0x4b3   : > { %1642 = vmatmul.mubr.msk.f32.vlgmr.msra.gmra.mrb[2].mxu1 %vm604_vm5, %v746_v63 }
 0x4b4   : > { %1645 = vmatpush3.bf16.msra.mxu1 %v842_v62  ;;  %1646 = vmatprep.mubr.msk.bf16.mxu1 %vm1834_vm2, %v1833_v26 }
 0x4b5   : > { %1661 = vmatprep.subr.mxu1 %v1833_v26 }
 0x57e   : > { %v2003_v1 = vpop.f32.mrb[4].mxu1 }
 0x57f   : > { %v1637_v2 = vpop.f32.mrb[5].mxu1 }
 0x580   : > { %v742_v3 = vpop.f32.mrb[6].mxu1 }
 0x581   : > { %v1638_v4 = vpop.f32.mrb[7].mxu1 }
 0x586   : > { %v819_v5 = vpop.f32.mrb[2].mxu1 }
 0x587   : > { %v1643_v6 = vpop.f32.mrb[3].mxu1  ;;  %v823_v7 = vsel %vm680_vm6, %v819_v5, -inf }
 0x588   : > { %824 = vmax.xlane.f32.xlu0 %v823_v7 }
 0x59e   : > { %884 = vrot.lane.b32.xlu0 %v1973_v45, %s1840_s22 }
 0x615   : > { %v825_v8 = vpop.xlane.xlu0 %824 }
 0x616   : > { %v826_v9 = vsub.f32 %v819_v5, %v825_v8 }
 0x618   : > { %v827_v10 = vmul.f32 1.442695, %v826_v9 }
 0x619   : > { %v885_v11 = vpop.permute.xlu0 %884 }
 0x61a   : > { %1780 = vpow2.f32 %v827_v10  ;;  %1653 = vmatmul.mubr.msk.f32.vlgmr.msra.gmra.mrb[4].mxu0 %vm604_vm5, %v885_v11 }
 0x61b   : > { %1657 = vmatprep.mubr.msk.bf16.mxu0 %vm1834_vm2, %v1833_v26 }
 0x624   : > { %v1781_v12 = vpop.eup %1780 }
 0x625   : > { %v829_v13 = vsel %vm680_vm6, %v1781_v12, 0.0 }
 0x626   : > { %830 = vadd.xlane.f32.xlu1 %v829_v13 }
 0x637   : > { %1024 = vrot.lane.b32.xlu1 %v1964_v33, %s1841_s23 }
 0x63b   : > { %1022 = vrot.lane.b32.xlu1 %v1973_v45, %s1842_s24 }
 0x6b3   : > { %v831_v14 = vpop.xlane.xlu1 %830 }
 0x6b4   : > { %1782 = vrcp.f32 %v831_v14 }
 0x6b7   : > { %v1025_v18 = vpop.permute.xlu1 %1024 }
 0x6bb   : > { %v1023_v19 = vpop.permute.xlu1 %1022 }
 0x6be   : > { %v1783_v15 = vpop.eup %1782 }
 0x6bf   : > { %v833_v16 = vmul.f32 %v1783_v15, %v1781_v12 }
 0x6c1   : > { %v834_v17 = vpack.c.bf16 %v833_v16, %v833_v16 }
 0x6c3   : > { %1647 = vmatmul.mubr.msk.bf16.vlgmr.msra.gmra.mrb[8].mxu1 %vm694_vm7, %v834_v17 }
 0x6c4   : > { %1662 = vmatpush3.xpose.msk.msra.mxu1 %vm604_vm5, %v1025_v18  ;;  %1663 = vmatprep.mubr.msk.f32.mxu1 %vm1834_vm2, %v1833_v26 }
 0x6c5   : > { %1666 = vmatprep.subr.bf16.mxu1 %v1833_v26 }
 0x6cb   : > { %1664 = vmatmul.mubr.msk.f32.vlgmr.msra.gmra.mrb[12].mxu1 %vm604_vm5, %v1023_v19 }
 0x6cc   : > { %1668 = vmatprep.mubr.msk.bf16.mxu1 %vm1834_vm2, %v1833_v26 }
 0x6ed   : > { %v958_v20 = vpop.f32.mrb[4].mxu0 }
 0x6ee   : > { %v1654_v21 = vpop.f32.mrb[5].mxu0  ;;  %v962_v22 = vsel %vm680_vm6, %v958_v20, -inf }
 0x6ef   : > { %963 = vmax.xlane.f32.xlu1 %v962_v22 }
 0x77c   : > { %v964_v23 = vpop.xlane.xlu1 %963 }
 0x77d   : > { %v965_v24 = vsub.f32 %v958_v20, %v964_v23 }
 0x77f   : > { %v966_v25 = vmul.f32 1.442695, %v965_v24  ;;  %v1581_v24 = vld [vmem:[%s442_s25] ss:$0 sm:$0xff] }
 0x781   : > { %1784 = vpow2.f32 %v966_v25 }
 0x78b   : > { %v1785_v27 = vpop.eup %1784 }
 0x78c   : > { %v968_v28 = vsel %vm680_vm6, %v1785_v27, 0.0 }
 0x78d   : > { %969 = vadd.xlane.f32.xlu1 %v968_v28 }
 0x796   : > { %v878_v29 = vpop.f32.mrb[8].mxu1 }
 0x797   : > { %v1648_v30 = vpop.f32.mrb[9].mxu1 }
 0x798   : > { %v881_v31 = vpop.f32.mrb[10].mxu1 }
 0x799   : > { %v1649_v32 = vpop.f32.mrb[11].mxu1 }
 0x79e   : > { %v1096_v33 = vpop.f32.mrb[12].mxu1 }
 0x79f   : > { %v1665_v34 = vpop.f32.mrb[13].mxu1  ;;  %v1100_v35 = vsel %vm680_vm6, %v1096_v33, -inf }
 0x7a0   : > { %1101 = vmax.xlane.f32.xlu0 %v1100_v35 }
 0x7b6   : > { %1112 = vrot.lane.b32.xlu0 %v1967_v42, %s1842_s24  ;;  %s452_s24 = scalar_lea.vmem %s2104_s8, %s1599_s19 }
 0x7b7   : > { %v1773_v9 = vld [vmem:[%s452_s24] sm:$0x3f]  }
 0x7b8   : > { %v1346_v15 = vsel %vm1344_vm10, %v1773_v9, 0 }
 0x81a   : > { %v970_v45 = vpop.xlane.xlu1 %969 }
 0x82d   : > { %v1102_v36 = vpop.xlane.xlu0 %1101 }
 0x82e   : > { %v1103_v37 = vsub.f32 %v1096_v33, %v1102_v36 }
 0x830   : > { %v1104_v38 = vmul.f32 1.442695, %v1103_v37 }
 0x831   : > { %v1113_v39 = vpop.permute.xlu0 %1112 }
 0x832   : > { %1786 = vpow2.f32 %v1104_v38  ;;  %v1118_v40 = vand.u32 %v1113_v39, %v1969_v44 }
 0x833   : > { %1788 = vrcp.f32 %v970_v45 }
 0x834   : > { %1667 = vmatpush3.bf16.msra.mxu1 %v1118_v40 }
 0x835   : > { %1684 = vmatprep.subr.bf16.mxu1 %v1833_v26 }
 0x83c   : > { %v1787_v41 = vpop.eup %1786 }
 0x83d   : > { %v1106_v43 = vsel %vm680_vm6, %v1787_v41, 0.0  ;;  %v1789_v47 = vpop.eup %1788 }
 0x83e   : > { %1107 = vadd.xlane.f32.xlu1 %v1106_v43  ;;  %v972_v48 = vmul.f32 %v1789_v47, %v1785_v27 }
 0x840   : > { %v973_v51 = vpack.c.bf16 %v972_v48, %v972_v48 }
 0x84f   : > { %974 = vrot.lane.b32.xlu1 %v1967_v42, %s1840_s22 }
 0x853   : > { %1161 = vrot.lane.b32.xlu1 %v878_v29, %s1841_s23 }
 0x8cb   : > { %v1108_v46 = vpop.xlane.xlu1 %1107 }
 0x8cc   : > { %1790 = vrcp.f32 %v1108_v46 }
 0x8cf   : > { %v975_v49 = vpop.permute.xlu1 %974 }
 0x8d0   : > { %v980_v50 = vand.u32 %v975_v49, %v1969_v44  ;;  %v1765_v44 = vld [vmem:[%s439_s29] sm:$0xff]  }
 0x8d2   : > { %1656 = vmatpush3.bf16.msra.mxu0 %v980_v50 }
 0x8d3   : > { %1672 = vmatprep.subr.bf16.mxu0 %v1833_v26  ;;  %v1162_v7 = vpop.permute.xlu1 %1161 }
 0x8d4   : > { %v1172_v10 = vsel %vm604_vm5, %v2003_v1, %v1162_v7 }
 0x8d5   : > { %1658 = vmatmul.mubr.msk.bf16.vlgmr.msra.gmra.mrb[8].mxu0 %vm694_vm7, %v973_v51 }
 0x8d6   : > { %v1791_v52 = vpop.eup %1790  ;;  %1680 = vmatprep.mubr.msk.bf16.mxu0 %vm1834_vm2, %v1833_v26  ;;  %1673 = vmatpush3.bf16.msra.mxu0 %v1765_v44 }
 0x8d7   : > { %v1110_v42 = vmul.f32 %v1791_v52, %v1787_v41  ;;  %1674 = vmatprep.subr.bf16.mxu0 %v1833_v26 }
 0x8d9   : > { %v1111_v53 = vpack.c.bf16 %v1110_v42, %v1110_v42 }
 0x8da   : > { %1675 = vmatpush3.bf16.msra.mxu0 %v1767_v55 }
 0x8db   : > { %1669 = vmatmul.mubr.msk.bf16.vlgmr.msra.gmra.mrb[16].mxu1 %vm694_vm7, %v1111_v53  ;;  %1676 = vmatprep.subr.bf16.mxu0 %v1833_v26 }
 0x8dc   : > { %1692 = vmatprep.mubr.msk.bf16.mxu1 %vm1834_vm2, %v1833_v26  ;;  %1685 = vmatpush3.bf16.msra.mxu1 %v1766_v54 }
 0x8dd   : > { %1686 = vmatprep.subr.bf16.mxu1 %v1833_v26 }
 0x8de   : > { %1677 = vmatpush3.bf16.msra.mxu0 %v1769_v57 }
 0x8df   : > { %1678 = vmatprep.subr.bf16.mxu0 %v1833_v26 }
 0x8e0   : > { %1687 = vmatpush3.bf16.msra.mxu1 %v1768_v56 }
 0x8e1   : > { %1688 = vmatprep.subr.bf16.mxu1 %v1833_v26 }
 0x8e2   : > { %1679 = vmatpush3.bf16.msra.mxu0 %v1771_v59 }
 0x8e3   : > { %1696 = vmatprep.subr.bf16.mxu0 %v1833_v26 }
 0x8e4   : > { %1689 = vmatpush3.bf16.msra.mxu1 %v1770_v58 }
 0x8e5   : > { %1690 = vmatprep.subr.bf16.mxu1 %v1833_v26 }
 0x8e8   : > { %1691 = vmatpush3.bf16.msra.mxu1 %v1772_v60 }
 0x9a8   : > { %v1016_v61 = vpop.f32.mrb[8].mxu0 }
 0x9a9   : > { %1165 = vrot.lane.b32.xlu1 %v1016_v61, %s1838_s20  ;;  %v1659_v62 = vpop.f32.mrb[9].mxu0 }
 0x9aa   : > { %v1019_v63 = vpop.f32.mrb[10].mxu0 }
 0x9ab   : > { %v1660_v2 = vpop.f32.mrb[11].mxu0 }
 0x9ae   : > { %v1154_v3 = vpop.f32.mrb[16].mxu1 }
 0x9af   : > { %1169 = vrot.lane.b32.xlu1 %v1154_v3, %s1839_s21  ;;  %v1670_v4 = vpop.f32.mrb[17].mxu1 }
 0x9b0   : > { %v1157_v5 = vpop.f32.mrb[18].mxu1 }
 0x9b1   : > { %v1671_v6 = vpop.f32.mrb[19].mxu1 }
 0xa1b   : > { %v1166_v8 = vpop.permute.xlu1 %1165 }
 0xa1c   : > { %v1174_v11 = vsel %vm1173_vm8, %v1172_v10, %v1166_v8 }
 0xa21   : > { %v1170_v12 = vpop.permute.xlu1 %1169 }
 0xa22   : > { %v1176_v13 = vsel %vm1175_vm9, %v1174_v11, %v1170_v12 }
 0xa23   : > { %v1177_v14 = vpack.c.bf16 %v1176_v13, %v1176_v13 }
 0xa25   : > { %1681 = vmatmul.mubr.msk.bf16.vlgmr.msra.gmra.mrb[12].mxu0 %vm555_vm1, %v1177_v14  ;;  %1693 = vmatmul.mubr.msk.bf16.vlgmr.msra.gmra.mrb[20].mxu1 %vm555_vm1, %v1177_v14 }
 0xa26   : > { %1697 = vmatpush3.bf16.msra.mxu0 %v1346_v15  ;;  %1698 = vmatprep.mubr.msk.bf16.mxu0 %vm1834_vm2, %v1833_v26 }
 0xaf8   : > { %v1254_v16 = vpop.f32.mrb[12].mxu0  ;;  %v1326_v17 = vpop.f32.mrb[20].mxu1 }
 0xaf9   : > { %v1332_v1 = vpack.c.bf16 %v1326_v17, %v1326_v17  ;;  %v1682_v18 = vpop.f32.mrb[13].mxu0  ;;  %v1694_v19 = vpop.f32.mrb[21].mxu1  ;;  %v1255_v26 = vadd.f32 %v1581_v24, %v1254_v16 }
 0xafa   : > { %v1257_v20 = vpop.f32.mrb[14].mxu0  ;;  %v1329_v21 = vpop.f32.mrb[22].mxu1 }
 0xafb   : > { %v1683_v22 = vpop.f32.mrb[15].mxu0  ;;  %v1695_v23 = vpop.f32.mrb[23].mxu1  ;;  %1699 = vmatmul.mubr.msk.bf16.vlgmr.msra.gmra.mrb[16].mxu0 %vm1340_vm11, %v1332_v1 }
 0xbce   : > { %v1382_v25 = vpop.f32.mrb[16].mxu0 }
 0xbcf   : > { %v1388_v27 = vmul.f32 2.0, %v1382_v25  ;;  %v1700_v28 = vpop.f32.mrb[17].mxu0 }
 0xbd0   : > { %v1385_v29 = vpop.f32.mrb[18].mxu0 }
 0xbd1   : > { %v1389_v30 = vadd.f32 %v1388_v27, %v1255_v26  ;;  %v1701_v31 = vpop.f32.mrb[19].mxu0 }
 0xbd3   : > { %v1390_v32 = vadd.f32 %v1389_v30, %v1931_v0 }
 0xbd5   : > { %1391 = vst.msk [vmem:[%s460_s17] sm:$0x1f] %vm463_vm0, %v1390_v32 }
 0xbd6 PF: > { %s19_s13 = sadd.s32 1, %s1830_s13   ;;  %s2106_s30 = smov %s1822_s11 }
 0xbd7   : > { %p16_p7 = scmp.ge.s32.totalorder %s19_s13, 8   ;;  %s2107_s10 = smov %s1826_s12 }
 0xbd8   : > { %s2108_s11 = smov %s2111_s14  ;;  %s2109_s12 = smov %s2115_s15 }
 0xbd9   :  { %18 = sbr.rel (!%p16_p7) target bundleno = 3 (0x3), region = 104 }

// kernel: multi_expert_clip_forward.17
= control target key start
LH: loop header
LB: loop body
LE: loop exit
PB: predicated region body
PF: predicated region fallthrough
CT: control target
= control target key end

     0   :  { %s1914_s30 = smov 0   ;;  %s1916_s10 = smov 0   ;;  %s2116_s0 = inlined_call_operand.vmem [shape: f32[3,2,5,64], index: 0, kind: input, shape index: {}]   ;;  %s2117_s1 = inlined_call_operand.vmem [shape: f32[1,64], index: 1, kind: input, shape index: {}]   ;;  %s2118_s2 = inlined_call_operand.vmem [shape: f32[1,64], index: 2, kind: input, shape index: {}]   ;;  %s2119_s3 = inlined_call_operand.vmem [shape: bf16[3,64,192], index: 3, kind: input, shape index: {}]   ;;  %s2120_s4 = inlined_call_operand.vmem [shape: f32[3,1,192], index: 4, kind: input, shape index: {}]   ;;  %s2121_s5 = inlined_call_operand.vmem [shape: bf16[3,64,64], index: 5, kind: input, shape index: {}]   ;;  %s2122_s6 = inlined_call_operand.vmem [shape: f32[3,1,64], index: 6, kind: input, shape index: {}]   ;;  %s2123_s7 = inlined_call_operand.vmem [shape: bf16[3,64,12], index: 7, kind: input, shape index: {}]   ;;  %s2124_s8 = inlined_call_operand.vmem [shape: bf16[3,12,64], index: 8, kind: input, shape index: {}]   ;;  %s2125_s9 = inlined_call_operand.vmem [shape: f32[3,2,5,64], index: 9, kind: output, shape index: {}]  }
   0x1   :  { %s1918_s11 = smov 0   ;;  %s1920_s12 = smov 0  }
   0x2   :  { %s1922_s13 = smov 0  }
   0x3 LB: > { %s28_s14 = sadd.s32 1, %s1843_s11  ;;  %s31_s15 = sadd.s32 1, %s1847_s12  ;;  %s1851_s13 = sphi %s1922_s13, %s19_s13   ;;  %s1847_s12 = sphi %s1920_s12, %s2129_s12   ;;  %s1843_s11 = sphi %s1918_s11, %s2128_s11   ;;  %s1839_s10 = sphi %s1916_s10, %s2127_s10   ;;  %s1835_s30 = sphi %s1914_s30, %s2126_s30  }
   0x4   : > { %p29_p0 = scmp.ge.s32.totalorder %s28_s14, 2  ;;  %p1565_p1 = scmp.ge.s32.totalorder %s1851_s13, 1 }
   0x5   : > { %p363_p2 = scmp.lt.s32.totalorder %s1851_s13, 7 }
   0x6   : > { %s2131_s14 = smov (%p29_p0, %s28_s14), 0  ;;  %s2133_s15 = smov (!%p29_p0, %s31_s15), %s1847_s12 }
   0x7   : > { %p364_p3 = pnand %p1565_p1, %p363_p2  ;;  %p33_p4 = scmp.ge.s32.totalorder %s2133_s15, 3 }
   0x8   : > { %p432_p5 = scmp.lt.s32.totalorder (!%p364_p3), %s1839_s10, 2  ;;  %p434_p6 = scmp.lt.s32.totalorder (!%p364_p3), %s1835_s30, 1  ;;  %vm477_vm0 = vcmask (!%p364_p3), 520192   ;;  %v1853_v8 = vmov (!%p364_p3), 0   ;;  %v1579_v20 = vld [vmem:[%s2117_s1] ss:$0 sm:$0xff] (!%p364_p3)  ;;  %v519_v27 = vlaneseq (!%p364_p3) }
   0x9   : > { %s2135_s15 = smov (%p33_p4, %s2133_s15), 0  ;;  %367 = sbr.rel (%p364_p3) target bundleno = 3032 (0xbd8), region = 56 }
   0xa   : > { %605 = vmatprep.mubr.bf16.mxu0 (!%p364_p3), %v1853_v8  ;;  %v1580_v22 = vld [vmem:[%s2118_s2] ss:$0 sm:$0xff] (!%p364_p3)  ;;  %vm569_vm1 = vcmask (!%p364_p3), 523264   ;;  %v1854_v26 = vmov (!%p364_p3), 0.0   ;;  %v520_v28 = vshrl.u32 (!%p364_p3), %v519_v27, 7  ;;  %vm1855_vm2 = vmmov (!%p364_p3), 0  }
   0xb   : > { %1649 = vmatprep.subr.mxu1 (!%p364_p3), %v1854_v26  ;;  %1651 = vmatprep.mubr.msk.f32.mxu1 (!%p364_p3), %vm1855_vm2, %v1854_v26  ;;  %vm712_vm3 = vcmask (!%p364_p3), 1041408   ;;  %vm713_vm4 = vcmask (!%p364_p3), 1042432   ;;  %v1857_v40 = vmov (!%p364_p3), 65535   ;;  %vm618_vm5 = vcmask (!%p364_p3), 130048   ;;  %s1860_s23 = smov (!%p364_p3), 48   ;;  %s1861_s24 = smov (!%p364_p3), 96  }
   0xc   : > { %v521_v29 = vsub.s32 (!%p364_p3), 0, %v520_v28  ;;  %v525_v37 = vsub.s32 (!%p364_p3), 1, %v520_v28  ;;  %v714_v41 = vsel (!%p364_p3), %vm712_vm3, 4294967295, %v1857_v40  ;;  %vm694_vm6 = vcmask (!%p364_p3), 36864   ;;  %s1863_s26 = smov (!%p364_p3), 80  }
   0xd   : > { %v1990_v44 = vsel (!%p364_p3), %vm713_vm4, %v714_v41, 0  ;;  %vm708_vm7 = vcmask (!%p364_p3), 39936   ;;  %vm1187_vm8 = vcmask (!%p364_p3), 261120   ;;  %vm1189_vm9 = vcmask (!%p364_p3), 392192  }
   0xe   : > { %vm1358_vm10 = vcmask (!%p364_p3), 1045504   ;;  %vm1354_vm11 = vcmask (!%p364_p3), 97280  }
  0x10   : > { %s2137_s10 = smov (!%p432_p5, %s1839_s10), 2  ;;  %s2139_s30 = smov (!%p434_p6, %s1835_s30), 1 }
  0x11   : > { %s1566_s16 = sshll.u32 %s2137_s10, 1  ;;  %s1617_s22 = sshll.u32 %s2137_s10, 6 }
  0x12   : > { %s1949_s17 = sadd.s32 %s1566_s16, %s2139_s30  ;;  %s444_s25 = scalar_lea.vmem %s2119_s3, %s1617_s22 }
  0x13   : > { %s1567_s18 = sshll.u32 %s1949_s17, 3  ;;  %v1774_v7 = vld [vmem:[%s444_s25 + $0x4] ss:$8 sps:$4 sm:$0xff]   ;;  %v1776_v9 = vld [vmem:[%s444_s25] ss:$8 sps:$4 sm:$0xff]   ;;  %s448_s20 = scalar_lea.vmem %s2120_s4, %s1566_s16 }
  0x14   : > { %s439_s21 = scalar_lea.vmem %s2116_s0, %s1567_s18  ;;  %573 = vmatprep.subr.bf16.mxu0 %v1774_v7  ;;  %v1777_v10 = vld [vmem:[%s444_s25 + $0x14] ss:$8 sps:$4 sm:$0xff]   ;;  %v1779_v11 = vld [vmem:[%s444_s25 + $0x10] ss:$8 sps:$4 sm:$0xff]   ;;  %v1780_v12 = vld [vmem:[%s444_s25 + $0x24] ss:$8 sps:$4 sm:$0xff]  }
  0x15   : > { %v1957_v0 = vld [vmem:[%s439_s21] sm:$0x1f]  ;;  %574 = vmatpush1.bf16.msra.mxu0 %v1776_v9  ;;  %v1783_v14 = vld [vmem:[%s444_s25 + $0x34] ss:$8 sps:$4 sm:$0xff]   ;;  %v1785_v15 = vld [vmem:[%s444_s25 + $0x30] ss:$8 sps:$4 sm:$0xff]  }
  0x16   : > { %v478_v1 = vsel %vm477_vm0, %v1957_v0, 0.0  ;;  %575 = vmatprep.subr.bf16.mxu0 %v1777_v10  ;;  %v1782_v13 = vld [vmem:[%s444_s25 + $0x20] ss:$8 sps:$4 sm:$0xff]   ;;  %s1856_s21 = smov 64   ;;  %s1858_s16 = smov 112  }
  0x17   : > { %479 = vadd.xlane.f32.xlu0 %v478_v1  ;;  %v517_v30 = vld [vmem:[%s448_s20] sm:$0x3]  ;;  %s1859_s22 = smov 32   ;;  %s1862_s25 = smov 16  }
  0x18   : > { %v522_v31 = vrot.slane %v517_v30, %v521_v29  ;;  %v526_v38 = vrot.slane %v517_v30, %v525_v37  ;;  %s1618_s27 = sshll.u32 %s2137_s10, 5 }
  0x19   : > { %576 = vmatpush1.bf16.msra.mxu0 %v1779_v11  ;;  %s453_s30 = scalar_lea.vmem %s2121_s5, %s1618_s27 }
  0x1a   : > { %577 = vmatprep.subr.bf16.mxu0 %v1780_v12 }
  0x1d   : > { %578 = vmatpush1.bf16.msra.mxu0 %v1782_v13 }
  0x1e   : > { %579 = vmatprep.subr.bf16.mxu0 %v1783_v14 }
  0x21   : > { %580 = vmatpush1.bf16.msra.mxu0 %v1785_v15 }
  0x22   : > { %1671 = vmatprep.subr.mxu0 %v1854_v26 }
  0xa4   : > { %v480_v2 = vpop.xlane.xlu0 %479 }
  0xa5   : > { %v482_v3 = vmul.f32 0.015625, %v480_v2 }
  0xa7   : > { %v483_v4 = vsub.f32 %v1957_v0, %v482_v3 }
  0xa9   : > { %v484_v5 = vmul.f32 %v483_v4, %v483_v4 }
  0xab   : > { %v485_v6 = vsel %vm477_vm0, %v484_v5, 0.0 }
  0xac   : > { %486 = vadd.xlane.f32.xlu0 %v485_v6 }
 0x139   : > { %v487_v16 = vpop.xlane.xlu0 %486 }
 0x13a   : > { %v488_v17 = vmul.f32 0.015625, %v487_v16 }
 0x13c   : > { %v489_v18 = vadd.f32 1e-05, %v488_v17 }
 0x13e   : > { %1795 = vrsqrt.f32 %v489_v18 }
 0x148   : > { %v1796_v19 = vpop.eup %1795 }
 0x149   : > { %v491_v21 = vmul.f32 %v1796_v19, %v483_v4 }
 0x14b   : > { %v499_v23 = vmul.f32 %v1579_v20, %v491_v21 }
 0x14d   : > { %v507_v24 = vadd.f32 %v1580_v22, %v499_v23 }
 0x14f   : > { %v508_v25 = vpack.c.bf16 %v507_v24, %v507_v24 }
 0x151   : > { %1589 = vmatmul.mubr.msk.bf16.vlgmr.msra.gmra.mrb[0].mxu0 %vm569_vm1, %v508_v25 }
 0x152   : > { %1673 = vmatprep.mubr.msk.f32.mxu0 %vm1855_vm2, %v1854_v26 }
 0x224   : > { %v607_v32 = vpop.f32.mrb[0].mxu0 }
 0x225   : > { %v1985_v33 = vadd.f32 %v607_v32, %v522_v31  ;;  %v609_v34 = vpop.f32.mrb[1].mxu0 }
 0x226   : > { %v611_v35 = vpop.f32.mrb[2].mxu0  ;;  %v610_v39 = vadd.f32 %v609_v34, %v526_v38 }
 0x227   : > { %v612_v36 = vpop.f32.mrb[3].mxu0  ;;  %616 = vrot.lane.b32.xlu1 %v1985_v33, %s1856_s21  ;;  %v1994_v45 = vmul.f32 0.25, %v1985_v33  ;;  %s461_s21 = scalar_lea.vmem %s2123_s7, %s1618_s27  ;;  %s456_s27 = scalar_lea.vmem %s2122_s6, %s2137_s10 }
 0x228   : > { %v1988_v42 = vpack.c.bf16 %v610_v39, %v610_v39 }
 0x22a   : > { %v717_v46 = vand.u32 %v1990_v44, %v1988_v42 }
 0x299   : > { %v617_v43 = vpop.permute.xlu1 %616 }
 0x29a   : > { %1650 = vmatpush3.xpose.msk.msra.mxu1 %vm618_vm5, %v617_v43 }
 0x29b   : > { %1654 = vmatprep.subr.bf16.mxu1 %v1854_v26 }
 0x29d   : > { %1652 = vmatmul.mubr.msk.f32.vlgmr.msra.gmra.mrb[0].mxu1 %vm618_vm5, %v1994_v45 }
 0x29e   : > { %1655 = vmatpush3.bf16.msra.mxu1 %v717_v46  ;;  %1656 = vmatprep.mubr.msk.bf16.mxu1 %vm1855_vm2, %v1854_v26 }
 0x29f   : > { %1660 = vmatprep.subr.mxu1 %v1854_v26 }
 0x370   : > { %v690_v47 = vpop.f32.mrb[0].mxu1 }
 0x371   : > { %v1653_v48 = vpop.f32.mrb[1].mxu1  ;;  %v695_v49 = vsel %vm694_vm6, %v690_v47, -inf }
 0x372   : > { %696 = vmax.xlane.f32.xlu1 %v695_v49 }
 0x383   : > { %850 = vrot.lane.b32.xlu1 %v1988_v42, %s1858_s16 }
 0x387   : > { %900 = vrot.lane.b32.xlu1 %v1985_v33, %s1859_s22 }
 0x3ff   : > { %v697_v50 = vpop.xlane.xlu1 %696 }
 0x400   : > { %v698_v51 = vsub.f32 %v690_v47, %v697_v50 }
 0x402   : > { %v699_v52 = vmul.f32 1.442695, %v698_v51 }
 0x403   : > { %v851_v53 = vpop.permute.xlu1 %850 }
 0x404   : > { %1797 = vpow2.f32 %v699_v52  ;;  %v856_v62 = vand.u32 %v851_v53, %v1990_v44 }
 0x407   : > { %v901_v54 = vpop.permute.xlu1 %900 }
 0x408   : > { %1672 = vmatpush3.xpose.msk.msra.mxu0 %vm618_vm5, %v901_v54  ;;  %v1787_v54 = vld [vmem:[%s461_s21] sm:$0xff]  }
 0x409   : > { %1676 = vmatprep.subr.bf16.mxu0 %v1854_v26 }
 0x40e   : > { %v1798_v55 = vpop.eup %1797 }
 0x40f   : > { %v701_v56 = vsel %vm694_vm6, %v1798_v55, 0.0 }
 0x410   : > { %702 = vadd.xlane.f32.xlu0 %v701_v56  ;;  %v1789_v56 = vld [vmem:[%s461_s21 + $0x8] sm:$0xff]  }
 0x426   : > { %761 = vrot.lane.b32.xlu0 %v1985_v33, %s1860_s23 }
 0x42a   : > { %759 = vrot.lane.b32.xlu0 %v1994_v45, %s1858_s16  ;;  %s1620_s16 = sshll.u32 %s2137_s10, 3 }
 0x49d   : > { %v703_v57 = vpop.xlane.xlu0 %702 }
 0x49e   : > { %1799 = vrcp.f32 %v703_v57  ;;  %v1790_v57 = vld [vmem:[%s453_s30 + $0x10] sm:$0xff]  }
 0x4a1   : > { %v762_v61 = vpop.permute.xlu0 %761 }
 0x4a5   : > { %v760_v63 = vpop.permute.xlu0 %759 }
 0x4a8   : > { %v1800_v58 = vpop.eup %1799 }
 0x4a9   : > { %v705_v59 = vmul.f32 %v1800_v58, %v1798_v55  ;;  %v1788_v55 = vld [vmem:[%s453_s30 + $0x8] sm:$0xff]   ;;  %v1791_v58 = vld [vmem:[%s461_s21 + $0x10] sm:$0xff]  }
 0x4ab   : > { %v706_v60 = vpack.c.bf16 %v705_v59, %v705_v59  ;;  %v1792_v59 = vld [vmem:[%s453_s30 + $0x18] sm:$0xff]  }
 0x4ad   : > { %1657 = vmatmul.mubr.msk.bf16.vlgmr.msra.gmra.mrb[4].mxu1 %vm708_vm7, %v706_v60  ;;  %v1793_v60 = vld [vmem:[%s461_s21 + $0x18] sm:$0xff]  }
 0x4ae   : > { %1661 = vmatpush3.xpose.msk.msra.mxu1 %vm618_vm5, %v762_v61  ;;  %1662 = vmatprep.mubr.msk.f32.mxu1 %vm1855_vm2, %v1854_v26 }
 0x4af   : > { %1665 = vmatprep.subr.bf16.mxu1 %v1854_v26 }
 0x4b5   : > { %1663 = vmatmul.mubr.msk.f32.vlgmr.msra.gmra.mrb[2].mxu1 %vm618_vm5, %v760_v63 }
 0x4b6   : > { %1666 = vmatpush3.bf16.msra.mxu1 %v856_v62  ;;  %1667 = vmatprep.mubr.msk.bf16.mxu1 %vm1855_vm2, %v1854_v26 }
 0x4b7   : > { %1682 = vmatprep.subr.mxu1 %v1854_v26 }
 0x580   : > { %v2024_v1 = vpop.f32.mrb[4].mxu1 }
 0x581   : > { %v1658_v2 = vpop.f32.mrb[5].mxu1 }
 0x582   : > { %v756_v3 = vpop.f32.mrb[6].mxu1 }
 0x583   : > { %v1659_v4 = vpop.f32.mrb[7].mxu1 }
 0x588   : > { %v833_v5 = vpop.f32.mrb[2].mxu1 }
 0x589   : > { %v1664_v6 = vpop.f32.mrb[3].mxu1  ;;  %v837_v7 = vsel %vm694_vm6, %v833_v5, -inf }
 0x58a   : > { %838 = vmax.xlane.f32.xlu0 %v837_v7 }
 0x5a0   : > { %898 = vrot.lane.b32.xlu0 %v1994_v45, %s1861_s24 }
 0x617   : > { %v839_v8 = vpop.xlane.xlu0 %838 }
 0x618   : > { %v840_v9 = vsub.f32 %v833_v5, %v839_v8 }
 0x61a   : > { %v841_v10 = vmul.f32 1.442695, %v840_v9 }
 0x61b   : > { %v899_v11 = vpop.permute.xlu0 %898 }
 0x61c   : > { %1801 = vpow2.f32 %v841_v10  ;;  %1674 = vmatmul.mubr.msk.f32.vlgmr.msra.gmra.mrb[4].mxu0 %vm618_vm5, %v899_v11 }
 0x61d   : > { %1678 = vmatprep.mubr.msk.bf16.mxu0 %vm1855_vm2, %v1854_v26 }
 0x626   : > { %v1802_v12 = vpop.eup %1801 }
 0x627   : > { %v843_v13 = vsel %vm694_vm6, %v1802_v12, 0.0 }
 0x628   : > { %844 = vadd.xlane.f32.xlu1 %v843_v13 }
 0x639   : > { %1038 = vrot.lane.b32.xlu1 %v1985_v33, %s1862_s25 }
 0x63d   : > { %1036 = vrot.lane.b32.xlu1 %v1994_v45, %s1863_s26 }
 0x6b5   : > { %v845_v14 = vpop.xlane.xlu1 %844 }
 0x6b6   : > { %1803 = vrcp.f32 %v845_v14 }
 0x6b9   : > { %v1039_v18 = vpop.permute.xlu1 %1038 }
 0x6bd   : > { %v1037_v19 = vpop.permute.xlu1 %1036 }
 0x6c0   : > { %v1804_v15 = vpop.eup %1803 }
 0x6c1   : > { %v847_v16 = vmul.f32 %v1804_v15, %v1802_v12 }
 0x6c3   : > { %v848_v17 = vpack.c.bf16 %v847_v16, %v847_v16 }
 0x6c5   : > { %1668 = vmatmul.mubr.msk.bf16.vlgmr.msra.gmra.mrb[8].mxu1 %vm708_vm7, %v848_v17 }
 0x6c6   : > { %1683 = vmatpush3.xpose.msk.msra.mxu1 %vm618_vm5, %v1039_v18  ;;  %1684 = vmatprep.mubr.msk.f32.mxu1 %vm1855_vm2, %v1854_v26 }
 0x6c7   : > { %1687 = vmatprep.subr.bf16.mxu1 %v1854_v26 }
 0x6cd   : > { %1685 = vmatmul.mubr.msk.f32.vlgmr.msra.gmra.mrb[12].mxu1 %vm618_vm5, %v1037_v19 }
 0x6ce   : > { %1689 = vmatprep.mubr.msk.bf16.mxu1 %vm1855_vm2, %v1854_v26 }
 0x6ef   : > { %v972_v20 = vpop.f32.mrb[4].mxu0 }
 0x6f0   : > { %v1675_v21 = vpop.f32.mrb[5].mxu0  ;;  %v976_v22 = vsel %vm694_vm6, %v972_v20, -inf }
 0x6f1   : > { %977 = vmax.xlane.f32.xlu1 %v976_v22 }
 0x77e   : > { %v978_v23 = vpop.xlane.xlu1 %977 }
 0x77f   : > { %v979_v24 = vsub.f32 %v972_v20, %v978_v23 }
 0x781   : > { %v980_v25 = vmul.f32 1.442695, %v979_v24  ;;  %v1602_v24 = vld [vmem:[%s456_s27] ss:$0 sm:$0xff] }
 0x783   : > { %1805 = vpow2.f32 %v980_v25 }
 0x78d   : > { %v1806_v27 = vpop.eup %1805 }
 0x78e   : > { %v982_v28 = vsel %vm694_vm6, %v1806_v27, 0.0 }
 0x78f   : > { %983 = vadd.xlane.f32.xlu1 %v982_v28 }
 0x798   : > { %v892_v29 = vpop.f32.mrb[8].mxu1 }
 0x799   : > { %v1669_v30 = vpop.f32.mrb[9].mxu1 }
 0x79a   : > { %v895_v31 = vpop.f32.mrb[10].mxu1 }
 0x79b   : > { %v1670_v32 = vpop.f32.mrb[11].mxu1 }
 0x7a0   : > { %v1110_v33 = vpop.f32.mrb[12].mxu1 }
 0x7a1   : > { %v1686_v34 = vpop.f32.mrb[13].mxu1  ;;  %v1114_v35 = vsel %vm694_vm6, %v1110_v33, -inf }
 0x7a2   : > { %1115 = vmax.xlane.f32.xlu0 %v1114_v35 }
 0x7b8   : > { %1126 = vrot.lane.b32.xlu0 %v1988_v42, %s1863_s26  ;;  %s466_s26 = scalar_lea.vmem %s2124_s8, %s1620_s16 }
 0x7b9   : > { %v1794_v9 = vld [vmem:[%s466_s26] sm:$0x3f]  }
 0x7ba   : > { %v1360_v15 = vsel %vm1358_vm10, %v1794_v9, 0 }
 0x81c   : > { %v984_v45 = vpop.xlane.xlu1 %983 }
 0x82f   : > { %v1116_v36 = vpop.xlane.xlu0 %1115 }
 0x830   : > { %v1117_v37 = vsub.f32 %v1110_v33, %v1116_v36 }
 0x832   : > { %v1118_v38 = vmul.f32 1.442695, %v1117_v37 }
 0x833   : > { %v1127_v39 = vpop.permute.xlu0 %1126 }
 0x834   : > { %1807 = vpow2.f32 %v1118_v38  ;;  %v1132_v40 = vand.u32 %v1127_v39, %v1990_v44 }
 0x835   : > { %1809 = vrcp.f32 %v984_v45 }
 0x836   : > { %1688 = vmatpush3.bf16.msra.mxu1 %v1132_v40 }
 0x837   : > { %1705 = vmatprep.subr.bf16.mxu1 %v1854_v26 }
 0x83e   : > { %v1808_v41 = vpop.eup %1807 }
 0x83f   : > { %v1120_v43 = vsel %vm694_vm6, %v1808_v41, 0.0  ;;  %v1810_v47 = vpop.eup %1809 }
 0x840   : > { %1121 = vadd.xlane.f32.xlu1 %v1120_v43  ;;  %v986_v48 = vmul.f32 %v1810_v47, %v1806_v27 }
 0x842   : > { %v987_v51 = vpack.c.bf16 %v986_v48, %v986_v48 }
 0x851   : > { %988 = vrot.lane.b32.xlu1 %v1988_v42, %s1861_s24 }
 0x855   : > { %1175 = vrot.lane.b32.xlu1 %v892_v29, %s1862_s25 }
 0x8cd   : > { %v1122_v46 = vpop.xlane.xlu1 %1121 }
 0x8ce   : > { %1811 = vrcp.f32 %v1122_v46 }
 0x8d1   : > { %v989_v49 = vpop.permute.xlu1 %988 }
 0x8d2   : > { %v994_v50 = vand.u32 %v989_v49, %v1990_v44  ;;  %v1786_v44 = vld [vmem:[%s453_s30] sm:$0xff]   ;;  %s474_s30 = scalar_lea.vmem %s2125_s9, %s1567_s18 }
 0x8d4   : > { %1677 = vmatpush3.bf16.msra.mxu0 %v994_v50 }
 0x8d5   : > { %1693 = vmatprep.subr.bf16.mxu0 %v1854_v26  ;;  %v1176_v7 = vpop.permute.xlu1 %1175 }
 0x8d6   : > { %v1186_v10 = vsel %vm618_vm5, %v2024_v1, %v1176_v7 }
 0x8d7   : > { %1679 = vmatmul.mubr.msk.bf16.vlgmr.msra.gmra.mrb[8].mxu0 %vm708_vm7, %v987_v51 }
 0x8d8   : > { %v1812_v52 = vpop.eup %1811  ;;  %1701 = vmatprep.mubr.msk.bf16.mxu0 %vm1855_vm2, %v1854_v26  ;;  %1694 = vmatpush3.bf16.msra.mxu0 %v1786_v44 }
 0x8d9   : > { %v1124_v42 = vmul.f32 %v1812_v52, %v1808_v41  ;;  %1695 = vmatprep.subr.bf16.mxu0 %v1854_v26 }
 0x8db   : > { %v1125_v53 = vpack.c.bf16 %v1124_v42, %v1124_v42 }
 0x8dc   : > { %1696 = vmatpush3.bf16.msra.mxu0 %v1788_v55 }
 0x8dd   : > { %1690 = vmatmul.mubr.msk.bf16.vlgmr.msra.gmra.mrb[16].mxu1 %vm708_vm7, %v1125_v53  ;;  %1697 = vmatprep.subr.bf16.mxu0 %v1854_v26 }
 0x8de   : > { %1713 = vmatprep.mubr.msk.bf16.mxu1 %vm1855_vm2, %v1854_v26  ;;  %1706 = vmatpush3.bf16.msra.mxu1 %v1787_v54 }
 0x8df   : > { %1707 = vmatprep.subr.bf16.mxu1 %v1854_v26 }
 0x8e0   : > { %1698 = vmatpush3.bf16.msra.mxu0 %v1790_v57 }
 0x8e1   : > { %1699 = vmatprep.subr.bf16.mxu0 %v1854_v26 }
 0x8e2   : > { %1708 = vmatpush3.bf16.msra.mxu1 %v1789_v56 }
 0x8e3   : > { %1709 = vmatprep.subr.bf16.mxu1 %v1854_v26 }
 0x8e4   : > { %1700 = vmatpush3.bf16.msra.mxu0 %v1792_v59 }
 0x8e5   : > { %1717 = vmatprep.subr.bf16.mxu0 %v1854_v26 }
 0x8e6   : > { %1710 = vmatpush3.bf16.msra.mxu1 %v1791_v58 }
 0x8e7   : > { %1711 = vmatprep.subr.bf16.mxu1 %v1854_v26 }
 0x8ea   : > { %1712 = vmatpush3.bf16.msra.mxu1 %v1793_v60 }
 0x9aa   : > { %v1030_v61 = vpop.f32.mrb[8].mxu0 }
 0x9ab   : > { %1179 = vrot.lane.b32.xlu1 %v1030_v61, %s1859_s22  ;;  %v1680_v62 = vpop.f32.mrb[9].mxu0 }
 0x9ac   : > { %v1033_v63 = vpop.f32.mrb[10].mxu0 }
 0x9ad   : > { %v1681_v2 = vpop.f32.mrb[11].mxu0 }
 0x9b0   : > { %v1168_v3 = vpop.f32.mrb[16].mxu1 }
 0x9b1   : > { %1183 = vrot.lane.b32.xlu1 %v1168_v3, %s1860_s23  ;;  %v1691_v4 = vpop.f32.mrb[17].mxu1 }
 0x9b2   : > { %v1171_v5 = vpop.f32.mrb[18].mxu1 }
 0x9b3   : > { %v1692_v6 = vpop.f32.mrb[19].mxu1 }
 0xa1d   : > { %v1180_v8 = vpop.permute.xlu1 %1179 }
 0xa1e   : > { %v1188_v11 = vsel %vm1187_vm8, %v1186_v10, %v1180_v8 }
 0xa23   : > { %v1184_v12 = vpop.permute.xlu1 %1183 }
 0xa24   : > { %v1190_v13 = vsel %vm1189_vm9, %v1188_v11, %v1184_v12 }
 0xa25   : > { %v1191_v14 = vpack.c.bf16 %v1190_v13, %v1190_v13 }
 0xa27   : > { %1702 = vmatmul.mubr.msk.bf16.vlgmr.msra.gmra.mrb[12].mxu0 %vm569_vm1, %v1191_v14  ;;  %1714 = vmatmul.mubr.msk.bf16.vlgmr.msra.gmra.mrb[20].mxu1 %vm569_vm1, %v1191_v14 }
 0xa28   : > { %1718 = vmatpush3.bf16.msra.mxu0 %v1360_v15  ;;  %1719 = vmatprep.mubr.msk.bf16.mxu0 %vm1855_vm2, %v1854_v26 }
 0xafa   : > { %v1268_v16 = vpop.f32.mrb[12].mxu0  ;;  %v1340_v17 = vpop.f32.mrb[20].mxu1 }
 0xafb   : > { %v1346_v18 = vpack.c.bf16 %v1340_v17, %v1340_v17  ;;  %v1703_v1 = vpop.f32.mrb[13].mxu0  ;;  %v1715_v19 = vpop.f32.mrb[21].mxu1  ;;  %v1269_v27 = vadd.f32 %v1602_v24, %v1268_v16 }
 0xafc   : > { %v1271_v20 = vpop.f32.mrb[14].mxu0  ;;  %v1343_v21 = vpop.f32.mrb[22].mxu1 }
 0xafd   : > { %v1704_v22 = vpop.f32.mrb[15].mxu0  ;;  %v1716_v23 = vpop.f32.mrb[23].mxu1  ;;  %1720 = vmatmul.mubr.msk.bf16.vlgmr.msra.gmra.mrb[16].mxu0 %vm1354_vm11, %v1346_v18 }
 0xbd0   : > { %v1396_v25 = vpop.f32.mrb[16].mxu0 }
 0xbd1   : > { %v1402_v26 = vmul.f32 2.0, %v1396_v25  ;;  %v1721_v28 = vpop.f32.mrb[17].mxu0 }
 0xbd2   : > { %v1399_v29 = vpop.f32.mrb[18].mxu0 }
 0xbd3   : > { %v1403_v30 = vadd.f32 %v1402_v26, %v1269_v27  ;;  %v1722_v31 = vpop.f32.mrb[19].mxu0 }
 0xbd5   : > { %v1404_v32 = vadd.f32 %v1403_v30, %v1957_v0 }
 0xbd7   : > { %1405 = vst.msk [vmem:[%s474_s30] sm:$0x1f] %vm477_vm0, %v1404_v32 }
 0xbd8 PF: > { %s19_s13 = sadd.s32 1, %s1851_s13   ;;  %s2126_s30 = smov %s1843_s11 }
 0xbd9   : > { %p16_p7 = scmp.ge.s32.totalorder %s19_s13, 8   ;;  %s2127_s10 = smov %s1847_s12 }
 0xbda   : > { %s2128_s11 = smov %s2131_s14  ;;  %s2129_s12 = smov %s2135_s15 }
 0xbdb   :  { %18 = sbr.rel (!%p16_p7) target bundleno = 3 (0x3), region = 104 }

// kernel: multi_expert_clip_forward.21
= control target key start
LH: loop header
LB: loop body
LE: loop exit
PB: predicated region body
PF: predicated region fallthrough
CT: control target
= control target key end

     0   :  { %vm29_vm0 = vcmask 261120   ;;  %v361_v15 = vmov 0.0   ;;  %vm362_vm1 = vmmov 0   ;;  %s474_s0 = inlined_call_operand.vmem [shape: f32[16,32], index: 0, kind: input, shape index: {}]   ;;  %s475_s3 = inlined_call_operand.vmem [shape: bf16[32,128], index: 3, kind: input, shape index: {}]   ;;  %s476_s1 = inlined_call_operand.vmem [shape: f32[1,32], index: 1, kind: input, shape index: {}]   ;;  %s477_s2 = inlined_call_operand.vmem [shape: f32[1,32], index: 2, kind: input, shape index: {}]   ;;  %s478_s5 = inlined_call_operand.vmem [shape: bf16[128,32], index: 5, kind: input, shape index: {}]   ;;  %s479_s4 = inlined_call_operand.vmem [shape: f32[1,128], index: 4, kind: input, shape index: {}]   ;;  %s480_s6 = inlined_call_operand.vmem [shape: f32[1,32], index: 6, kind: input, shape index: {}]   ;;  %s481_s7 = inlined_call_operand.vmem [shape: f32[16,32], index: 7, kind: output, shape index: {}]  }
   0x1   :  { %v406_v0 = vld [vmem:[%s474_s0] sm:$0xff]  ;;  %v411_v1 = vld [vmem:[%s474_s0 + $0x8] sm:$0xff]  ;;  %309 = vmatprep.subr.bf16.mxu0 %v361_v15  ;;  %317 = vmatprep.subr.bf16.mxu1 %v361_v15  ;;  %v343_v36 = vld [vmem:[%s478_s5 + $0x10] sm:$0xff]  }
   0x2   :  { %v30_v2 = vsel %vm29_vm0, %v406_v0, 0.0  ;;  %v33_v3 = vsel %vm29_vm0, %v411_v1, 0.0  ;;  %v339_v14 = vld [vmem:[%s475_s3] sm:$0xff]   ;;  %v340_v16 = vld [vmem:[%s475_s3 + $0x8] sm:$0xff]   ;;  %313 = vmatprep.mubr.msk.bf16.mxu0 %vm362_vm1, %v361_v15  ;;  %333 = vmatprep.mubr.msk.bf16.mxu1 %vm362_vm1, %v361_v15  ;;  %v344_v37 = vld [vmem:[%s478_s5 + $0x18] sm:$0xff]  }
   0x3   :  { %31 = vadd.xlane.f32.xlu0 %v30_v2  ;;  %310 = vmatpush3.bf16.msra.mxu0 %v339_v14  ;;  %v280_v25 = vld [vmem:[%s476_s1] ss:$0 sm:$0xff]  ;;  %v342_v35 = vld [vmem:[%s478_s5 + $0x8] sm:$0xff]   ;;  %v347_v40 = vld [vmem:[%s478_s5 + $0x30] sm:$0xff]  }
   0x4   :  { %311 = vmatprep.subr.bf16.mxu0 %v361_v15  ;;  %v281_v29 = vld [vmem:[%s477_s2] ss:$0 sm:$0xff]  ;;  %v346_v39 = vld [vmem:[%s478_s5 + $0x28] sm:$0xff]   ;;  %v348_v41 = vld [vmem:[%s478_s5 + $0x38] sm:$0xff]  }
   0x5   :  { %v341_v34 = vld [vmem:[%s478_s5] sm:$0xff]  }
   0x6   :  { %318 = vmatpush3.bf16.msra.mxu1 %v341_v34  ;;  %v345_v38 = vld [vmem:[%s478_s5 + $0x20] sm:$0xff]  }
   0x7   :  { %34 = vadd.xlane.f32.xlu0 %v33_v3  ;;  %312 = vmatpush3.bf16.msra.mxu0 %v340_v16  ;;  %v282_v42 = vld [vmem:[%s479_s4] ss:$0 sm:$0xff] }
   0x8   :  { %319 = vmatprep.subr.bf16.mxu1 %v361_v15  ;;  %v288_v62 = vld [vmem:[%s480_s6] ss:$0 sm:$0xff] }
   0xa   :  { %320 = vmatpush3.bf16.msra.mxu1 %v342_v35 }
   0xb   :  { %321 = vmatprep.subr.bf16.mxu1 %v361_v15 }
   0xe   :  { %322 = vmatpush3.bf16.msra.mxu1 %v343_v36 }
   0xf   :  { %323 = vmatprep.subr.bf16.mxu1 %v361_v15 }
  0x12   :  { %324 = vmatpush3.bf16.msra.mxu1 %v344_v37 }
  0x13   :  { %325 = vmatprep.subr.bf16.mxu1 %v361_v15 }
  0x16   :  { %326 = vmatpush3.bf16.msra.mxu1 %v345_v38 }
  0x17   :  { %327 = vmatprep.subr.bf16.mxu1 %v361_v15 }
  0x1a   :  { %328 = vmatpush3.bf16.msra.mxu1 %v346_v39 }
  0x1b   :  { %329 = vmatprep.subr.bf16.mxu1 %v361_v15 }
  0x1e   :  { %330 = vmatpush3.bf16.msra.mxu1 %v347_v40 }
  0x1f   :  { %331 = vmatprep.subr.bf16.mxu1 %v361_v15 }
  0x22   :  { %332 = vmatpush3.bf16.msra.mxu1 %v348_v41 }
  0x90   :  { %v32_v4 = vpop.xlane.xlu0 %31 }
  0x91   :  { %v37_v5 = vmul.f32 0.03125, %v32_v4 }
  0x93   :  { %v39_v6 = vsub.f32 %v406_v0, %v37_v5 }
  0x94   :  { %v35_v7 = vpop.xlane.xlu0 %34 }
  0x95   :  { %v38_v8 = vmul.f32 0.03125, %v35_v7  ;;  %v41_v9 = vmul.f32 %v39_v6, %v39_v6 }
  0x97   :  { %v40_v10 = vsub.f32 %v411_v1, %v38_v8  ;;  %v43_v11 = vsel %vm29_vm0, %v41_v9, 0.0 }
  0x98   :  { %44 = vadd.xlane.f32.xlu1 %v43_v11 }
  0x99   :  { %v42_v12 = vmul.f32 %v40_v10, %v40_v10 }
  0x9b   :  { %v46_v13 = vsel %vm29_vm0, %v42_v12, 0.0 }
  0x9c   :  { %47 = vadd.xlane.f32.xlu1 %v46_v13 }
 0x125   :  { %v45_v17 = vpop.xlane.xlu1 %44 }
 0x126   :  { %v49_v18 = vmul.f32 0.03125, %v45_v17 }
 0x128   :  { %v51_v19 = vadd.f32 1e-05, %v49_v18 }
 0x129   :  { %v48_v20 = vpop.xlane.xlu1 %47 }
 0x12a   :  { %349 = vrsqrt.f32 %v51_v19  ;;  %v50_v21 = vmul.f32 0.03125, %v48_v20 }
 0x12c   :  { %v52_v22 = vadd.f32 1e-05, %v50_v21 }
 0x12e   :  { %351 = vrsqrt.f32 %v52_v22 }
 0x134   :  { %v350_v23 = vpop.eup %349 }
 0x135   :  { %v55_v24 = vmul.f32 %v350_v23, %v39_v6 }
 0x137   :  { %v64_v28 = vmul.f32 %v280_v25, %v55_v24 }
 0x138   :  { %v352_v26 = vpop.eup %351 }
 0x139   :  { %v56_v27 = vmul.f32 %v352_v26, %v40_v10  ;;  %v73_v31 = vadd.f32 %v281_v29, %v64_v28 }
 0x13b   :  { %v65_v30 = vmul.f32 %v280_v25, %v56_v27 }
 0x13d   :  { %v74_v32 = vadd.f32 %v281_v29, %v65_v30 }
 0x13f   :  { %v75_v33 = vpack.c.bf16 %v74_v32, %v73_v31 }
 0x141   :  { %314 = vmatmul.mubr.msk.bf16.vlgmr.msra.gmra.mrb[0].mxu0 %vm29_vm0, %v75_v33 }
 0x214   :  { %v136_v43 = vpop.f32.mrb[0].mxu0 }
 0x215   :  { %v137_v44 = vadd.f32 %v282_v42, %v136_v43  ;;  %v315_v45 = vpop.f32.mrb[1].mxu0 }
 0x216   :  { %v139_v46 = vpop.f32.mrb[2].mxu0 }
 0x217   :  { %v286_v47 = vmul.f32 -1.702, %v137_v44  ;;  %v140_v48 = vadd.f32 %v282_v42, %v139_v46  ;;  %v316_v49 = vpop.f32.mrb[3].mxu0 }
 0x219   :  { %v147_v50 = vmul.f32 1.442695, %v286_v47  ;;  %v287_v51 = vmul.f32 -1.702, %v140_v48 }
 0x21b   :  { %353 = vpow2.f32 %v147_v50  ;;  %v149_v52 = vmul.f32 1.442695, %v287_v51 }
 0x21d   :  { %355 = vpow2.f32 %v149_v52 }
 0x225   :  { %v354_v53 = vpop.eup %353 }
 0x226   :  { %v151_v54 = vadd.f32 1.0, %v354_v53 }
 0x227   :  { %v356_v55 = vpop.eup %355 }
 0x228   :  { %357 = vrcp.f32 %v151_v54  ;;  %v152_v56 = vadd.f32 1.0, %v356_v55 }
 0x22a   :  { %359 = vrcp.f32 %v152_v56 }
 0x232   :  { %v358_v57 = vpop.eup %357 }
 0x233   :  { %v157_v59 = vmul.f32 %v358_v57, %v137_v44 }
 0x234   :  { %v360_v58 = vpop.eup %359 }
 0x235   :  { %v158_v60 = vmul.f32 %v360_v58, %v140_v48 }
 0x237   :  { %v159_v61 = vpack.c.bf16 %v158_v60, %v157_v59 }
 0x239   :  { %334 = vmatmul.mubr.bf16.vlgmr.msra.gmra.mrb[0].mxu1 %v159_v61 }
 0x30c   :  { %v265_v63 = vpop.f32.mrb[0].mxu1 }
 0x30d   :  { %v266_v2 = vadd.f32 %v288_v62, %v265_v63  ;;  %v335_v3 = vpop.f32.mrb[1].mxu1 }
 0x30e   :  { %v268_v4 = vpop.f32.mrb[2].mxu1 }
 0x30f   :  { %v272_v5 = vadd.f32 %v266_v2, %v406_v0  ;;  %v269_v6 = vadd.f32 %v288_v62, %v268_v4  ;;  %v336_v7 = vpop.f32.mrb[3].mxu1 }
 0x311   :  { %274 = vst.msk [vmem:[%s481_s7] sm:$0xff] %vm29_vm0, %v272_v5  ;;  %v273_v8 = vadd.f32 %v269_v6, %v411_v1 }
 0x313   :  { %275 = vst.msk [vmem:[%s481_s7 + $0x8] sm:$0xff] %vm29_vm0, %v273_v8 }

// kernel: multi_expert_clip_forward.20
= control target key start
LH: loop header
LB: loop body
LE: loop exit
PB: predicated region body
PF: predicated region fallthrough
CT: control target
= control target key end

     0   :  { %s1178_s24 = smov 0   ;;  %s1180_s25 = smov 0   ;;  %s1287_s0 = inlined_call_operand.vmem [shape: f32[1,2,8,32], index: 0, kind: input, shape index: {}]   ;;  %s1288_s1 = inlined_call_operand.vmem [shape: f32[1,32], index: 1, kind: input, shape index: {}]   ;;  %s1289_s2 = inlined_call_operand.vmem [shape: f32[1,32], index: 2, kind: input, shape index: {}]   ;;  %s1290_s3 = inlined_call_operand.vmem [shape: bf16[1,32,96], index: 3, kind: input, shape index: {}]   ;;  %s1291_s4 = inlined_call_operand.vmem [shape: f32[1,1,96], index: 4, kind: input, shape index: {}]   ;;  %s1292_s5 = inlined_call_operand.vmem [shape: bf16[1,32,32], index: 5, kind: input, shape index: {}]   ;;  %s1293_s6 = inlined_call_operand.vmem [shape: f32[1,1,32], index: 6, kind: input, shape index: {}]   ;;  %s1294_s7 = inlined_call_operand.vmem [shape: f32[1,2,8,32], index: 7, kind: output, shape index: {}]  }
   0x1   :  { %s1182_s26 = smov 0  }
   0x2 LB: > { %s26_s27 = sadd.s32 1, %s1124_s25  ;;  %p987_p0 = scmp.ge.s32.totalorder %s1128_s26, 1  ;;  %s1128_s26 = sphi %s1182_s26, %s17_s26   ;;  %s1124_s25 = sphi %s1180_s25, %s1296_s25   ;;  %s1120_s24 = sphi %s1178_s24, %s1295_s24  }
   0x3   : > { %p27_p1 = scmp.ge.s32.totalorder %s26_s27, 2  ;;  %p292_p2 = scmp.lt.s32.totalorder %s1128_s26, 3 }
   0x5   : > { %s1298_s27 = smov (%p27_p1, %s26_s27), 0  ;;  %p293_p3 = pnand %p987_p0, %p292_p2 }
   0x6   : > { %p348_p4 = scmp.lt.s32.totalorder (!%p293_p3), %s1120_s24, 1  ;;  %vm380_vm0 = vcmask (!%p293_p3), 261120   ;;  %v1092_v7 = vld [vmem:[%s1290_s3] sm:$0xff] (!%p293_p3)   ;;  %v1130_v8 = vmov (!%p293_p3), 0.0   ;;  %vm1131_vm1 = vmmov (!%p293_p3), 0   ;;  %v1093_v9 = vld [vmem:[%s1290_s3 + $0x8] sm:$0xff] (!%p293_p3)   ;;  %v479_v28 = vlaneseq (!%p293_p3) }
   0x7   : > { %296 = sbr.rel (%p293_p3) target bundleno = 2278 (0x8e6), region = 48  ;;  %1022 = vmatprep.subr.bf16.mxu0 (!%p293_p3), %v1130_v8  ;;  %1026 = vmatprep.mubr.msk.bf16.mxu0 (!%p293_p3), %vm1131_vm1, %v1130_v8  ;;  %v990_v14 = vld [vmem:[%s1288_s1] ss:$0 sm:$0xff] (!%p293_p3)  ;;  %s1132_s19 = smov (!%p293_p3), 96   ;;  %vm486_vm2 = vcmask (!%p293_p3), 130048   ;;  %vm564_vm4 = vcmask (!%p293_p3), 64512  }
   0x8   : > { %1023 = vmatpush3.bf16.msra.mxu0 (!%p293_p3), %v1092_v7  ;;  %1030 = vmatprep.subr.mxu1 (!%p293_p3), %v1130_v8  ;;  %v991_v16 = vld [vmem:[%s1289_s2] ss:$0 sm:$0xff] (!%p293_p3)  ;;  %v480_v29 = vshrl.u32 (!%p293_p3), %v479_v28, 7  ;;  %v482_v30 = vand.u32 (!%p293_p3), 127, %v479_v28  ;;  %s1133_s20 = smov (!%p293_p3), 64   ;;  %s1134_s21 = smov (!%p293_p3), 80  }
   0x9   : > { %1024 = vmatprep.subr.bf16.mxu0 (!%p293_p3), %v1130_v8  ;;  %1032 = vmatprep.mubr.msk.f32.mxu1 (!%p293_p3), %vm1131_vm1, %v1130_v8  ;;  %v992_v20 = vld [vmem:[%s1291_s4] ss:$0 sm:$0xff] (!%p293_p3)  ;;  %s1135_s22 = smov (!%p293_p3), 112   ;;  %vm584_vm5 = vcmask (!%p293_p3), 1043456   ;;  %s1136_s23 = smov (!%p293_p3), 48  }
   0xa   : > { %vm562_vm3 = vcmp.gt.s32.totalorder (!%p293_p3), %v482_v30, %v480_v29  ;;  %s1137_s10 = smov (!%p293_p3), 16  }
   0xc   : > { %1025 = vmatpush3.bf16.msra.mxu0 (!%p293_p3), %v1093_v9 }
   0xd   : > { %1052 = vmatprep.subr.bf16.mxu0 (!%p293_p3), %v1130_v8 }
   0xe   : > { %s1300_s24 = smov (!%p348_p4, %s1120_s24), 1 }
   0xf   : > { %s988_s28 = sshll.u32 %s1300_s24, 3 }
  0x10   : > { %s353_s8 = scalar_lea.vmem %s1287_s0, %s988_s28  ;;  %s377_s15 = scalar_lea.vmem %s1294_s7, %s988_s28 }
  0x11   : > { %v1204_v0 = vld [vmem:[%s353_s8] sm:$0xff] }
  0x12   : > { %v381_v1 = vsel %vm380_vm0, %v1204_v0, 0.0 }
  0x13   : > { %382 = vadd.xlane.f32.xlu0 %v381_v1 }
  0xa0   : > { %v383_v2 = vpop.xlane.xlu0 %382 }
  0xa1   : > { %v385_v3 = vmul.f32 0.03125, %v383_v2 }
  0xa3   : > { %v386_v4 = vsub.f32 %v1204_v0, %v385_v3 }
  0xa5   : > { %v387_v5 = vmul.f32 %v386_v4, %v386_v4 }
  0xa7   : > { %v388_v6 = vsel %vm380_vm0, %v387_v5, 0.0  ;;  %v1094_v5 = vld [vmem:[%s1292_s5] sm:$0xff]  }
  0xa8   : > { %389 = vadd.xlane.f32.xlu0 %v388_v6  ;;  %v1095_v6 = vld [vmem:[%s1292_s5 + $0x8] sm:$0xff]  }
 0x135   : > { %v390_v10 = vpop.xlane.xlu0 %389 }
 0x136   : > { %v391_v11 = vmul.f32 0.03125, %v390_v10 }
 0x138   : > { %v392_v12 = vadd.f32 1e-05, %v391_v11 }
 0x13a   : > { %1096 = vrsqrt.f32 %v392_v12 }
 0x144   : > { %v1097_v13 = vpop.eup %1096 }
 0x145   : > { %v394_v15 = vmul.f32 %v1097_v13, %v386_v4 }
 0x147   : > { %v402_v17 = vmul.f32 %v990_v14, %v394_v15  ;;  %v1002_v15 = vld [vmem:[%s1293_s6] ss:$0 sm:$0xff] }
 0x149   : > { %v410_v18 = vadd.f32 %v991_v16, %v402_v17 }
 0x14b   : > { %v411_v19 = vpack.c.bf16 %v410_v18, %v410_v18 }
 0x14d   : > { %1027 = vmatmul.mubr.msk.bf16.vlgmr.msra.gmra.mrb[0].mxu0 %vm380_vm0, %v411_v19 }
 0x14e   : > { %1056 = vmatprep.mubr.msk.bf16.mxu0 %vm1131_vm1, %v1130_v8  ;;  %1053 = vmatpush3.bf16.msra.mxu0 %v1094_v5 }
 0x14f   : > { %1054 = vmatprep.subr.bf16.mxu0 %v1130_v8 }
 0x152   : > { %1055 = vmatpush3.bf16.msra.mxu0 %v1095_v6 }
 0x220   : > { %v472_v21 = vpop.f32.mrb[0].mxu0 }
 0x221   : > { %v473_v22 = vadd.f32 %v992_v20, %v472_v21  ;;  %v1028_v23 = vpop.f32.mrb[1].mxu0 }
 0x222   : > { %v475_v24 = vpop.f32.mrb[2].mxu0 }
 0x223   : > { %484 = vrot.lane.b32.xlu1 %v473_v22, %s1132_s19  ;;  %v1029_v25 = vpop.f32.mrb[3].mxu0  ;;  %v478_v27 = vmul.f32 0.25, %v473_v22  ;;  %v577_v40 = vpack.c.bf16 %v473_v22, %v473_v22 }
 0x295   : > { %v485_v26 = vpop.permute.xlu1 %484 }
 0x296   : > { %1031 = vmatpush3.xpose.msk.msra.mxu1 %vm486_vm2, %v485_v26 }
 0x297   : > { %1035 = vmatprep.subr.bf16.mxu1 %v1130_v8 }
 0x299   : > { %1033 = vmatmul.mubr.msk.f32.vlgmr.msra.gmra.mrb[0].mxu1 %vm486_vm2, %v478_v27 }
 0x29a   : > { %1037 = vmatprep.mubr.msk.bf16.mxu1 %vm1131_vm1, %v1130_v8 }
 0x36c   : > { %v558_v31 = vpop.f32.mrb[0].mxu1 }
 0x36d   : > { %v563_v32 = vsel %vm562_vm3, -1e+09, %v558_v31  ;;  %v1034_v33 = vpop.f32.mrb[1].mxu1 }
 0x36e   : > { %v565_v34 = vsel %vm564_vm4, %v563_v32, -inf }
 0x36f   : > { %566 = vmax.xlane.f32.xlu1 %v565_v34 }
 0x3fc   : > { %v567_v35 = vpop.xlane.xlu1 %566 }
 0x3fd   : > { %v568_v36 = vsub.f32 %v563_v32, %v567_v35 }
 0x3ff   : > { %v569_v37 = vmul.f32 1.442695, %v568_v36 }
 0x401   : > { %1098 = vpow2.f32 %v569_v37 }
 0x40b   : > { %v1099_v38 = vpop.eup %1098 }
 0x40c   : > { %v571_v39 = vsel %vm564_vm4, %v1099_v38, 0.0 }
 0x40d   : > { %572 = vadd.xlane.f32.xlu0 %v571_v39 }
 0x423   : > { %579 = vrot.lane.b32.xlu0 %v577_v40, %s1133_s20 }
 0x427   : > { %630 = vrot.lane.b32.xlu0 %v473_v22, %s1134_s21 }
 0x42b   : > { %628 = vrot.lane.b32.xlu0 %v478_v27, %s1135_s22 }
 0x49a   : > { %v573_v41 = vpop.xlane.xlu0 %572 }
 0x49b   : > { %1100 = vrcp.f32 %v573_v41 }
 0x49e   : > { %v580_v42 = vpop.permute.xlu0 %579 }
 0x49f   : > { %v586_v43 = vsel %vm584_vm5, %v580_v42, 0 }
 0x4a0   : > { %1036 = vmatpush3.bf16.msra.mxu1 %v586_v43 }
 0x4a1   : > { %1041 = vmatprep.subr.mxu1 %v1130_v8 }
 0x4a2   : > { %v631_v47 = vpop.permute.xlu0 %630 }
 0x4a5   : > { %v1101_v44 = vpop.eup %1100 }
 0x4a6   : > { %v575_v45 = vmul.f32 %v1101_v44, %v1099_v38  ;;  %v629_v48 = vpop.permute.xlu0 %628 }
 0x4a8   : > { %v576_v46 = vpack.c.bf16 %v575_v45, %v575_v45 }
 0x4aa   : > { %1038 = vmatmul.mubr.msk.bf16.vlgmr.msra.gmra.mrb[4].mxu1 %vm564_vm4, %v576_v46 }
 0x4ab   : > { %1042 = vmatpush3.xpose.msk.msra.mxu1 %vm486_vm2, %v631_v47  ;;  %1043 = vmatprep.mubr.msk.f32.mxu1 %vm1131_vm1, %v1130_v8 }
 0x4ac   : > { %1046 = vmatprep.subr.bf16.mxu1 %v1130_v8 }
 0x4b2   : > { %1044 = vmatmul.mubr.msk.f32.vlgmr.msra.gmra.mrb[2].mxu1 %vm486_vm2, %v629_v48 }
 0x4b3   : > { %1048 = vmatprep.mubr.msk.bf16.mxu1 %vm1131_vm1, %v1130_v8 }
 0x57d   : > { %v622_v49 = vpop.f32.mrb[4].mxu1 }
 0x57e   : > { %v1039_v50 = vpop.f32.mrb[5].mxu1 }
 0x57f   : > { %v625_v51 = vpop.f32.mrb[6].mxu1 }
 0x580   : > { %v1040_v52 = vpop.f32.mrb[7].mxu1 }
 0x585   : > { %v702_v53 = vpop.f32.mrb[2].mxu1 }
 0x586   : > { %v706_v54 = vsel %vm562_vm3, -1e+09, %v702_v53  ;;  %v1045_v55 = vpop.f32.mrb[3].mxu1 }
 0x587   : > { %v707_v56 = vsel %vm564_vm4, %v706_v54, -inf }
 0x588   : > { %708 = vmax.xlane.f32.xlu1 %v707_v56 }
 0x599   : > { %719 = vrot.lane.b32.xlu1 %v577_v40, %s1136_s23 }
 0x615   : > { %v709_v57 = vpop.xlane.xlu1 %708 }
 0x616   : > { %v710_v58 = vsub.f32 %v706_v54, %v709_v57 }
 0x618   : > { %v711_v59 = vmul.f32 1.442695, %v710_v58 }
 0x619   : > { %v720_v60 = vpop.permute.xlu1 %719 }
 0x61a   : > { %1102 = vpow2.f32 %v711_v59  ;;  %v725_v61 = vsel %vm584_vm5, %v720_v60, 0 }
 0x61b   : > { %1047 = vmatpush3.bf16.msra.mxu1 %v725_v61 }
 0x624   : > { %v1103_v62 = vpop.eup %1102 }
 0x625   : > { %v713_v63 = vsel %vm564_vm4, %v1103_v62, 0.0 }
 0x626   : > { %714 = vadd.xlane.f32.xlu0 %v713_v63 }
 0x6b3   : > { %v715_v1 = vpop.xlane.xlu0 %714 }
 0x6b4   : > { %1104 = vrcp.f32 %v715_v1 }
 0x6be   : > { %v1105_v2 = vpop.eup %1104 }
 0x6bf   : > { %v717_v3 = vmul.f32 %v1105_v2, %v1103_v62 }
 0x6c1   : > { %v718_v4 = vpack.c.bf16 %v717_v3, %v717_v3 }
 0x6c3   : > { %1049 = vmatmul.mubr.msk.bf16.vlgmr.msra.gmra.mrb[8].mxu1 %vm564_vm4, %v718_v4 }
 0x796   : > { %v761_v7 = vpop.f32.mrb[8].mxu1 }
 0x797   : > { %768 = vrot.lane.b32.xlu1 %v761_v7, %s1137_s10  ;;  %v1050_v9 = vpop.f32.mrb[9].mxu1 }
 0x798   : > { %v764_v10 = vpop.f32.mrb[10].mxu1 }
 0x799   : > { %v1051_v11 = vpop.f32.mrb[11].mxu1 }
 0x809   : > { %v769_v12 = vpop.permute.xlu1 %768 }
 0x80a   : > { %v771_v13 = vsel %vm486_vm2, %v622_v49, %v769_v12 }
 0x80b   : > { %v772_v14 = vpack.c.bf16 %v771_v13, %v771_v13 }
 0x80d   : > { %1057 = vmatmul.mubr.msk.bf16.vlgmr.msra.gmra.mrb[4].mxu0 %vm380_vm0, %v772_v14 }
 0x8e0   : > { %v833_v16 = vpop.f32.mrb[4].mxu0 }
 0x8e1   : > { %v834_v8 = vadd.f32 %v1002_v15, %v833_v16  ;;  %v1058_v17 = vpop.f32.mrb[5].mxu0 }
 0x8e2   : > { %v836_v18 = vpop.f32.mrb[6].mxu0 }
 0x8e3   : > { %v839_v19 = vadd.f32 %v834_v8, %v1204_v0  ;;  %v1059_v20 = vpop.f32.mrb[7].mxu0 }
 0x8e5   : > { %840 = vst.msk [vmem:[%s377_s15] sm:$0xff] %vm380_vm0, %v839_v19 }
 0x8e6 PF: > { %s17_s26 = sadd.s32 1, %s1128_s26   ;;  %s1295_s24 = smov %s1124_s25 }
 0x8e7   : > { %p14_p5 = scmp.ge.s32.totalorder %s17_s26, 4   ;;  %s1296_s25 = smov %s1298_s27 }
 0x8e9   :  { %16 = sbr.rel (!%p14_p5) target bundleno = 2 (0x2), region = 90 }

// kernel: multi_expert_clip_forward.24
= control target key start
LH: loop header
LB: loop body
LE: loop exit
PB: predicated region body
PF: predicated region fallthrough
CT: control target
= control target key end

     0   :  { %vm19_vm0 = vcmask 254976   ;;  %v138_v8 = vmov 0.0   ;;  %vm139_vm1 = vmmov 0   ;;  %vm67_vm2 = vcmask 261120   ;;  %s186_s0 = inlined_call_operand.vmem [shape: f32[2,32], index: 0, kind: input, shape index: {}]   ;;  %s187_s3 = inlined_call_operand.vmem [shape: bf16[32,32], index: 3, kind: input, shape index: {}]   ;;  %s188_s1 = inlined_call_operand.vmem [shape: f32[1,32], index: 1, kind: input, shape index: {}]   ;;  %s189_s2 = inlined_call_operand.vmem [shape: f32[1,32], index: 2, kind: input, shape index: {}]   ;;  %s190_s4 = inlined_call_operand.vmem [shape: f32[2,32], index: 4, kind: output, shape index: {}]  }
   0x1   :  { %v18_v0 = vld [vmem:[%s186_s0] sm:$0x3]  ;;  %124 = vmatprep.subr.bf16.mxu0 %v138_v8  ;;  %v135_v9 = vld [vmem:[%s187_s3 + $0x8] sm:$0xff]   ;;  %128 = vmatprep.mubr.msk.bf16.mxu0 %vm139_vm1, %v138_v8 }
   0x2   :  { %v20_v1 = vsel %vm19_vm0, %v18_v0, 0.0  ;;  %v134_v7 = vld [vmem:[%s187_s3] sm:$0xff]  }
   0x3   :  { %21 = vadd.xlane.f32.xlu0 %v20_v1  ;;  %125 = vmatpush3.bf16.msra.mxu0 %v134_v7  ;;  %v116_v14 = vld [vmem:[%s188_s1] ss:$0 sm:$0xff] }
   0x4   :  { %126 = vmatprep.subr.bf16.mxu0 %v138_v8  ;;  %v117_v16 = vld [vmem:[%s189_s2] ss:$0 sm:$0xff] }
   0x7   :  { %127 = vmatpush3.bf16.msra.mxu0 %v135_v9 }
  0x90   :  { %v22_v2 = vpop.xlane.xlu0 %21 }
  0x91   :  { %v24_v3 = vmul.f32 0.03125, %v22_v2 }
  0x93   :  { %v25_v4 = vsub.f32 %v18_v0, %v24_v3 }
  0x95   :  { %v26_v5 = vmul.f32 %v25_v4, %v25_v4 }
  0x97   :  { %v27_v6 = vsel %vm19_vm0, %v26_v5, 0.0 }
  0x98   :  { %28 = vadd.xlane.f32.xlu0 %v27_v6 }
 0x125   :  { %v29_v10 = vpop.xlane.xlu0 %28 }
 0x126   :  { %v30_v11 = vmul.f32 0.03125, %v29_v10 }
 0x128   :  { %v31_v12 = vadd.f32 1e-05, %v30_v11 }
 0x12a   :  { %136 = vrsqrt.f32 %v31_v12 }
 0x134   :  { %v137_v13 = vpop.eup %136 }
 0x135   :  { %v33_v15 = vmul.f32 %v137_v13, %v25_v4 }
 0x137   :  { %v41_v17 = vmul.f32 %v116_v14, %v33_v15 }
 0x139   :  { %v49_v18 = vadd.f32 %v117_v16, %v41_v17 }
 0x13b   :  { %v50_v19 = vpack.c.bf16 %v49_v18, %v49_v18 }
 0x13d   :  { %129 = vmatmul.mubr.msk.bf16.vlgmr.msra.gmra.mrb[0].mxu0 %vm67_vm2, %v50_v19 }
 0x210   :  { %v105_v20 = vpop.f32.mrb[0].mxu0 }
 0x211   :  { %111 = vst.msk [vmem:[%s190_s4] sm:$0x3] %vm19_vm0, %v105_v20  ;;  %v130_v21 = vpop.f32.mrb[1].mxu0 }
 0x212   :  { %v108_v22 = vpop.f32.mrb[2].mxu0 }
 0x213   :  { %v131_v23 = vpop.f32.mrb[3].mxu0 }

// kernel: multi_expert_clip_forward.25
= control target key start
LH: loop header
LB: loop body
LE: loop exit
PB: predicated region body
PF: predicated region fallthrough
CT: control target
= control target key end

     0   :  { %vm23_vm0 = vcmask 254976   ;;  %vm15_vm1 = vcmask 259072   ;;  %v101_v6 = vmov 0.0   ;;  %vm102_vm2 = vmmov 0   ;;  %s127_s1 = inlined_call_operand.vmem [shape: f32[2,32], index: 1, kind: input, shape index: {}]   ;;  %s128_s0 = inlined_call_operand.vmem [shape: f32[6,32], index: 0, kind: input, shape index: {}]   ;;  %s129_s2 = inlined_call_operand.vmem [shape: f32[6,2], index: 2, kind: output, shape index: {}]  }
   0x1   :  { %v13_v0 = vld [vmem:[%s127_s1] sm:$0x3]  ;;  %89 = vmatprep.subr.bf16.mxu0 %v101_v6  ;;  %91 = vmatprep.mubr.msk.bf16.mxu0 %vm102_vm2, %v101_v6  ;;  %vm32_vm3 = vcmask 261120   ;;  %vm80_vm4 = vcmask 13312  }
   0x2   :  { %v12_v1 = vld [vmem:[%s128_s0] sm:$0x3f]  ;;  %v22_v2 = vmul.f32 %v13_v0, %v13_v0 }
   0x3   :  { %v14_v3 = vmul.f32 %v12_v1, %v12_v1 }
   0x4   :  { %v24_v4 = vsel %vm23_vm0, %v22_v2, 0.0 }
   0x5   :  { %25 = vadd.xlane.f32.xlu0 %v24_v4  ;;  %v16_v5 = vsel %vm15_vm1, %v14_v3, 0.0 }
   0x9   :  { %17 = vadd.xlane.f32.xlu0 %v16_v5 }
  0x92   :  { %v26_v7 = vpop.xlane.xlu0 %25 }
  0x93   :  { %v27_v8 = vadd.f32 1e-12, %v26_v7 }
  0x95   :  { %97 = vrsqrt.f32 %v27_v8 }
  0x96   :  { %v18_v9 = vpop.xlane.xlu0 %17 }
  0x97   :  { %v19_v10 = vadd.f32 1e-12, %v18_v9 }
  0x99   :  { %99 = vrsqrt.f32 %v19_v10 }
  0x9f   :  { %v98_v11 = vpop.eup %97 }
  0xa0   :  { %v29_v12 = vmul.f32 %v98_v11, %v13_v0 }
  0xa2   :  { %v31_v13 = vpack.c.bf16 %v29_v12, %v29_v12 }
  0xa3   :  { %v100_v14 = vpop.eup %99 }
  0xa4   :  { %v37_v15 = vsel %vm32_vm3, %v31_v13, 0  ;;  %v21_v16 = vmul.f32 %v100_v14, %v12_v1 }
  0xa5   :  { %90 = vmatpush3.bf16.xpose.msra.mxu0 %v37_v15 }
  0xa6   :  { %v30_v17 = vpack.c.bf16 %v21_v16, %v21_v16 }
  0xac   :  { %92 = vmatmul.mubr.msk.bf16.vlgmr.msra.gmra.mrb[0].mxu0 %vm32_vm3, %v30_v17 }
 0x17f   :  { %v73_v18 = vpop.f32.mrb[0].mxu0 }
 0x180   :  { %v79_v19 = vmul.f32 14.285714, %v73_v18  ;;  %v93_v20 = vpop.f32.mrb[1].mxu0 }
 0x181   :  { %v76_v21 = vpop.f32.mrb[2].mxu0 }
 0x182   :  { %81 = vst.msk [vmem:[%s129_s2] sm:$0x3f] %vm80_vm4, %v79_v19  ;;  %v94_v22 = vpop.f32.mrb[3].mxu0 }

</bundles_post_ra>
